<compile_context>
chip_gen: v5e
topology: v5e:2x2
jax: 0.10.0
libtpu: 0.0.40
codegen_flags: <defaults>
</compile_context>

<pallas_src>
import math

import jax
import jax.numpy as jnp
from jax.experimental import pallas as pl
from jax.experimental.pallas import tpu as pltpu


def _round_up(x, m):
    return ((x + m - 1) // m) * m


def _pick_tt(T):
    """Timesteps processed per grid iteration of the recurrent kernel."""
    if T <= 8:
        return T
    for cand in (8, 4, 2):
        if T % cand == 0:
            return cand
    return 1  # awkward (prime) T: falls back to one step per grid iteration


_TORCH_GATE_ORDER = ("i", "f", "g", "o")    # nn.LSTMCell stacking order
_KERNEL_GATE_ORDER = ("i", "f", "o", "g")   # sigmoid gates first, tanh gate last


def _regroup_and_pad_gates(w, H, Hp):
    """[4H, ...] in torch gate order -> [4Hp, ...] in kernel order, zero padded."""
    idx = {name: k for k, name in enumerate(_TORCH_GATE_ORDER)}
    pieces = []
    for name in _KERNEL_GATE_ORDER:
        k = idx[name]
        piece = w[k * H:(k + 1) * H]
        if Hp > H:
            pad_shape = (Hp - H,) + w.shape[1:]
            piece = jnp.concatenate([piece, jnp.zeros(pad_shape, w.dtype)], axis=0)
        pieces.append(piece)
    return jnp.concatenate(pieces, axis=0)


# --------------------------------------------------------------------------
# Kernel A: fused single LSTMCell step (decode / forward() path).
#   gates = [x | h] @ [W_ih^T ; W_hh^T] + b   -- one MXU matmul, no gx tensor.
# --------------------------------------------------------------------------
def _lstm_fused_step_kernel(x_ref, h_ref, c_ref, w_xh_ref, b_ref,
                            h_out_ref, c_out_ref):
    Hp = h_ref.shape[1]
    # Both halves are multiples of 128 lanes -> concat needs no lane splicing.
    xh = jnp.concatenate(
        [x_ref[...].astype(jnp.bfloat16), h_ref[...].astype(jnp.bfloat16)],
        axis=1)
    gates = jnp.dot(xh, w_xh_ref[...],
                    preferred_element_type=jnp.float32) + b_ref[...]
    sig = jax.nn.sigmoid(gates[:, :3 * Hp])
    g_g = jnp.tanh(gates[:, 3 * Hp:])
    i_g = sig[:, 0 * Hp:1 * Hp]
    f_g = sig[:, 1 * Hp:2 * Hp]
    o_g = sig[:, 2 * Hp:3 * Hp]
    c_new = f_g * c_ref[...] + i_g * g_g
    h_new = o_g * jnp.tanh(c_new)
    h_out_ref[...] = h_new
    c_out_ref[...] = c_new


@jax.jit
def lstm_step(x, h_prev, c_prev, w_xh_k, bias_k):
    """One LSTMCell step via the fused kernel. x:[S,I], h/c:[S,H] -> (h,c)."""
    S, I = x.shape
    H = h_prev.shape[1]
    Hp4 = w_xh_k.shape[1]
    Hp = Hp4 // 4
    Ip = w_xh_k.shape[0] - Hp
    Sp = _round_up(S, 8)

    x_p = jnp.pad(x, ((0, Sp - S), (0, Ip - I)))
    h_p = jnp.pad(h_prev, ((0, Sp - S), (0, Hp - H)))
    c_p = jnp.pad(c_prev, ((0, Sp - S), (0, Hp - H)))

    h_new, c_new = pl.pallas_call(
        _lstm_fused_step_kernel,
        out_shape=(jax.ShapeDtypeStruct((Sp, Hp), jnp.float32),
                   jax.ShapeDtypeStruct((Sp, Hp), jnp.float32)),
    )(x_p, h_p, c_p, w_xh_k, bias_k)
    return h_new[:S, :H], c_new[:S, :H]


# --------------------------------------------------------------------------
# Kernel 1: batched input projection  gx = bf16(x @ W_ih^T + (b_ih + b_hh))
#   x tile is cast to bf16 in-kernel; output stored in bf16 to halve the HBM
#   traffic that the recurrence streams every timestep.
# --------------------------------------------------------------------------
def _input_proj_kernel(x_ref, wih_t_ref, b_ref, gx_ref):
    gates = jnp.dot(x_ref[...].astype(jnp.bfloat16), wih_t_ref[...],
                    preferred_element_type=jnp.float32) + b_ref[...]
    gx_ref[...] = gates.astype(jnp.bfloat16)


# --------------------------------------------------------------------------
# Kernel 2: recurrence, TT timesteps per grid iteration, h/c in VMEM scratch.
# --------------------------------------------------------------------------
def _lstm_recurrent_kernel(gx_ref, whh_t_ref, h0_ref, c0_ref,
                           h_seq_ref, c_fin_ref, h_sc, c_sc):
    blk = pl.program_id(0)
    TT = gx_ref.shape[0]
    Hp = h_sc.shape[1]

    @pl.when(blk == 0)
    def _():
        h_sc[...] = h0_ref[...]
        c_sc[...] = c0_ref[...]

    h = h_sc[...]
    c = c_sc[...]
    # TT is a small static constant -> fully unrolled inner loop (the unrolled
    # equivalent of lax.fori_loop(0, TT, ..., unroll=True)).
    for tt in range(TT):
        gates = gx_ref[tt].astype(jnp.float32) + jnp.dot(
            h.astype(jnp.bfloat16), whh_t_ref[...],
            preferred_element_type=jnp.float32)
        # Gate columns are [i | f | o | g], each Hp (multiple of 128) wide:
        # one wide sigmoid + one tanh; every slice boundary is lane-aligned.
        sig = jax.nn.sigmoid(gates[:, :3 * Hp])
        g_g = jnp.tanh(gates[:, 3 * Hp:])
        i_g = sig[:, 0 * Hp:1 * Hp]
        f_g = sig[:, 1 * Hp:2 * Hp]
        o_g = sig[:, 2 * Hp:3 * Hp]
        c = f_g * c + i_g * g_g
        h = o_g * jnp.tanh(c)
        h_seq_ref[tt] = h

    h_sc[...] = h
    c_sc[...] = c

    @pl.when(blk == pl.num_programs(0) - 1)
    def _():
        c_fin_ref[...] = c


@jax.jit
def lstm_forward_seq(x_seq, h0, c0, w_ih_t_k, w_hh_t_k, bias_k):
    """Run T LSTMCell steps. x_seq: [T, S, I]; returns (h_seq[T,S,H], h_T, c_T)."""
    T, S, I = x_seq.shape
    H = h0.shape[1]
    Hp4 = w_ih_t_k.shape[1]
    Hp = Hp4 // 4
    Sp = _round_up(S, 8)
    TT = _pick_tt(T)

    # Zero padding is self-consistent through the LSTM math (padded lanes stay 0).
    x_p = x_seq if Sp == S else jnp.pad(x_seq, ((0, 0), (0, Sp - S), (0, 0)))
    h0_p = jnp.pad(h0, ((0, Sp - S), (0, Hp - H)))
    c0_p = jnp.pad(c0, ((0, Sp - S), (0, Hp - H)))

    # ---- 1) input projection for the whole sequence ------------------------
    # Row tile = TT*Sp rows exactly (TT divides T): no M padding, no post-slice
    # copy; x stays f32 in HBM and is cast to bf16 inside the kernel.
    rows = TT * Sp
    x_flat = x_p.reshape(T * Sp, I)                 # layout-preserving, no copy
    gx_flat = pl.pallas_call(
        _input_proj_kernel,
        out_shape=jax.ShapeDtypeStruct((T * Sp, Hp4), jnp.bfloat16),
        grid=(T // TT,),
        in_specs=[
            pl.BlockSpec((rows, I), lambda m: (m, 0)),
            pl.BlockSpec((I, Hp4), lambda m: (0, 0)),   # W_ih^T resident in VMEM
            pl.BlockSpec((1, Hp4), lambda m: (0, 0)),   # fused bias resident
        ],
        out_specs=pl.BlockSpec((rows, Hp4), lambda m: (m, 0)),
        compiler_params=pltpu.CompilerParams(dimension_semantics=("parallel",)),
    )(x_flat, w_ih_t_k, bias_k)
    gx = gx_flat.reshape(T, Sp, Hp4)                # layout-preserving, no copy

    # ---- 2) recurrence: one kernel call, TT steps per grid iteration --------
    h_seq_p, c_fin_p = pl.pallas_call(
        _lstm_recurrent_kernel,
        out_shape=(
            jax.ShapeDtypeStruct((T, Sp, Hp), jnp.float32),
            jax.ShapeDtypeStruct((Sp, Hp), jnp.float32),
        ),
        grid=(T // TT,),
        in_specs=[
            pl.BlockSpec((TT, Sp, Hp4), lambda b: (b, 0, 0)),  # streamed gate tiles (bf16)
            pl.BlockSpec((Hp, Hp4), lambda b: (0, 0)),         # W_hh^T resident
            pl.BlockSpec((Sp, Hp), lambda b: (0, 0)),          # h0 (read at blk==0)
            pl.BlockSpec((Sp, Hp), lambda b: (0, 0)),          # c0 (read at blk==0)
        ],
        out_specs=(
            pl.BlockSpec((TT, Sp, Hp), lambda b: (b, 0, 0)),
            pl.BlockSpec((Sp, Hp), lambda b: (0, 0)),
        ),
        scratch_shapes=[
            pltpu.VMEM((Sp, Hp), jnp.float32),   # h carry
            pltpu.VMEM((Sp, Hp), jnp.float32),   # c carry
        ],
        compiler_params=pltpu.CompilerParams(dimension_semantics=("arbitrary",)),
    )(gx, w_hh_t_k, h0_p, c0_p)

    h_seq = h_seq_p[:, :S, :H]
    return h_seq, h_seq[T - 1], c_fin_p[:S, :H]


class LSTMEncoder:
    """JAX/Pallas port of model/encoder/LSTMEncoder.LSTMEncoder (forward only)."""

    def __init__(self, params, train=True, key=jax.random.PRNGKey(0)):
        self.num_rollouts = params['num_rollouts'] if train else params['test_rollouts']
        self.batch_size = params['batch_size'] if train else params['test_batch_size']
        self.sample_size = self.batch_size * self.num_rollouts
        self.hidden_size = params['hidden_size']
        self.embedding_size = params['embedding_size']
        self.use_concept_embeddings = params['use_concept_embeddings']
        self.input_size = (2 * self.embedding_size if self.use_concept_embeddings
                           else self.embedding_size)

        H, I = self.hidden_size, self.input_size
        self.Hp = _round_up(max(H, 1), 128)
        self.Ip = _round_up(max(I, 1), 128)
        Hp, Ip = self.Hp, self.Ip

        # nn.LSTMCell-style init: U(-k, k), k = 1/sqrt(H); gate order [i|f|g|o].
        k = 1.0 / math.sqrt(H)
        k_ih, k_hh, k_bih, k_bhh = jax.random.split(key, 4)
        self.w_ih = jax.random.uniform(k_ih, (4 * H, I), jnp.float32, -k, k)
        self.w_hh = jax.random.uniform(k_hh, (4 * H, H), jnp.float32, -k, k)
        b_ih = jax.random.uniform(k_bih, (4 * H,), jnp.float32, -k, k)
        b_hh = jax.random.uniform(k_bhh, (4 * H,), jnp.float32, -k, k)
        self.bias = b_ih + b_hh                                   # [4H] f32

        # Kernel layouts: bf16 weights, gates regrouped to [i|f|o|g], each gate
        # zero-padded to Hp columns; W_hh^T rows zero-padded to Hp.
        w_ih_bf = self.w_ih.astype(jnp.bfloat16)
        w_hh_bf = self.w_hh.astype(jnp.bfloat16)
        self.w_ih_t_k = jnp.transpose(_regroup_and_pad_gates(w_ih_bf, H, Hp))   # [I, 4Hp]
        whh_t = jnp.transpose(_regroup_and_pad_gates(w_hh_bf, H, Hp))           # [H, 4Hp]
        if Hp > H:
            whh_t = jnp.concatenate(
                [whh_t, jnp.zeros((Hp - H, 4 * Hp), whh_t.dtype)], axis=0)
        self.w_hh_t_k = whh_t                                                   # [Hp, 4Hp]
        self.bias_k = _regroup_and_pad_gates(self.bias, H, Hp).reshape(1, 4 * Hp)

        # Stacked weight for the fused single-step kernel:
        #   [ W_ih^T (rows zero-padded to Ip) ; W_hh^T ]  ->  [Ip + Hp, 4Hp]
        wih_t_rows = self.w_ih_t_k
        if Ip > I:
            wih_t_rows = jnp.concatenate(
                [wih_t_rows, jnp.zeros((Ip - I, 4 * Hp), jnp.bfloat16)], axis=0)
        self.w_xh_k = jnp.concatenate([wih_t_rows, self.w_hh_t_k], axis=0)      # [Ip+Hp, 4Hp]

        self.init_state()

    def init_state(self):
        self.history_state = [
            jnp.zeros((self.sample_size, self.hidden_size), jnp.float32)
            for _ in range(2)
        ]

    def beam_update(self, path_idx):
        self.history_state = [s[path_idx, :] for s in self.history_state]

    def forward(self, prev_action_embedding):
        """Single LSTMCell step (matches the torch module's forward) — fused kernel."""
        hx_prev, cx_prev = self.history_state
        hx, cx = lstm_step(prev_action_embedding, hx_prev, cx_prev,
                           self.w_xh_k, self.bias_k)
        self.history_state = [hx, cx]
        return hx

    def forward_sequence(self, x_seq):
        """Fast path: run all T steps with one recurrent kernel. x_seq: [T, S, I]."""
        hx_prev, cx_prev = self.history_state
        if x_seq.shape[0] == 1:
            hx, cx = lstm_step(x_seq[0], hx_prev, cx_prev, self.w_xh_k, self.bias_k)
            h_seq = hx[jnp.newaxis]
        else:
            h_seq, hx, cx = lstm_forward_seq(x_seq, hx_prev, cx_prev,
                                             self.w_ih_t_k, self.w_hh_t_k, self.bias_k)
        self.history_state = [hx, cx]
        return h_seq

    __call__ = forward


def _reference_step(x, h, c, w_ih, w_hh, bias, round_gx=False):
    """Pure-JAX LSTMCell step mirroring the kernel's bf16-matmul / f32-math numerics.

    round_gx=True additionally mirrors the sequence path's bf16 storage of the
    input projection (x @ W_ih^T + b)."""
    bf = lambda a: a.astype(jnp.bfloat16).astype(jnp.float32)
    gx = bf(x) @ bf(w_ih).T + bias
    if round_gx:
        gx = gx.astype(jnp.bfloat16).astype(jnp.float32)
    gates = gx + bf(h) @ bf(w_hh).T
    H = h.shape[1]
    i_g = jax.nn.sigmoid(gates[:, 0 * H:1 * H])
    f_g = jax.nn.sigmoid(gates[:, 1 * H:2 * H])
    g_g = jnp.tanh(gates[:, 2 * H:3 * H])
    o_g = jax.nn.sigmoid(gates[:, 3 * H:4 * H])
    c_new = f_g * c + i_g * g_g
    return o_g * jnp.tanh(c_new), c_new


if __name__ == "__main__":
    params = {
        'num_rollouts': 4,
        'batch_size': 2,
        'hidden_size': 32,
        'embedding_size': 16,
        'use_concept_embeddings': True,   # -> input_size = 32
        'test_rollouts': 4,
        'test_batch_size': 2,
    }

    enc = LSTMEncoder(params, train=True, key=jax.random.PRNGKey(0))
    S, I, H = enc.sample_size, enc.input_size, enc.hidden_size
    T = 8

    x_seq = jax.random.normal(jax.random.PRNGKey(0), (T, S, I), jnp.float32)

    def run_ref(n_steps, round_gx):
        h = jnp.zeros((S, H), jnp.float32)
        c = jnp.zeros_like(h)
        hs = []
        for t in range(n_steps):
            h, c = _reference_step(x_seq[t], h, c, enc.w_ih, enc.w_hh, enc.bias,
                                   round_gx=round_gx)
            hs.append(h)
        return jnp.stack(hs), c

    # Sequence path stores gx in bf16 -> its reference mirrors that rounding.
    ref_h_seq_rg, ref_c_rg = run_ref(T, round_gx=True)
    # Fused single-step path keeps the gate pre-activations in f32 end to end.
    ref_h_seq_ex, _ = run_ref(2, round_gx=False)

    # ---- sequence path (single recurrent kernel dispatch) -------------------
    enc.init_state()
    h_seq = enc.forward_sequence(x_seq)
    h_seq = jax.block_until_ready(h_seq)
    assert h_seq.shape == (T, S, H)
    assert jnp.allclose(h_seq, ref_h_seq_rg, atol=5e-3, rtol=5e-3)
    assert jnp.allclose(enc.history_state[0], ref_h_seq_rg[-1], atol=5e-3, rtol=5e-3)
    assert jnp.allclose(enc.history_state[1], ref_c_rg, atol=5e-3, rtol=5e-3)

    # ---- stateful single-step API (torch forward semantics), two steps ------
    enc.init_state()
    out1 = enc(x_seq[0])
    out2 = enc(x_seq[1])
    out2 = jax.block_until_ready(out2)
    assert out2.shape == (S, H)
    assert jnp.allclose(out1, ref_h_seq_ex[0], atol=5e-3, rtol=5e-3)
    assert jnp.allclose(out2, ref_h_seq_ex[1], atol=5e-3, rtol=5e-3)

    print("KERNEL_OK")
</pallas_src>

<mosaic_0001>
module attributes {stable_mosaic.version = 11 : i64} {
  func.func @_input_proj_kernel(%arg0: i32, %arg1: memref<64x32xf32, #tpu.memory_space<vmem>>, %arg2: memref<32x512xbf16, #tpu.memory_space<vmem>>, %arg3: memref<1x512xf32, #tpu.memory_space<vmem>>, %arg4: memref<64x512xbf16, #tpu.memory_space<vmem>>) attributes {dimension_semantics = [#tpu.dimension_semantics<parallel>], iteration_bounds = array<i64: 1>, scalar_prefetch = 0 : i64, scratch_operands = 0 : i64, tpu.core_type = #tpu.core_type<tc>, window_params = [{transform_indices = @transform_0, window_bounds = array<i64: 64, 32>}, {pipeline_mode = #tpu.pipeline_mode<synchronous>, transform_indices = @transform_1, window_bounds = array<i64: 32, 512>}, {pipeline_mode = #tpu.pipeline_mode<synchronous>, transform_indices = @transform_2, window_bounds = array<i64: 1, 512>}, {transform_indices = @transform_3, window_bounds = array<i64: 64, 512>}]} {
    %c0 = arith.constant 0 : index
    %c0_0 = arith.constant 0 : index
    %0 = vector.load %arg1[%c0, %c0_0] : memref<64x32xf32, #tpu.memory_space<vmem>>, vector<64x32xf32>
    %1 = arith.truncf %0 : vector<64x32xf32> to vector<64x32xbf16>
    %c0_1 = arith.constant 0 : index
    %c0_2 = arith.constant 0 : index
    %2 = vector.load %arg2[%c0_1, %c0_2] : memref<32x512xbf16, #tpu.memory_space<vmem>>, vector<32x512xbf16>
    %cst = arith.constant dense<0.000000e+00> : vector<64x512xf32>
    %3 = tpu.matmul %1, %2, %cst {dimension_numbers = #tpu.dot_dimension_numbers<[1], [0], [0], [1], [0, 0, 1, 1], [], []>} : vector<64x32xbf16>, vector<32x512xbf16>, vector<64x512xf32> -> vector<64x512xf32>
    %c0_3 = arith.constant 0 : index
    %c0_4 = arith.constant 0 : index
    %4 = vector.load %arg3[%c0_3, %c0_4] : memref<1x512xf32, #tpu.memory_space<vmem>>, vector<1x512xf32>
    %5 = vector.broadcast %4 : vector<1x512xf32> to vector<64x512xf32>
    %6 = arith.addf %3, %5 : vector<64x512xf32>
    %7 = arith.truncf %6 : vector<64x512xf32> to vector<64x512xbf16>
    %c0_5 = arith.constant 0 : index
    %c0_6 = arith.constant 0 : index
    %8 = vector.load %arg4[%c0_5, %c0_6] : memref<64x512xbf16, #tpu.memory_space<vmem>>, vector<64x512xbf16>
    tpu.vector_store %arg4[%c0_5, %c0_6], %7 {strides = array<i32>} : memref<64x512xbf16, #tpu.memory_space<vmem>>, vector<64x512xbf16>,
    return
  }
  func.func @transform_0(%arg0: i32) -> (i32, i32) {
    %c0_i32 = arith.constant 0 : i32
    %c0_i32_0 = arith.constant 0 : i32
    return %arg0, %c0_i32 : i32, i32
  }
  func.func @transform_1(%arg0: i32) -> (i32, i32) {
    %c0_i32 = arith.constant 0 : i32
    %c0_i32_0 = arith.constant 0 : i32
    %c0_i32_1 = arith.constant 0 : i32
    return %c0_i32, %c0_i32_0 : i32, i32
  }
  func.func @transform_2(%arg0: i32) -> (i32, i32) {
    %c0_i32 = arith.constant 0 : i32
    %c0_i32_0 = arith.constant 0 : i32
    %c0_i32_1 = arith.constant 0 : i32
    return %c0_i32, %c0_i32_0 : i32, i32
  }
  func.func @transform_3(%arg0: i32) -> (i32, i32) {
    %c0_i32 = arith.constant 0 : i32
    %c0_i32_0 = arith.constant 0 : i32
    return %arg0, %c0_i32 : i32, i32
  }
}

module attributes {stable_mosaic.version = 11 : i64} {
  func.func @_lstm_recurrent_kernel(%arg0: i32, %arg1: memref<8x8x512xbf16, #tpu.memory_space<vmem>>, %arg2: memref<128x512xbf16, #tpu.memory_space<vmem>>, %arg3: memref<8x128xf32, #tpu.memory_space<vmem>>, %arg4: memref<8x128xf32, #tpu.memory_space<vmem>>, %arg5: memref<8x8x128xf32, #tpu.memory_space<vmem>>, %arg6: memref<8x128xf32, #tpu.memory_space<vmem>>, %arg7: memref<8x128xf32, #tpu.memory_space<vmem>>, %arg8: memref<8x128xf32, #tpu.memory_space<vmem>>) attributes {dimension_semantics = [#tpu.dimension_semantics<arbitrary>], iteration_bounds = array<i64: 1>, scalar_prefetch = 0 : i64, scratch_operands = 2 : i64, tpu.core_type = #tpu.core_type<tc>, window_params = [{transform_indices = @transform_0, window_bounds = array<i64: 8, 8, 512>}, {pipeline_mode = #tpu.pipeline_mode<synchronous>, transform_indices = @transform_1, window_bounds = array<i64: 128, 512>}, {pipeline_mode = #tpu.pipeline_mode<synchronous>, transform_indices = @transform_2, window_bounds = array<i64: 8, 128>}, {pipeline_mode = #tpu.pipeline_mode<synchronous>, transform_indices = @transform_3, window_bounds = array<i64: 8, 128>}, {transform_indices = @transform_4, window_bounds = array<i64: 8, 8, 128>}, {pipeline_mode = #tpu.pipeline_mode<synchronous>, transform_indices = @transform_5, window_bounds = array<i64: 8, 128>}]} {
    %c0_i32 = arith.constant 0 : i32
    %0 = arith.cmpi eq, %arg0, %c0_i32 : i32
    %1 = arith.extui %0 : i1 to i32
    %c0_i32_0 = arith.constant 0 : i32
    %2 = arith.cmpi ne, %1, %c0_i32_0 : i32
    scf.if %2 {
      %c0_82 = arith.constant 0 : index
      %c0_83 = arith.constant 0 : index
      %218 = vector.load %arg3[%c0_82, %c0_83] : memref<8x128xf32, #tpu.memory_space<vmem>>, vector<8x128xf32>
      %c0_84 = arith.constant 0 : index
      %c0_85 = arith.constant 0 : index
      %219 = vector.load %arg7[%c0_84, %c0_85] : memref<8x128xf32, #tpu.memory_space<vmem>>, vector<8x128xf32>
      tpu.vector_store %arg7[%c0_84, %c0_85], %218 {strides = array<i32>} : memref<8x128xf32, #tpu.memory_space<vmem>>, vector<8x128xf32>,
      %c0_86 = arith.constant 0 : index
      %c0_87 = arith.constant 0 : index
      %220 = vector.load %arg4[%c0_86, %c0_87] : memref<8x128xf32, #tpu.memory_space<vmem>>, vector<8x128xf32>
      %c0_88 = arith.constant 0 : index
      %c0_89 = arith.constant 0 : index
      %221 = vector.load %arg8[%c0_88, %c0_89] : memref<8x128xf32, #tpu.memory_space<vmem>>, vector<8x128xf32>
      tpu.vector_store %arg8[%c0_88, %c0_89], %220 {strides = array<i32>} : memref<8x128xf32, #tpu.memory_space<vmem>>, vector<8x128xf32>,
    } else {
    }
    %c0 = arith.constant 0 : index
    %c0_1 = arith.constant 0 : index
    %3 = vector.load %arg7[%c0, %c0_1] : memref<8x128xf32, #tpu.memory_space<vmem>>, vector<8x128xf32>
    %c0_2 = arith.constant 0 : index
    %c0_3 = arith.constant 0 : index
    %4 = vector.load %arg8[%c0_2, %c0_3] : memref<8x128xf32, #tpu.memory_space<vmem>>, vector<8x128xf32>
    %c0_4 = arith.constant 0 : index
    %c0_5 = arith.constant 0 : index
    %c0_6 = arith.constant 0 : index
    %5 = vector.load %arg1[%c0_4, %c0_5, %c0_6] : memref<8x8x512xbf16, #tpu.memory_space<vmem>>, vector<1x8x512xbf16>
    %6 = vector.shape_cast %5 : vector<1x8x512xbf16> to vector<8x512xbf16>
    %7 = arith.extf %6 : vector<8x512xbf16> to vector<8x512xf32>
    %8 = arith.truncf %3 : vector<8x128xf32> to vector<8x128xbf16>
    %c0_7 = arith.constant 0 : index
    %c0_8 = arith.constant 0 : index
    %9 = vector.load %arg2[%c0_7, %c0_8] : memref<128x512xbf16, #tpu.memory_space<vmem>>, vector<128x512xbf16>
    %cst = arith.constant dense<0.000000e+00> : vector<8x512xf32>
    %10 = tpu.matmul %8, %9, %cst {dimension_numbers = #tpu.dot_dimension_numbers<[1], [0], [0], [1], [0, 0, 1, 1], [], []>} : vector<8x128xbf16>, vector<128x512xbf16>, vector<8x512xf32> -> vector<8x512xf32>
    %11 = arith.addf %7, %10 : vector<8x512xf32>
    %12 = vector.extract_strided_slice %11 {offsets = [0, 0], sizes = [8, 384], strides = [1, 1]} : vector<8x512xf32> to vector<8x384xf32>
    %13 = arith.negf %12 : vector<8x384xf32>
    %14 = math.exp %13 : vector<8x384xf32>
    %cst_9 = arith.constant 1.000000e+00 : f32
    %15 = vector.broadcast %cst_9 : f32 to vector<8x384xf32>
    %16 = arith.addf %15, %14 : vector<8x384xf32>
    %17 = arith.divf %15, %16 : vector<8x384xf32>
    %18 = vector.extract_strided_slice %11 {offsets = [0, 384], sizes = [8, 128], strides = [1, 1]} : vector<8x512xf32> to vector<8x128xf32>
    %19 = math.tanh %18 : vector<8x128xf32>
    %20 = vector.extract_strided_slice %17 {offsets = [0, 0], sizes = [8, 128], strides = [1, 1]} : vector<8x384xf32> to vector<8x128xf32>
    %21 = vector.extract_strided_slice %17 {offsets = [0, 128], sizes = [8, 128], strides = [1, 1]} : vector<8x384xf32> to vector<8x128xf32>
    %22 = vector.extract_strided_slice %17 {offsets = [0, 256], sizes = [8, 128], strides = [1, 1]} : vector<8x384xf32> to vector<8x128xf32>
    %23 = arith.mulf %21, %4 : vector<8x128xf32>
    %24 = arith.mulf %20, %19 : vector<8x128xf32>
    %25 = arith.addf %23, %24 : vector<8x128xf32>
    %26 = math.tanh %25 : vector<8x128xf32>
    %27 = arith.mulf %22, %26 : vector<8x128xf32>
    %c0_10 = arith.constant 0 : index
    %c0_11 = arith.constant 0 : index
    %c0_12 = arith.constant 0 : index
    %28 = vector.load %arg5[%c0_10, %c0_11, %c0_12] : memref<8x8x128xf32, #tpu.memory_space<vmem>>, vector<1x8x128xf32>
    %29 = vector.shape_cast %28 : vector<1x8x128xf32> to vector<8x128xf32>
    %30 = vector.shape_cast %27 : vector<8x128xf32> to vector<1x8x128xf32>
    tpu.vector_store %arg5[%c0_10, %c0_11, %c0_12], %30 {strides = array<i32>} : memref<8x8x128xf32, #tpu.memory_space<vmem>>, vector<1x8x128xf32>,
    %c1 = arith.constant 1 : index
    %c0_13 = arith.constant 0 : index
    %c0_14 = arith.constant 0 : index
    %31 = vector.load %arg1[%c1, %c0_13, %c0_14] : memref<8x8x512xbf16, #tpu.memory_space<vmem>>, vector<1x8x512xbf16>
    %32 = vector.shape_cast %31 : vector<1x8x512xbf16> to vector<8x512xbf16>
    %33 = arith.extf %32 : vector<8x512xbf16> to vector<8x512xf32>
    %34 = arith.truncf %27 : vector<8x128xf32> to vector<8x128xbf16>
    %c0_15 = arith.constant 0 : index
    %c0_16 = arith.constant 0 : index
    %35 = vector.load %arg2[%c0_15, %c0_16] : memref<128x512xbf16, #tpu.memory_space<vmem>>, vector<128x512xbf16>
    %cst_17 = arith.constant dense<0.000000e+00> : vector<8x512xf32>
    %36 = tpu.matmul %34, %35, %cst_17 {dimension_numbers = #tpu.dot_dimension_numbers<[1], [0], [0], [1], [0, 0, 1, 1], [], []>} : vector<8x128xbf16>, vector<128x512xbf16>, vector<8x512xf32> -> vector<8x512xf32>
    %37 = arith.addf %33, %36 : vector<8x512xf32>
    %38 = vector.extract_strided_slice %37 {offsets = [0, 0], sizes = [8, 384], strides = [1, 1]} : vector<8x512xf32> to vector<8x384xf32>
    %39 = arith.negf %38 : vector<8x384xf32>
    %40 = math.exp %39 : vector<8x384xf32>
    %cst_18 = arith.constant 1.000000e+00 : f32
    %41 = vector.broadcast %cst_18 : f32 to vector<8x384xf32>
    %42 = arith.addf %41, %40 : vector<8x384xf32>
    %43 = arith.divf %41, %42 : vector<8x384xf32>
    %44 = vector.extract_strided_slice %37 {offsets = [0, 384], sizes = [8, 128], strides = [1, 1]} : vector<8x512xf32> to vector<8x128xf32>
    %45 = math.tanh %44 : vector<8x128xf32>
    %46 = vector.extract_strided_slice %43 {offsets = [0, 0], sizes = [8, 128], strides = [1, 1]} : vector<8x384xf32> to vector<8x128xf32>
    %47 = vector.extract_strided_slice %43 {offsets = [0, 128], sizes = [8, 128], strides = [1, 1]} : vector<8x384xf32> to vector<8x128xf32>
    %48 = vector.extract_strided_slice %43 {offsets = [0, 256], sizes = [8, 128], strides = [1, 1]} : vector<8x384xf32> to vector<8x128xf32>
    %49 = arith.mulf %47, %25 : vector<8x128xf32>
    %50 = arith.mulf %46, %45 : vector<8x128xf32>
    %51 = arith.addf %49, %50 : vector<8x128xf32>
    %52 = math.tanh %51 : vector<8x128xf32>
    %53 = arith.mulf %48, %52 : vector<8x128xf32>
    %c1_19 = arith.constant 1 : index
    %c0_20 = arith.constant 0 : index
    %c0_21 = arith.constant 0 : index
    %54 = vector.load %arg5[%c1_19, %c0_20, %c0_21] : memref<8x8x128xf32, #tpu.memory_space<vmem>>, vector<1x8x128xf32>
    %55 = vector.shape_cast %54 : vector<1x8x128xf32> to vector<8x128xf32>
    %56 = vector.shape_cast %53 : vector<8x128xf32> to vector<1x8x128xf32>
    tpu.vector_store %arg5[%c1_19, %c0_20, %c0_21], %56 {strides = array<i32>} : memref<8x8x128xf32, #tpu.memory_space<vmem>>, vector<1x8x128xf32>,
    %c2 = arith.constant 2 : index
    %c0_22 = arith.constant 0 : index
    %c0_23 = arith.constant 0 : index
    %57 = vector.load %arg1[%c2, %c0_22, %c0_23] : memref<8x8x512xbf16, #tpu.memory_space<vmem>>, vector<1x8x512xbf16>
    %58 = vector.shape_cast %57 : vector<1x8x512xbf16> to vector<8x512xbf16>
    %59 = arith.extf %58 : vector<8x512xbf16> to vector<8x512xf32>
    %60 = arith.truncf %53 : vector<8x128xf32> to vector<8x128xbf16>
    %c0_24 = arith.constant 0 : index
    %c0_25 = arith.constant 0 : index
    %61 = vector.load %arg2[%c0_24, %c0_25] : memref<128x512xbf16, #tpu.memory_space<vmem>>, vector<128x512xbf16>
    %cst_26 = arith.constant dense<0.000000e+00> : vector<8x512xf32>
    %62 = tpu.matmul %60, %61, %cst_26 {dimension_numbers = #tpu.dot_dimension_numbers<[1], [0], [0], [1], [0, 0, 1, 1], [], []>} : vector<8x128xbf16>, vector<128x512xbf16>, vector<8x512xf32> -> vector<8x512xf32>
    %63 = arith.addf %59, %62 : vector<8x512xf32>
    %64 = vector.extract_strided_slice %63 {offsets = [0, 0], sizes = [8, 384], strides = [1, 1]} : vector<8x512xf32> to vector<8x384xf32>
    %65 = arith.negf %64 : vector<8x384xf32>
    %66 = math.exp %65 : vector<8x384xf32>
    %cst_27 = arith.constant 1.000000e+00 : f32
    %67 = vector.broadcast %cst_27 : f32 to vector<8x384xf32>
    %68 = arith.addf %67, %66 : vector<8x384xf32>
    %69 = arith.divf %67, %68 : vector<8x384xf32>
    %70 = vector.extract_strided_slice %63 {offsets = [0, 384], sizes = [8, 128], strides = [1, 1]} : vector<8x512xf32> to vector<8x128xf32>
    %71 = math.tanh %70 : vector<8x128xf32>
    %72 = vector.extract_strided_slice %69 {offsets = [0, 0], sizes = [8, 128], strides = [1, 1]} : vector<8x384xf32> to vector<8x128xf32>
    %73 = vector.extract_strided_slice %69 {offsets = [0, 128], sizes = [8, 128], strides = [1, 1]} : vector<8x384xf32> to vector<8x128xf32>
    %74 = vector.extract_strided_slice %69 {offsets = [0, 256], sizes = [8, 128], strides = [1, 1]} : vector<8x384xf32> to vector<8x128xf32>
    %75 = arith.mulf %73, %51 : vector<8x128xf32>
    %76 = arith.mulf %72, %71 : vector<8x128xf32>
    %77 = arith.addf %75, %76 : vector<8x128xf32>
    %78 = math.tanh %77 : vector<8x128xf32>
    %79 = arith.mulf %74, %78 : vector<8x128xf32>
    %c2_28 = arith.constant 2 : index
    %c0_29 = arith.constant 0 : index
    %c0_30 = arith.constant 0 : index
    %80 = vector.load %arg5[%c2_28, %c0_29, %c0_30] : memref<8x8x128xf32, #tpu.memory_space<vmem>>, vector<1x8x128xf32>
    %81 = vector.shape_cast %80 : vector<1x8x128xf32> to vector<8x128xf32>
    %82 = vector.shape_cast %79 : vector<8x128xf32> to vector<1x8x128xf32>
    tpu.vector_store %arg5[%c2_28, %c0_29, %c0_30], %82 {strides = array<i32>} : memref<8x8x128xf32, #tpu.memory_space<vmem>>, vector<1x8x128xf32>,
    %c3 = arith.constant 3 : index
    %c0_31 = arith.constant 0 : index
    %c0_32 = arith.constant 0 : index
    %83 = vector.load %arg1[%c3, %c0_31, %c0_32] : memref<8x8x512xbf16, #tpu.memory_space<vmem>>, vector<1x8x512xbf16>
    %84 = vector.shape_cast %83 : vector<1x8x512xbf16> to vector<8x512xbf16>
    %85 = arith.extf %84 : vector<8x512xbf16> to vector<8x512xf32>
    %86 = arith.truncf %79 : vector<8x128xf32> to vector<8x128xbf16>
    %c0_33 = arith.constant 0 : index
    %c0_34 = arith.constant 0 : index
    %87 = vector.load %arg2[%c0_33, %c0_34] : memref<128x512xbf16, #tpu.memory_space<vmem>>, vector<128x512xbf16>
    %cst_35 = arith.constant dense<0.000000e+00> : vector<8x512xf32>
    %88 = tpu.matmul %86, %87, %cst_35 {dimension_numbers = #tpu.dot_dimension_numbers<[1], [0], [0], [1], [0, 0, 1, 1], [], []>} : vector<8x128xbf16>, vector<128x512xbf16>, vector<8x512xf32> -> vector<8x512xf32>
    %89 = arith.addf %85, %88 : vector<8x512xf32>
    %90 = vector.extract_strided_slice %89 {offsets = [0, 0], sizes = [8, 384], strides = [1, 1]} : vector<8x512xf32> to vector<8x384xf32>
    %91 = arith.negf %90 : vector<8x384xf32>
    %92 = math.exp %91 : vector<8x384xf32>
    %cst_36 = arith.constant 1.000000e+00 : f32
    %93 = vector.broadcast %cst_36 : f32 to vector<8x384xf32>
    %94 = arith.addf %93, %92 : vector<8x384xf32>
    %95 = arith.divf %93, %94 : vector<8x384xf32>
    %96 = vector.extract_strided_slice %89 {offsets = [0, 384], sizes = [8, 128], strides = [1, 1]} : vector<8x512xf32> to vector<8x128xf32>
    %97 = math.tanh %96 : vector<8x128xf32>
    %98 = vector.extract_strided_slice %95 {offsets = [0, 0], sizes = [8, 128], strides = [1, 1]} : vector<8x384xf32> to vector<8x128xf32>
    %99 = vector.extract_strided_slice %95 {offsets = [0, 128], sizes = [8, 128], strides = [1, 1]} : vector<8x384xf32> to vector<8x128xf32>
    %100 = vector.extract_strided_slice %95 {offsets = [0, 256], sizes = [8, 128], strides = [1, 1]} : vector<8x384xf32> to vector<8x128xf32>
    %101 = arith.mulf %99, %77 : vector<8x128xf32>
    %102 = arith.mulf %98, %97 : vector<8x128xf32>
    %103 = arith.addf %101, %102 : vector<8x128xf32>
    %104 = math.tanh %103 : vector<8x128xf32>
    %105 = arith.mulf %100, %104 : vector<8x128xf32>
    %c3_37 = arith.constant 3 : index
    %c0_38 = arith.constant 0 : index
    %c0_39 = arith.constant 0 : index
    %106 = vector.load %arg5[%c3_37, %c0_38, %c0_39] : memref<8x8x128xf32, #tpu.memory_space<vmem>>, vector<1x8x128xf32>
    %107 = vector.shape_cast %106 : vector<1x8x128xf32> to vector<8x128xf32>
    %108 = vector.shape_cast %105 : vector<8x128xf32> to vector<1x8x128xf32>
    tpu.vector_store %arg5[%c3_37, %c0_38, %c0_39], %108 {strides = array<i32>} : memref<8x8x128xf32, #tpu.memory_space<vmem>>, vector<1x8x128xf32>,
    %c4 = arith.constant 4 : index
    %c0_40 = arith.constant 0 : index
    %c0_41 = arith.constant 0 : index
    %109 = vector.load %arg1[%c4, %c0_40, %c0_41] : memref<8x8x512xbf16, #tpu.memory_space<vmem>>, vector<1x8x512xbf16>
    %110 = vector.shape_cast %109 : vector<1x8x512xbf16> to vector<8x512xbf16>
    %111 = arith.extf %110 : vector<8x512xbf16> to vector<8x512xf32>
    %112 = arith.truncf %105 : vector<8x128xf32> to vector<8x128xbf16>
    %c0_42 = arith.constant 0 : index
    %c0_43 = arith.constant 0 : index
    %113 = vector.load %arg2[%c0_42, %c0_43] : memref<128x512xbf16, #tpu.memory_space<vmem>>, vector<128x512xbf16>
    %cst_44 = arith.constant dense<0.000000e+00> : vector<8x512xf32>
    %114 = tpu.matmul %112, %113, %cst_44 {dimension_numbers = #tpu.dot_dimension_numbers<[1], [0], [0], [1], [0, 0, 1, 1], [], []>} : vector<8x128xbf16>, vector<128x512xbf16>, vector<8x512xf32> -> vector<8x512xf32>
    %115 = arith.addf %111, %114 : vector<8x512xf32>
    %116 = vector.extract_strided_slice %115 {offsets = [0, 0], sizes = [8, 384], strides = [1, 1]} : vector<8x512xf32> to vector<8x384xf32>
    %117 = arith.negf %116 : vector<8x384xf32>
    %118 = math.exp %117 : vector<8x384xf32>
    %cst_45 = arith.constant 1.000000e+00 : f32
    %119 = vector.broadcast %cst_45 : f32 to vector<8x384xf32>
    %120 = arith.addf %119, %118 : vector<8x384xf32>
    %121 = arith.divf %119, %120 : vector<8x384xf32>
    %122 = vector.extract_strided_slice %115 {offsets = [0, 384], sizes = [8, 128], strides = [1, 1]} : vector<8x512xf32> to vector<8x128xf32>
    %123 = math.tanh %122 : vector<8x128xf32>
    %124 = vector.extract_strided_slice %121 {offsets = [0, 0], sizes = [8, 128], strides = [1, 1]} : vector<8x384xf32> to vector<8x128xf32>
    %125 = vector.extract_strided_slice %121 {offsets = [0, 128], sizes = [8, 128], strides = [1, 1]} : vector<8x384xf32> to vector<8x128xf32>
    %126 = vector.extract_strided_slice %121 {offsets = [0, 256], sizes = [8, 128], strides = [1, 1]} : vector<8x384xf32> to vector<8x128xf32>
    %127 = arith.mulf %125, %103 : vector<8x128xf32>
    %128 = arith.mulf %124, %123 : vector<8x128xf32>
    %129 = arith.addf %127, %128 : vector<8x128xf32>
    %130 = math.tanh %129 : vector<8x128xf32>
    %131 = arith.mulf %126, %130 : vector<8x128xf32>
    %c4_46 = arith.constant 4 : index
    %c0_47 = arith.constant 0 : index
    %c0_48 = arith.constant 0 : index
    %132 = vector.load %arg5[%c4_46, %c0_47, %c0_48] : memref<8x8x128xf32, #tpu.memory_space<vmem>>, vector<1x8x128xf32>
    %133 = vector.shape_cast %132 : vector<1x8x128xf32> to vector<8x128xf32>
    %134 = vector.shape_cast %131 : vector<8x128xf32> to vector<1x8x128xf32>
    tpu.vector_store %arg5[%c4_46, %c0_47, %c0_48], %134 {strides = array<i32>} : memref<8x8x128xf32, #tpu.memory_space<vmem>>, vector<1x8x128xf32>,
    %c5 = arith.constant 5 : index
    %c0_49 = arith.constant 0 : index
    %c0_50 = arith.constant 0 : index
    %135 = vector.load %arg1[%c5, %c0_49, %c0_50] : memref<8x8x512xbf16, #tpu.memory_space<vmem>>, vector<1x8x512xbf16>
    %136 = vector.shape_cast %135 : vector<1x8x512xbf16> to vector<8x512xbf16>
    %137 = arith.extf %136 : vector<8x512xbf16> to vector<8x512xf32>
    %138 = arith.truncf %131 : vector<8x128xf32> to vector<8x128xbf16>
    %c0_51 = arith.constant 0 : index
    %c0_52 = arith.constant 0 : index
    %139 = vector.load %arg2[%c0_51, %c0_52] : memref<128x512xbf16, #tpu.memory_space<vmem>>, vector<128x512xbf16>
    %cst_53 = arith.constant dense<0.000000e+00> : vector<8x512xf32>
    %140 = tpu.matmul %138, %139, %cst_53 {dimension_numbers = #tpu.dot_dimension_numbers<[1], [0], [0], [1], [0, 0, 1, 1], [], []>} : vector<8x128xbf16>, vector<128x512xbf16>, vector<8x512xf32> -> vector<8x512xf32>
    %141 = arith.addf %137, %140 : vector<8x512xf32>
    %142 = vector.extract_strided_slice %141 {offsets = [0, 0], sizes = [8, 384], strides = [1, 1]} : vector<8x512xf32> to vector<8x384xf32>
    %143 = arith.negf %142 : vector<8x384xf32>
    %144 = math.exp %143 : vector<8x384xf32>
    %cst_54 = arith.constant 1.000000e+00 : f32
    %145 = vector.broadcast %cst_54 : f32 to vector<8x384xf32>
    %146 = arith.addf %145, %144 : vector<8x384xf32>
    %147 = arith.divf %145, %146 : vector<8x384xf32>
    %148 = vector.extract_strided_slice %141 {offsets = [0, 384], sizes = [8, 128], strides = [1, 1]} : vector<8x512xf32> to vector<8x128xf32>
    %149 = math.tanh %148 : vector<8x128xf32>
    %150 = vector.extract_strided_slice %147 {offsets = [0, 0], sizes = [8, 128], strides = [1, 1]} : vector<8x384xf32> to vector<8x128xf32>
    %151 = vector.extract_strided_slice %147 {offsets = [0, 128], sizes = [8, 128], strides = [1, 1]} : vector<8x384xf32> to vector<8x128xf32>
    %152 = vector.extract_strided_slice %147 {offsets = [0, 256], sizes = [8, 128], strides = [1, 1]} : vector<8x384xf32> to vector<8x128xf32>
    %153 = arith.mulf %151, %129 : vector<8x128xf32>
    %154 = arith.mulf %150, %149 : vector<8x128xf32>
    %155 = arith.addf %153, %154 : vector<8x128xf32>
    %156 = math.tanh %155 : vector<8x128xf32>
    %157 = arith.mulf %152, %156 : vector<8x128xf32>
    %c5_55 = arith.constant 5 : index
    %c0_56 = arith.constant 0 : index
    %c0_57 = arith.constant 0 : index
    %158 = vector.load %arg5[%c5_55, %c0_56, %c0_57] : memref<8x8x128xf32, #tpu.memory_space<vmem>>, vector<1x8x128xf32>
    %159 = vector.shape_cast %158 : vector<1x8x128xf32> to vector<8x128xf32>
    %160 = vector.shape_cast %157 : vector<8x128xf32> to vector<1x8x128xf32>
    tpu.vector_store %arg5[%c5_55, %c0_56, %c0_57], %160 {strides = array<i32>} : memref<8x8x128xf32, #tpu.memory_space<vmem>>, vector<1x8x128xf32>,
    %c6 = arith.constant 6 : index
    %c0_58 = arith.constant 0 : index
    %c0_59 = arith.constant 0 : index
    %161 = vector.load %arg1[%c6, %c0_58, %c0_59] : memref<8x8x512xbf16, #tpu.memory_space<vmem>>, vector<1x8x512xbf16>
    %162 = vector.shape_cast %161 : vector<1x8x512xbf16> to vector<8x512xbf16>
    %163 = arith.extf %162 : vector<8x512xbf16> to vector<8x512xf32>
    %164 = arith.truncf %157 : vector<8x128xf32> to vector<8x128xbf16>
    %c0_60 = arith.constant 0 : index
    %c0_61 = arith.constant 0 : index
    %165 = vector.load %arg2[%c0_60, %c0_61] : memref<128x512xbf16, #tpu.memory_space<vmem>>, vector<128x512xbf16>
    %cst_62 = arith.constant dense<0.000000e+00> : vector<8x512xf32>
    %166 = tpu.matmul %164, %165, %cst_62 {dimension_numbers = #tpu.dot_dimension_numbers<[1], [0], [0], [1], [0, 0, 1, 1], [], []>} : vector<8x128xbf16>, vector<128x512xbf16>, vector<8x512xf32> -> vector<8x512xf32>
    %167 = arith.addf %163, %166 : vector<8x512xf32>
    %168 = vector.extract_strided_slice %167 {offsets = [0, 0], sizes = [8, 384], strides = [1, 1]} : vector<8x512xf32> to vector<8x384xf32>
    %169 = arith.negf %168 : vector<8x384xf32>
    %170 = math.exp %169 : vector<8x384xf32>
    %cst_63 = arith.constant 1.000000e+00 : f32
    %171 = vector.broadcast %cst_63 : f32 to vector<8x384xf32>
    %172 = arith.addf %171, %170 : vector<8x384xf32>
    %173 = arith.divf %171, %172 : vector<8x384xf32>
    %174 = vector.extract_strided_slice %167 {offsets = [0, 384], sizes = [8, 128], strides = [1, 1]} : vector<8x512xf32> to vector<8x128xf32>
    %175 = math.tanh %174 : vector<8x128xf32>
    %176 = vector.extract_strided_slice %173 {offsets = [0, 0], sizes = [8, 128], strides = [1, 1]} : vector<8x384xf32> to vector<8x128xf32>
    %177 = vector.extract_strided_slice %173 {offsets = [0, 128], sizes = [8, 128], strides = [1, 1]} : vector<8x384xf32> to vector<8x128xf32>
    %178 = vector.extract_strided_slice %173 {offsets = [0, 256], sizes = [8, 128], strides = [1, 1]} : vector<8x384xf32> to vector<8x128xf32>
    %179 = arith.mulf %177, %155 : vector<8x128xf32>
    %180 = arith.mulf %176, %175 : vector<8x128xf32>
    %181 = arith.addf %179, %180 : vector<8x128xf32>
    %182 = math.tanh %181 : vector<8x128xf32>
    %183 = arith.mulf %178, %182 : vector<8x128xf32>
    %c6_64 = arith.constant 6 : index
    %c0_65 = arith.constant 0 : index
    %c0_66 = arith.constant 0 : index
    %184 = vector.load %arg5[%c6_64, %c0_65, %c0_66] : memref<8x8x128xf32, #tpu.memory_space<vmem>>, vector<1x8x128xf32>
    %185 = vector.shape_cast %184 : vector<1x8x128xf32> to vector<8x128xf32>
    %186 = vector.shape_cast %183 : vector<8x128xf32> to vector<1x8x128xf32>
    tpu.vector_store %arg5[%c6_64, %c0_65, %c0_66], %186 {strides = array<i32>} : memref<8x8x128xf32, #tpu.memory_space<vmem>>, vector<1x8x128xf32>,
    %c7 = arith.constant 7 : index
    %c0_67 = arith.constant 0 : index
    %c0_68 = arith.constant 0 : index
    %187 = vector.load %arg1[%c7, %c0_67, %c0_68] : memref<8x8x512xbf16, #tpu.memory_space<vmem>>, vector<1x8x512xbf16>
    %188 = vector.shape_cast %187 : vector<1x8x512xbf16> to vector<8x512xbf16>
    %189 = arith.extf %188 : vector<8x512xbf16> to vector<8x512xf32>
    %190 = arith.truncf %183 : vector<8x128xf32> to vector<8x128xbf16>
    %c0_69 = arith.constant 0 : index
    %c0_70 = arith.constant 0 : index
    %191 = vector.load %arg2[%c0_69, %c0_70] : memref<128x512xbf16, #tpu.memory_space<vmem>>, vector<128x512xbf16>
    %cst_71 = arith.constant dense<0.000000e+00> : vector<8x512xf32>
    %192 = tpu.matmul %190, %191, %cst_71 {dimension_numbers = #tpu.dot_dimension_numbers<[1], [0], [0], [1], [0, 0, 1, 1], [], []>} : vector<8x128xbf16>, vector<128x512xbf16>, vector<8x512xf32> -> vector<8x512xf32>
    %193 = arith.addf %189, %192 : vector<8x512xf32>
    %194 = vector.extract_strided_slice %193 {offsets = [0, 0], sizes = [8, 384], strides = [1, 1]} : vector<8x512xf32> to vector<8x384xf32>
    %195 = arith.negf %194 : vector<8x384xf32>
    %196 = math.exp %195 : vector<8x384xf32>
    %cst_72 = arith.constant 1.000000e+00 : f32
    %197 = vector.broadcast %cst_72 : f32 to vector<8x384xf32>
    %198 = arith.addf %197, %196 : vector<8x384xf32>
    %199 = arith.divf %197, %198 : vector<8x384xf32>
    %200 = vector.extract_strided_slice %193 {offsets = [0, 384], sizes = [8, 128], strides = [1, 1]} : vector<8x512xf32> to vector<8x128xf32>
    %201 = math.tanh %200 : vector<8x128xf32>
    %202 = vector.extract_strided_slice %199 {offsets = [0, 0], sizes = [8, 128], strides = [1, 1]} : vector<8x384xf32> to vector<8x128xf32>
    %203 = vector.extract_strided_slice %199 {offsets = [0, 128], sizes = [8, 128], strides = [1, 1]} : vector<8x384xf32> to vector<8x128xf32>
    %204 = vector.extract_strided_slice %199 {offsets = [0, 256], sizes = [8, 128], strides = [1, 1]} : vector<8x384xf32> to vector<8x128xf32>
    %205 = arith.mulf %203, %181 : vector<8x128xf32>
    %206 = arith.mulf %202, %201 : vector<8x128xf32>
    %207 = arith.addf %205, %206 : vector<8x128xf32>
    %208 = math.tanh %207 : vector<8x128xf32>
    %209 = arith.mulf %204, %208 : vector<8x128xf32>
    %c7_73 = arith.constant 7 : index
    %c0_74 = arith.constant 0 : index
    %c0_75 = arith.constant 0 : index
    %210 = vector.load %arg5[%c7_73, %c0_74, %c0_75] : memref<8x8x128xf32, #tpu.memory_space<vmem>>, vector<1x8x128xf32>
    %211 = vector.shape_cast %210 : vector<1x8x128xf32> to vector<8x128xf32>
    %212 = vector.shape_cast %209 : vector<8x128xf32> to vector<1x8x128xf32>
    tpu.vector_store %arg5[%c7_73, %c0_74, %c0_75], %212 {strides = array<i32>} : memref<8x8x128xf32, #tpu.memory_space<vmem>>, vector<1x8x128xf32>,
    %c0_76 = arith.constant 0 : index
    %c0_77 = arith.constant 0 : index
    %213 = vector.load %arg7[%c0_76, %c0_77] : memref<8x128xf32, #tpu.memory_space<vmem>>, vector<8x128xf32>
    tpu.vector_store %arg7[%c0_76, %c0_77], %209 {strides = array<i32>} : memref<8x128xf32, #tpu.memory_space<vmem>>, vector<8x128xf32>,
    %c0_78 = arith.constant 0 : index
    %c0_79 = arith.constant 0 : index
    %214 = vector.load %arg8[%c0_78, %c0_79] : memref<8x128xf32, #tpu.memory_space<vmem>>, vector<8x128xf32>
    tpu.vector_store %arg8[%c0_78, %c0_79], %207 {strides = array<i32>} : memref<8x128xf32, #tpu.memory_space<vmem>>, vector<8x128xf32>,
    %c0_i32_80 = arith.constant 0 : i32
    %215 = arith.cmpi eq, %arg0, %c0_i32_80 : i32
    %216 = arith.extui %215 : i1 to i32
    %c0_i32_81 = arith.constant 0 : i32
    %217 = arith.cmpi ne, %216, %c0_i32_81 : i32
    scf.if %217 {
      %c0_82 = arith.constant 0 : index
      %c0_83 = arith.constant 0 : index
      %218 = vector.load %arg6[%c0_82, %c0_83] : memref<8x128xf32, #tpu.memory_space<vmem>>, vector<8x128xf32>
      tpu.vector_store %arg6[%c0_82, %c0_83], %207 {strides = array<i32>} : memref<8x128xf32, #tpu.memory_space<vmem>>, vector<8x128xf32>,
    } else {
    }
    return
  }
  func.func @transform_0(%arg0: i32) -> (i32, i32, i32) {
    %c0_i32 = arith.constant 0 : i32
    %c0_i32_0 = arith.constant 0 : i32
    %c0_i32_1 = arith.constant 0 : i32
    return %arg0, %c0_i32, %c0_i32_0 : i32, i32, i32
  }
  func.func @transform_1(%arg0: i32) -> (i32, i32) {
    %c0_i32 = arith.constant 0 : i32
    %c0_i32_0 = arith.constant 0 : i32
    %c0_i32_1 = arith.constant 0 : i32
    return %c0_i32, %c0_i32_0 : i32, i32
  }
  func.func @transform_2(%arg0: i32) -> (i32, i32) {
    %c0_i32 = arith.constant 0 : i32
    %c0_i32_0 = arith.constant 0 : i32
    %c0_i32_1 = arith.constant 0 : i32
    return %c0_i32, %c0_i32_0 : i32, i32
  }
  func.func @transform_3(%arg0: i32) -> (i32, i32) {
    %c0_i32 = arith.constant 0 : i32
    %c0_i32_0 = arith.constant 0 : i32
    %c0_i32_1 = arith.constant 0 : i32
    return %c0_i32, %c0_i32_0 : i32, i32
  }
  func.func @transform_4(%arg0: i32) -> (i32, i32, i32) {
    %c0_i32 = arith.constant 0 : i32
    %c0_i32_0 = arith.constant 0 : i32
    %c0_i32_1 = arith.constant 0 : i32
    return %arg0, %c0_i32, %c0_i32_0 : i32, i32, i32
  }
  func.func @transform_5(%arg0: i32) -> (i32, i32) {
    %c0_i32 = arith.constant 0 : i32
    %c0_i32_0 = arith.constant 0 : i32
    %c0_i32_1 = arith.constant 0 : i32
    return %c0_i32, %c0_i32_0 : i32, i32
  }
}

</mosaic_0001>

<bundles_post_ra>
// kernel: lstm_forward_seq.2
= control target key start
LH: loop header
LB: loop body
LE: loop exit
PB: predicated region body
PF: predicated region fallthrough
CT: control target
= control target key end

     0   :  { %8 = vsyncpa [#allocation3], 0  ;;  %s537_s0 = inlined_call_operand.hbm [shape: f32[64,32], index: 0, kind: input, shape index: {}]   ;;  %s538_s1 = inlined_call_operand.hbm [shape: bf16[32,512], index: 1, kind: input, shape index: {}]   ;;  %s539_s2 = inlined_call_operand.vmem [shape: f32[1,512], index: 2, kind: input, shape index: {}]   ;;  %s540_s3 = inlined_call_operand.vmem [shape: bf16[64,512], index: 3, kind: output, shape index: {}]  }
   0x1   :  { %s14_s14 = sshll.u32 %s537_s0, 4  ;;  %s15_s14 = int_to_ptr.hbm [resolvable:$true] %s14_s14 }
   0x2   :  { %9 = vsyncpa [#allocation5], 0  ;;  %s398_s15 = smov [#allocation2]   ;;  %s27_s19 = sshll.u32 %s538_s1, 4  ;;  %s28_s19 = int_to_ptr.hbm [resolvable:$true] %s27_s19 }
   0x3   :  { %s16_s16 = sshll.u32 %s398_s15, 4  ;;  %s399_s20 = smov 128   ;;  %s17_s16 = int_to_ptr.vmem [resolvable:$true] %s16_s16 }
   0x4   :  { %s400_s21 = smov 8   ;;  %s401_s22 = smov [#allocation4]  }
   0x5   :  { %22 = dma.hbm_to_vmem [thread:$0]  %s15_s14, 1024, %s17_s16, [#allocation3], %s399_s20, %s399_s20, %s400_s21  }
   0x6   :  { %s29_s23 = sshll.u32 %s401_s22, 4  ;;  %s402_s24 = smov 256   ;;  %s30_s23 = int_to_ptr.vmem [resolvable:$true] %s29_s23 }
   0x7   :  { %s403_s25 = smov 16  }
   0x8   :  { %35 = dma.hbm_to_vmem [thread:$0]  %s28_s19, 1024, %s30_s23, [#allocation5], %s402_s24, %s402_s24, %s403_s25  }
   0x9   :  { %394 = dma.done.wait [#allocation3], 1024  }
   0xa   :  { %395 = vsyncadd [#allocation3], 4294966272 }
   0xb   :  { %396 = dma.done.wait [#allocation5], 1024  }
   0xc   :  { %397 = vsyncadd [#allocation5], 4294966272  ;;  %v302_v0 = vld [vmem:[#allocation4 + $0x20] sm:$0xf]  ;;  %v338_v1 = vld [vmem:[#allocation4 + $0x2c] sm:$0xf0] }
   0xd   :  { %v336_v2 = vld [vmem:[#allocation4 + $0x24] sm:$0xf]  ;;  %v303_v3 = vor.u32 %v338_v1, %v302_v0  ;;  %v304_v4 = vld [vmem:[#allocation4 + $0x30] sm:$0xf0]  ;;  %v310_v5 = vld [vmem:[#allocation4 + $0x28] sm:$0xf] }
   0xe   :  { %v339_v6 = vld [vmem:[#allocation4 + $0x34] sm:$0xf0]  ;;  %v307_v7 = vor.u32 %v336_v2, %v304_v4  ;;  %v337_v9 = vld [vmem:[#allocation4 + $0x2c] sm:$0xf]  ;;  %v312_v10 = vld [vmem:[#allocation4 + $0x38] sm:$0xf0] }
   0xf   :  { %v311_v8 = vor.u32 %v339_v6, %v310_v5  ;;  %v286_v11 = vld [vmem:[#allocation4] sm:$0xf]  ;;  %136 = vmatpush.bf16.msra.mxu0 %v303_v3  ;;  %v315_v12 = vor.u32 %v337_v9, %v312_v10  ;;  %v334_v13 = vld [vmem:[#allocation4 + $0xc] sm:$0xf0]  ;;  %v332_v14 = vld [vmem:[#allocation4 + $0x4] sm:$0xf] }
  0x10   :  { %v288_v15 = vld [vmem:[#allocation4 + $0x10] sm:$0xf0]  ;;  %165 = vmatpush.bf16.msra.mxu1 %v307_v7  ;;  %v287_v16 = vor.u32 %v334_v13, %v286_v11  ;;  %v294_v18 = vld [vmem:[#allocation4 + $0x8] sm:$0xf]  ;;  %v335_v19 = vld [vmem:[#allocation4 + $0x14] sm:$0xf0] }
  0x11   :  { %194 = vmatpush.bf16.msra.mxu2 %v311_v8  ;;  %v291_v17 = vor.u32 %v332_v14, %v288_v15  ;;  %v333_v20 = vld [vmem:[#allocation4 + $0xc] sm:$0xf]  ;;  %223 = vmatpush.bf16.msra.mxu3 %v315_v12  ;;  %v295_v21 = vor.u32 %v335_v19, %v294_v18  ;;  %v296_v22 = vld [vmem:[#allocation4 + $0x18] sm:$0xf0]  ;;  %v47_v23 = vld [vmem:[#allocation2] sm:$0xff]  ;;  %vm117_vm0 = vcmask 261120  }
  0x12   :  { %v48_v24 = vld [vmem:[#allocation2 + $0x8] sm:$0xff]  ;;  %v299_v25 = vor.u32 %v333_v20, %v296_v22  ;;  %v49_v27 = vld [vmem:[#allocation2 + $0x10] sm:$0xff]  ;;  %v50_v28 = vld [vmem:[#allocation2 + $0x18] sm:$0xff] }
  0x13   :  { %v55_v26 = vpack.c.bf16 %v48_v24, %v47_v23  ;;  %137 = vmatpush.bf16.msra.mxu0 %v287_v16  ;;  %v56_v29 = vpack.c.bf16 %v50_v28, %v49_v27  ;;  %v51_v30 = vld [vmem:[#allocation2 + $0x20] sm:$0xff]  ;;  %v52_v31 = vld [vmem:[#allocation2 + $0x28] sm:$0xff]  ;;  %v53_v33 = vld [vmem:[#allocation2 + $0x30] sm:$0xff] }
  0x14   :  { %166 = vmatpush.bf16.msra.mxu1 %v291_v17  ;;  %v57_v32 = vpack.c.bf16 %v52_v31, %v51_v30  ;;  %v54_v34 = vld [vmem:[#allocation2 + $0x38] sm:$0xff]  ;;  %v67_v36 = vld [vmem:[%s539_s2] sm:$0xf] }
  0x15   :  { %195 = vmatpush.bf16.msra.mxu2 %v295_v21  ;;  %224 = vmatpush.bf16.msra.mxu3 %v299_v25  ;;  %v58_v35 = vpack.c.bf16 %v54_v34, %v53_v33  ;;  %v449_v37 = vperm.slane %v67_v36, 0  ;;  %v451_v38 = vperm.slane %v67_v36, 1  ;;  %v455_v44 = vperm.slane %v67_v36, 2 }
  0x16   :  { %316 = vmatmul.msk.bf16.vlgmr.msra.gmra.mxu0 %vm117_vm0, %v55_v26  ;;  %v457_v45 = vperm.slane %v67_v36, 3 }
  0x17   :  { %320 = vmatmul.msk.bf16.vlgmr.msra.gmra.mxu1 %vm117_vm0, %v55_v26 }
  0x18   :  { %324 = vmatmul.msk.bf16.vlgmr.msra.gmra.mxu2 %vm117_vm0, %v55_v26  ;;  %328 = vmatmul.msk.bf16.vlgmr.msra.gmra.mxu3 %vm117_vm0, %v55_v26 }
  0x26   :  { %317 = vmatmul.msk.bf16.gmra.mxu0 %vm117_vm0, %v56_v29 }
  0x27   :  { %321 = vmatmul.msk.bf16.gmra.mxu1 %vm117_vm0, %v56_v29 }
  0x28   :  { %325 = vmatmul.msk.bf16.gmra.mxu2 %vm117_vm0, %v56_v29  ;;  %329 = vmatmul.msk.bf16.gmra.mxu3 %vm117_vm0, %v56_v29 }
  0x36   :  { %318 = vmatmul.msk.bf16.gmra.mxu0 %vm117_vm0, %v57_v32 }
  0x37   :  { %322 = vmatmul.msk.bf16.gmra.mxu1 %vm117_vm0, %v57_v32 }
  0x38   :  { %326 = vmatmul.msk.bf16.gmra.mxu2 %vm117_vm0, %v57_v32  ;;  %330 = vmatmul.msk.bf16.gmra.mxu3 %vm117_vm0, %v57_v32 }
  0x46   :  { %319 = vmatmul.msk.bf16.gmra.mxu0 %vm117_vm0, %v58_v35 }
  0x47   :  { %323 = vmatmul.msk.bf16.gmra.mxu1 %vm117_vm0, %v58_v35 }
  0x48   :  { %327 = vmatmul.msk.bf16.gmra.mxu2 %vm117_vm0, %v58_v35  ;;  %331 = vmatmul.msk.bf16.gmra.mxu3 %vm117_vm0, %v58_v35 }
  0x93   :  { %v139_v39 = vpop.f32.mrf.mxu0 }
  0x94   :  { %v140_v40 = vadd.f32 %v139_v39, %v449_v37  ;;  %v168_v41 = vpop.f32.mrf.mxu1 }
  0x95   :  { %v169_v42 = vadd.f32 %v168_v41, %v451_v38 }
  0x97   :  { %v246_v43 = vpack.c.bf16 %v169_v42, %v140_v40 }
  0x99   :  { %262 = vst [vmem:[%s540_s3] sm:$0xff] %v246_v43 }
  0x9b   :  { %v197_v46 = vpop.f32.mrf.mxu2  ;;  %v226_v48 = vpop.f32.mrf.mxu3 }
  0x9c   :  { %v198_v47 = vadd.f32 %v197_v46, %v455_v44  ;;  %v141_v49 = vpop.f32.mrf.mxu0  ;;  %v227_v50 = vadd.f32 %v226_v48, %v457_v45  ;;  %v170_v52 = vpop.f32.mrf.mxu1 }
  0x9d   :  { %v142_v51 = vadd.f32 %v141_v49, %v449_v37  ;;  %v171_v53 = vadd.f32 %v170_v52, %v451_v38 }
  0x9e   :  { %v247_v54 = vpack.c.bf16 %v227_v50, %v198_v47 }
  0x9f   :  { %v248_v55 = vpack.c.bf16 %v171_v53, %v142_v51 }
  0xa0   :  { %263 = vst [vmem:[%s540_s3 + $0x8] sm:$0xff] %v247_v54 }
  0xa1   :  { %264 = vst [vmem:[%s540_s3 + $0x10] sm:$0xff] %v248_v55 }
  0xa3   :  { %v199_v56 = vpop.f32.mrf.mxu2  ;;  %v228_v58 = vpop.f32.mrf.mxu3 }
  0xa4   :  { %v200_v57 = vadd.f32 %v199_v56, %v455_v44  ;;  %v144_v59 = vpop.f32.mrf.mxu0  ;;  %v229_v60 = vadd.f32 %v228_v58, %v457_v45  ;;  %v173_v62 = vpop.f32.mrf.mxu1 }
  0xa5   :  { %v145_v61 = vadd.f32 %v144_v59, %v449_v37  ;;  %v174_v63 = vadd.f32 %v173_v62, %v451_v38 }
  0xa6   :  { %v249_v0 = vpack.c.bf16 %v229_v60, %v200_v57 }
  0xa7   :  { %v250_v1 = vpack.c.bf16 %v174_v63, %v145_v61 }
  0xa8   :  { %265 = vst [vmem:[%s540_s3 + $0x18] sm:$0xff] %v249_v0 }
  0xa9   :  { %266 = vst [vmem:[%s540_s3 + $0x20] sm:$0xff] %v250_v1 }
  0xab   :  { %v202_v2 = vpop.f32.mrf.mxu2  ;;  %v231_v4 = vpop.f32.mrf.mxu3 }
  0xac   :  { %v203_v3 = vadd.f32 %v202_v2, %v455_v44  ;;  %v146_v5 = vpop.f32.mrf.mxu0  ;;  %v232_v6 = vadd.f32 %v231_v4, %v457_v45  ;;  %v175_v8 = vpop.f32.mrf.mxu1 }
  0xad   :  { %v147_v7 = vadd.f32 %v146_v5, %v449_v37  ;;  %v176_v9 = vadd.f32 %v175_v8, %v451_v38 }
  0xae   :  { %v251_v10 = vpack.c.bf16 %v232_v6, %v203_v3 }
  0xaf   :  { %v252_v11 = vpack.c.bf16 %v176_v9, %v147_v7 }
  0xb0   :  { %267 = vst [vmem:[%s540_s3 + $0x28] sm:$0xff] %v251_v10 }
  0xb1   :  { %268 = vst [vmem:[%s540_s3 + $0x30] sm:$0xff] %v252_v11 }
  0xb3   :  { %v204_v12 = vpop.f32.mrf.mxu2  ;;  %v233_v14 = vpop.f32.mrf.mxu3 }
  0xb4   :  { %v205_v13 = vadd.f32 %v204_v12, %v455_v44  ;;  %v149_v15 = vpop.f32.mrf.mxu0  ;;  %v234_v16 = vadd.f32 %v233_v14, %v457_v45  ;;  %v178_v18 = vpop.f32.mrf.mxu1 }
  0xb5   :  { %v150_v17 = vadd.f32 %v149_v15, %v449_v37  ;;  %v179_v19 = vadd.f32 %v178_v18, %v451_v38 }
  0xb6   :  { %v253_v20 = vpack.c.bf16 %v234_v16, %v205_v13 }
  0xb7   :  { %v254_v21 = vpack.c.bf16 %v179_v19, %v150_v17 }
  0xb8   :  { %269 = vst [vmem:[%s540_s3 + $0x38] sm:$0xff] %v253_v20 }
  0xb9   :  { %270 = vst [vmem:[%s540_s3 + $0x40] sm:$0xff] %v254_v21 }
  0xbb   :  { %v207_v22 = vpop.f32.mrf.mxu2  ;;  %v236_v24 = vpop.f32.mrf.mxu3 }
  0xbc   :  { %v208_v23 = vadd.f32 %v207_v22, %v455_v44  ;;  %v151_v25 = vpop.f32.mrf.mxu0  ;;  %v237_v26 = vadd.f32 %v236_v24, %v457_v45  ;;  %v180_v28 = vpop.f32.mrf.mxu1 }
  0xbd   :  { %v152_v27 = vadd.f32 %v151_v25, %v449_v37  ;;  %v181_v29 = vadd.f32 %v180_v28, %v451_v38 }
  0xbe   :  { %v255_v30 = vpack.c.bf16 %v237_v26, %v208_v23 }
  0xbf   :  { %v256_v31 = vpack.c.bf16 %v181_v29, %v152_v27 }
  0xc0   :  { %271 = vst [vmem:[%s540_s3 + $0x48] sm:$0xff] %v255_v30 }
  0xc1   :  { %272 = vst [vmem:[%s540_s3 + $0x50] sm:$0xff] %v256_v31 }
  0xc3   :  { %v209_v32 = vpop.f32.mrf.mxu2  ;;  %v238_v34 = vpop.f32.mrf.mxu3 }
  0xc4   :  { %v210_v33 = vadd.f32 %v209_v32, %v455_v44  ;;  %v154_v35 = vpop.f32.mrf.mxu0  ;;  %v239_v36 = vadd.f32 %v238_v34, %v457_v45  ;;  %v183_v40 = vpop.f32.mrf.mxu1 }
  0xc5   :  { %v155_v39 = vadd.f32 %v154_v35, %v449_v37  ;;  %v184_v41 = vadd.f32 %v183_v40, %v451_v38 }
  0xc6   :  { %v257_v42 = vpack.c.bf16 %v239_v36, %v210_v33 }
  0xc7   :  { %v258_v43 = vpack.c.bf16 %v184_v41, %v155_v39 }
  0xc8   :  { %273 = vst [vmem:[%s540_s3 + $0x58] sm:$0xff] %v257_v42 }
  0xc9   :  { %274 = vst [vmem:[%s540_s3 + $0x60] sm:$0xff] %v258_v43 }
  0xcb   :  { %v212_v46 = vpop.f32.mrf.mxu2  ;;  %v241_v48 = vpop.f32.mrf.mxu3 }
  0xcc   :  { %v213_v47 = vadd.f32 %v212_v46, %v455_v44  ;;  %v156_v49 = vpop.f32.mrf.mxu0  ;;  %v242_v50 = vadd.f32 %v241_v48, %v457_v45  ;;  %v185_v52 = vpop.f32.mrf.mxu1 }
  0xcd   :  { %v157_v51 = vadd.f32 %v156_v49, %v449_v37  ;;  %v186_v53 = vadd.f32 %v185_v52, %v451_v38 }
  0xce   :  { %v259_v54 = vpack.c.bf16 %v242_v50, %v213_v47 }
  0xcf   :  { %v260_v55 = vpack.c.bf16 %v186_v53, %v157_v51 }
  0xd0   :  { %275 = vst [vmem:[%s540_s3 + $0x68] sm:$0xff] %v259_v54 }
  0xd1   :  { %276 = vst [vmem:[%s540_s3 + $0x70] sm:$0xff] %v260_v55 }
  0xd3   :  { %v214_v56 = vpop.f32.mrf.mxu2  ;;  %v243_v58 = vpop.f32.mrf.mxu3 }
  0xd4   :  { %v215_v57 = vadd.f32 %v214_v56, %v455_v44  ;;  %v244_v59 = vadd.f32 %v243_v58, %v457_v45 }
  0xd6   :  { %v261_v37 = vpack.c.bf16 %v244_v59, %v215_v57 }
  0xd8   :  { %277 = vst [vmem:[%s540_s3 + $0x78] sm:$0xff] %v261_v37 }
  0xd9   :  { %282 = vsyncpa [#allocation3], 1 }
  0xda   :  { %283 = vsyncpa [#allocation5], 1 }

// kernel: lstm_forward_seq.3
= control target key start
LH: loop header
LB: loop body
LE: loop exit
PB: predicated region body
PF: predicated region fallthrough
CT: control target
= control target key end

     0   :  { %11 = vsyncpa [#allocation5], 0  ;;  %s4322_s0 = inlined_call_operand.vmem [shape: bf16[8,8,512], index: 0, kind: input, shape index: {}]   ;;  %s4323_s1 = inlined_call_operand.hbm [shape: bf16[128,512], index: 1, kind: input, shape index: {}]   ;;  %s4324_s2 = inlined_call_operand.vmem [shape: f32[8,128], index: 2, kind: input, shape index: {}]   ;;  %s4325_s3 = inlined_call_operand.vmem [shape: f32[8,128], index: 3, kind: input, shape index: {}]   ;;  %s4326_s4 = inlined_call_operand.vmem [shape: f32[8,8,128], index: 4, kind: output, shape index: {0}]   ;;  %s4327_s5 = inlined_call_operand.hbm [shape: f32[8,128], index: 5, kind: output, shape index: {1}]  }
   0x1   :  { %12 = vsyncpa [#allocation6], 0  ;;  %s19_s20 = sshll.u32 %s4323_s1, 4  ;;  %s4148_s21 = smov [#allocation4]   ;;  %s20_s20 = int_to_ptr.hbm [resolvable:$true] %s19_s20 }
   0x2   :  { %s21_s22 = sshll.u32 %s4148_s21, 4  ;;  %s4149_s23 = smov 256   ;;  %s22_s22 = int_to_ptr.vmem [resolvable:$true] %s21_s22 }
   0x3   :  { %s4150_s24 = smov 16  }
   0x4   :  { %27 = dma.hbm_to_vmem [thread:$0]  %s20_s20, 4096, %s22_s22, [#allocation5], %s4149_s23, %s4149_s23, %s4150_s24  }
   0x5   :  { %4144 = dma.done.wait [#allocation5], 4096  }
   0x6   :  { %4145 = vsyncadd [#allocation5], 4294963200  ;;  %v2753_v0 = vld [vmem:[#allocation4 + $0xe0] sm:$0xf]  ;;  %v3738_v1 = vld [vmem:[#allocation4 + $0xec] sm:$0xf0] }
   0x7   :  { %v3736_v2 = vld [vmem:[#allocation4 + $0xe4] sm:$0xf]  ;;  %v2754_v3 = vor.u32 %v3738_v1, %v2753_v0  ;;  %v2755_v4 = vld [vmem:[#allocation4 + $0xf0] sm:$0xf0]  ;;  %v2761_v5 = vld [vmem:[#allocation4 + $0xe8] sm:$0xf] }
   0x8   :  { %v3739_v6 = vld [vmem:[#allocation4 + $0xf4] sm:$0xf0]  ;;  %v2758_v7 = vor.u32 %v3736_v2, %v2755_v4  ;;  %v2737_v9 = vld [vmem:[#allocation4 + $0xc0] sm:$0xf]  ;;  %v3734_v10 = vld [vmem:[#allocation4 + $0xcc] sm:$0xf0] }
   0x9   :  { %v2762_v8 = vor.u32 %v3739_v6, %v2761_v5  ;;  %v3732_v11 = vld [vmem:[#allocation4 + $0xc4] sm:$0xf]  ;;  %245 = vmatpush.bf16.msra.mxu0 %v2754_v3  ;;  %v2738_v12 = vor.u32 %v3734_v10, %v2737_v9  ;;  %v2739_v13 = vld [vmem:[#allocation4 + $0xd0] sm:$0xf0]  ;;  %v2745_v14 = vld [vmem:[#allocation4 + $0xc8] sm:$0xf] }
   0xa   :  { %v3735_v15 = vld [vmem:[#allocation4 + $0xd4] sm:$0xf0]  ;;  %258 = vmatpush.bf16.msra.mxu1 %v2758_v7  ;;  %v2742_v16 = vor.u32 %v3732_v11, %v2739_v13  ;;  %v3737_v18 = vld [vmem:[#allocation4 + $0xec] sm:$0xf]  ;;  %v2763_v19 = vld [vmem:[#allocation4 + $0xf8] sm:$0xf0] }
   0xb   :  { %271 = vmatpush.bf16.msra.mxu2 %v2762_v8  ;;  %v2746_v17 = vor.u32 %v3735_v15, %v2745_v14  ;;  %v2721_v20 = vld [vmem:[#allocation4 + $0xa0] sm:$0xf]  ;;  %v2766_v21 = vor.u32 %v3737_v18, %v2763_v19  ;;  %v3730_v22 = vld [vmem:[#allocation4 + $0xac] sm:$0xf0]  ;;  %v3728_v23 = vld [vmem:[#allocation4 + $0xa4] sm:$0xf] }
   0xc   :  { %v2723_v24 = vld [vmem:[#allocation4 + $0xb0] sm:$0xf0]  ;;  %v2729_v25 = vld [vmem:[#allocation4 + $0xa8] sm:$0xf]  ;;  %v3731_v26 = vld [vmem:[#allocation4 + $0xb4] sm:$0xf0]  ;;  %v2722_v28 = vor.u32 %v3730_v22, %v2721_v20 }
   0xd   :  { %v3733_v27 = vld [vmem:[#allocation4 + $0xcc] sm:$0xf]  ;;  %246 = vmatpush.bf16.msra.mxu0 %v2738_v12  ;;  %284 = vmatpush.bf16.msra.mxu3 %v2766_v21  ;;  %v2747_v29 = vld [vmem:[#allocation4 + $0xd8] sm:$0xf0]  ;;  %v2705_v30 = vld [vmem:[#allocation4 + $0x80] sm:$0xf]  ;;  %v2726_v32 = vor.u32 %v3728_v23, %v2723_v24  ;;  %v2730_v33 = vor.u32 %v3731_v26, %v2729_v25 }
   0xe   :  { %v3726_v31 = vld [vmem:[#allocation4 + $0x8c] sm:$0xf0]  ;;  %259 = vmatpush.bf16.msra.mxu1 %v2742_v16  ;;  %v2750_v34 = vor.u32 %v3733_v27, %v2747_v29  ;;  %v3724_v35 = vld [vmem:[#allocation4 + $0x84] sm:$0xf]  ;;  %v2707_v36 = vld [vmem:[#allocation4 + $0x90] sm:$0xf0] }
   0xf   :  { %272 = vmatpush.bf16.msra.mxu2 %v2746_v17  ;;  %v2713_v37 = vld [vmem:[#allocation4 + $0x88] sm:$0xf]  ;;  %v3727_v38 = vld [vmem:[#allocation4 + $0x94] sm:$0xf0]  ;;  %v3729_v39 = vld [vmem:[#allocation4 + $0xac] sm:$0xf]  ;;  %v2706_v41 = vor.u32 %v3726_v31, %v2705_v30  ;;  %v2710_v45 = vor.u32 %v3724_v35, %v2707_v36 }
  0x10   :  { %v2731_v40 = vld [vmem:[#allocation4 + $0xb8] sm:$0xf0]  ;;  %v2689_v43 = vld [vmem:[#allocation4 + $0x60] sm:$0xf]  ;;  %v3722_v44 = vld [vmem:[#allocation4 + $0x6c] sm:$0xf0]  ;;  %v2714_v46 = vor.u32 %v3727_v38, %v2713_v37 }
  0x11   :  { %247 = vmatpush.bf16.msra.mxu0 %v2722_v28  ;;  %285 = vmatpush.bf16.msra.mxu3 %v2750_v34  ;;  %v2734_v42 = vor.u32 %v3729_v39, %v2731_v40  ;;  %v3720_v47 = vld [vmem:[#allocation4 + $0x64] sm:$0xf]  ;;  %v3725_v48 = vld [vmem:[#allocation4 + $0x8c] sm:$0xf]  ;;  %v2715_v49 = vld [vmem:[#allocation4 + $0x98] sm:$0xf0]  ;;  %v2690_v53 = vor.u32 %v3722_v44, %v2689_v43 }
  0x12   :  { %260 = vmatpush.bf16.msra.mxu1 %v2726_v32  ;;  %v2691_v50 = vld [vmem:[#allocation4 + $0x70] sm:$0xf0]  ;;  %v2697_v51 = vld [vmem:[#allocation4 + $0x68] sm:$0xf]  ;;  %v3723_v52 = vld [vmem:[#allocation4 + $0x74] sm:$0xf0]  ;;  %v2718_v54 = vor.u32 %v3725_v48, %v2715_v49 }
  0x13   :  { %273 = vmatpush.bf16.msra.mxu2 %v2730_v33  ;;  %v2673_v55 = vld [vmem:[#allocation4 + $0x40] sm:$0xf]  ;;  %v3718_v56 = vld [vmem:[#allocation4 + $0x4c] sm:$0xf0]  ;;  %v2694_v57 = vor.u32 %v3720_v47, %v2691_v50  ;;  %v2698_v58 = vor.u32 %v3723_v52, %v2697_v51  ;;  %v3716_v59 = vld [vmem:[#allocation4 + $0x44] sm:$0xf] }
  0x14   :  { %v3721_v60 = vld [vmem:[#allocation4 + $0x6c] sm:$0xf]  ;;  %v2699_v61 = vld [vmem:[#allocation4 + $0x78] sm:$0xf0]  ;;  %v2675_v62 = vld [vmem:[#allocation4 + $0x50] sm:$0xf0]  ;;  %v2674_v1 = vor.u32 %v3718_v56, %v2673_v55 }
  0x15   :  { %248 = vmatpush.bf16.msra.mxu0 %v2706_v41  ;;  %286 = vmatpush.bf16.msra.mxu3 %v2734_v42  ;;  %v2681_v63 = vld [vmem:[#allocation4 + $0x48] sm:$0xf]  ;;  %v3719_v0 = vld [vmem:[#allocation4 + $0x54] sm:$0xf0]  ;;  %v2702_v2 = vor.u32 %v3721_v60, %v2699_v61  ;;  %v2657_v3 = vld [vmem:[#allocation4 + $0x20] sm:$0xf]  ;;  %v2678_v5 = vor.u32 %v3716_v59, %v2675_v62 }
  0x16   :  { %261 = vmatpush.bf16.msra.mxu1 %v2710_v45  ;;  %v3714_v4 = vld [vmem:[#allocation4 + $0x2c] sm:$0xf0]  ;;  %v2682_v6 = vor.u32 %v3719_v0, %v2681_v63  ;;  %v3712_v7 = vld [vmem:[#allocation4 + $0x24] sm:$0xf]  ;;  %v3717_v8 = vld [vmem:[#allocation4 + $0x4c] sm:$0xf] }
  0x17   :  { %274 = vmatpush.bf16.msra.mxu2 %v2714_v46  ;;  %v2683_v9 = vld [vmem:[#allocation4 + $0x58] sm:$0xf0]  ;;  %v2659_v10 = vld [vmem:[#allocation4 + $0x30] sm:$0xf0]  ;;  %v2665_v11 = vld [vmem:[#allocation4 + $0x28] sm:$0xf]  ;;  %v2658_v13 = vor.u32 %v3714_v4, %v2657_v3 }
  0x18   :  { %v3715_v12 = vld [vmem:[#allocation4 + $0x34] sm:$0xf0]  ;;  %v2686_v14 = vor.u32 %v3717_v8, %v2683_v9  ;;  %v2641_v15 = vld [vmem:[#allocation4] sm:$0xf]  ;;  %v3710_v16 = vld [vmem:[#allocation4 + $0xc] sm:$0xf0]  ;;  %v2662_v17 = vor.u32 %v3712_v7, %v2659_v10 }
  0x19   :  { %249 = vmatpush.bf16.msra.mxu0 %v2690_v53  ;;  %287 = vmatpush.bf16.msra.mxu3 %v2718_v54  ;;  %v2666_v18 = vor.u32 %v3715_v12, %v2665_v11  ;;  %v3708_v19 = vld [vmem:[#allocation4 + $0x4] sm:$0xf]  ;;  %v3713_v20 = vld [vmem:[#allocation4 + $0x2c] sm:$0xf]  ;;  %v2667_v21 = vld [vmem:[#allocation4 + $0x38] sm:$0xf0]  ;;  %v2642_v25 = vor.u32 %v3710_v16, %v2641_v15 }
  0x1a   :  { %262 = vmatpush.bf16.msra.mxu1 %v2694_v57  ;;  %v2643_v22 = vld [vmem:[#allocation4 + $0x10] sm:$0xf0]  ;;  %v2649_v23 = vld [vmem:[#allocation4 + $0x8] sm:$0xf]  ;;  %v3711_v24 = vld [vmem:[#allocation4 + $0x14] sm:$0xf0]  ;;  %v2670_v27 = vor.u32 %v3713_v20, %v2667_v21 }
  0x1b   :  { %275 = vmatpush.bf16.msra.mxu2 %v2698_v58  ;;  %v40_v26 = vld [vmem:[%s4324_s2] sm:$0xff]  ;;  %v2646_v28 = vor.u32 %v3708_v19, %v2643_v22  ;;  %v2650_v29 = vor.u32 %v3711_v24, %v2649_v23  ;;  %v3709_v30 = vld [vmem:[#allocation4 + $0xc] sm:$0xf]  ;;  %v2651_v31 = vld [vmem:[#allocation4 + $0x18] sm:$0xf0]  ;;  %s2627_s22 = sshll.u32 %s4327_s5, 4  ;;  %s2628_s22 = int_to_ptr.hbm [resolvable:$true] %s2627_s22 }
  0x1c   :  { %v52_v32 = vpack.c.bf16 %v40_v26, %v40_v26  ;;  %v2654_v33 = vor.u32 %v3709_v30, %v2651_v31  ;;  %v2886_v34 = vld [vmem:[#allocation4 + $0xe0] sm:$0xf]  ;;  %v3770_v35 = vld [vmem:[#allocation4 + $0xec] sm:$0xf0]  ;;  %v3768_v36 = vld [vmem:[#allocation4 + $0xe4] sm:$0xf] }
  0x1d   :  { %250 = vmatpush.bf16.msra.mxu0 %v2674_v1  ;;  %288 = vmatpush.bf16.msra.mxu3 %v2702_v2  ;;  %v2887_v37 = vor.u32 %v3770_v35, %v2886_v34  ;;  %v2888_v38 = vld [vmem:[#allocation4 + $0xf0] sm:$0xf0]  ;;  %v2894_v39 = vld [vmem:[#allocation4 + $0xe8] sm:$0xf]  ;;  %v3771_v40 = vld [vmem:[#allocation4 + $0xf4] sm:$0xf0] }
  0x1e   :  { %263 = vmatpush.bf16.msra.mxu1 %v2678_v5  ;;  %v2891_v41 = vor.u32 %v3768_v36, %v2888_v38  ;;  %v2895_v42 = vor.u32 %v3771_v40, %v2894_v39  ;;  %v3769_v43 = vld [vmem:[#allocation4 + $0xec] sm:$0xf]  ;;  %v2896_v44 = vld [vmem:[#allocation4 + $0xf8] sm:$0xf0]  ;;  %v2870_v46 = vld [vmem:[#allocation4 + $0xc0] sm:$0xf] }
  0x1f   :  { %276 = vmatpush.bf16.msra.mxu2 %v2682_v6  ;;  %v2899_v45 = vor.u32 %v3769_v43, %v2896_v44  ;;  %v3766_v47 = vld [vmem:[#allocation4 + $0xcc] sm:$0xf0]  ;;  %v3764_v48 = vld [vmem:[#allocation4 + $0xc4] sm:$0xf]  ;;  %v2872_v50 = vld [vmem:[#allocation4 + $0xd0] sm:$0xf0] }
  0x20   :  { %v2871_v49 = vor.u32 %v3766_v47, %v2870_v46  ;;  %v2878_v51 = vld [vmem:[#allocation4 + $0xc8] sm:$0xf]  ;;  %v3767_v52 = vld [vmem:[#allocation4 + $0xd4] sm:$0xf0]  ;;  %v2875_v53 = vor.u32 %v3764_v48, %v2872_v50  ;;  %v3765_v55 = vld [vmem:[#allocation4 + $0xcc] sm:$0xf] }
  0x21   :  { %251 = vmatpush.bf16.msra.mxu0 %v2658_v13  ;;  %289 = vmatpush.bf16.msra.mxu3 %v2686_v14  ;;  %v2879_v54 = vor.u32 %v3767_v52, %v2878_v51  ;;  %v2880_v56 = vld [vmem:[#allocation4 + $0xd8] sm:$0xf0]  ;;  %v2854_v58 = vld [vmem:[#allocation4 + $0xa0] sm:$0xf]  ;;  %v3762_v59 = vld [vmem:[#allocation4 + $0xac] sm:$0xf0] }
  0x22   :  { %264 = vmatpush.bf16.msra.mxu1 %v2662_v17  ;;  %v2883_v57 = vor.u32 %v3765_v55, %v2880_v56  ;;  %v3760_v60 = vld [vmem:[#allocation4 + $0xa4] sm:$0xf]  ;;  %v2855_v61 = vor.u32 %v3762_v59, %v2854_v58  ;;  %v2856_v62 = vld [vmem:[#allocation4 + $0xb0] sm:$0xf0]  ;;  %v2862_v63 = vld [vmem:[#allocation4 + $0xa8] sm:$0xf] }
  0x23   :  { %277 = vmatpush.bf16.msra.mxu2 %v2666_v18  ;;  %v3763_v0 = vld [vmem:[#allocation4 + $0xb4] sm:$0xf0]  ;;  %v2859_v1 = vor.u32 %v3760_v60, %v2856_v62  ;;  %v3761_v3 = vld [vmem:[#allocation4 + $0xac] sm:$0xf]  ;;  %v2864_v4 = vld [vmem:[#allocation4 + $0xb8] sm:$0xf0] }
  0x24   :  { %v2863_v2 = vor.u32 %v3763_v0, %v2862_v63  ;;  %v46_v5 = vld [vmem:[%s4322_s0] sm:$0xff]  ;;  %v2867_v6 = vor.u32 %v3761_v3, %v2864_v4  ;;  %v3758_v8 = vld [vmem:[#allocation4 + $0x8c] sm:$0xf0]  ;;  %v2840_v11 = vld [vmem:[#allocation4 + $0x90] sm:$0xf0] }
  0x25   :  { %252 = vmatpush.bf16.msra.mxu0 %v2642_v25  ;;  %290 = vmatpush.bf16.msra.mxu3 %v2670_v27  ;;  %v2838_v7 = vld [vmem:[#allocation4 + $0x80] sm:$0xf]  ;;  %v3756_v9 = vld [vmem:[#allocation4 + $0x84] sm:$0xf]  ;;  %v2846_v12 = vld [vmem:[#allocation4 + $0x88] sm:$0xf]  ;;  %v48_v19 = vunpack.c.l.bf16 %v46_v5  ;;  %v49_v23 = vunpack.c.h.bf16 %v46_v5 }
  0x26   :  { %265 = vmatpush.bf16.msra.mxu1 %v2646_v28  ;;  %v2839_v10 = vor.u32 %v3758_v8, %v2838_v7  ;;  %v3759_v13 = vld [vmem:[#allocation4 + $0x94] sm:$0xf0]  ;;  %v2843_v14 = vor.u32 %v3756_v9, %v2840_v11  ;;  %v3757_v16 = vld [vmem:[#allocation4 + $0x8c] sm:$0xf]  ;;  %v2848_v17 = vld [vmem:[#allocation4 + $0x98] sm:$0xf0] }
  0x27   :  { %278 = vmatpush.bf16.msra.mxu2 %v2650_v29  ;;  %v2847_v15 = vor.u32 %v3759_v13, %v2846_v12  ;;  %v2851_v18 = vor.u32 %v3757_v16, %v2848_v17  ;;  %v2822_v20 = vld [vmem:[#allocation4 + $0x60] sm:$0xf]  ;;  %v3754_v21 = vld [vmem:[#allocation4 + $0x6c] sm:$0xf0]  ;;  %v3752_v22 = vld [vmem:[#allocation4 + $0x64] sm:$0xf] }
  0x28   :  { %253 = vmatmul.bf16.vlgmr.msra.gmra.mxu0 %v52_v32  ;;  %v2823_v24 = vor.u32 %v3754_v21, %v2822_v20  ;;  %v2824_v25 = vld [vmem:[#allocation4 + $0x70] sm:$0xf0]  ;;  %v2830_v26 = vld [vmem:[#allocation4 + $0x68] sm:$0xf]  ;;  %v3755_v27 = vld [vmem:[#allocation4 + $0x74] sm:$0xf0] }
  0x29   :  { %266 = vmatmul.bf16.vlgmr.msra.gmra.mxu1 %v52_v32  ;;  %291 = vmatpush.bf16.msra.mxu3 %v2654_v33  ;;  %v2827_v28 = vor.u32 %v3752_v22, %v2824_v25  ;;  %v2831_v29 = vor.u32 %v3755_v27, %v2830_v26  ;;  %v3753_v30 = vld [vmem:[#allocation4 + $0x6c] sm:$0xf]  ;;  %v2832_v31 = vld [vmem:[#allocation4 + $0x78] sm:$0xf0]  ;;  %v3750_v38 = vld [vmem:[#allocation4 + $0x4c] sm:$0xf0] }
  0x2a   :  { %279 = vmatmul.bf16.vlgmr.msra.gmra.mxu2 %v52_v32  ;;  %565 = vmatpush.bf16.msrb.mxu0 %v2887_v37  ;;  %v4194_v33 = vld [vmem:[%s4322_s0 + $0x8] sm:$0xff]  ;;  %v2835_v34 = vor.u32 %v3753_v30, %v2832_v31  ;;  %v2806_v37 = vld [vmem:[#allocation4 + $0x40] sm:$0xf]  ;;  %v3748_v39 = vld [vmem:[#allocation4 + $0x44] sm:$0xf] }
  0x2b   :  { %578 = vmatpush.bf16.msrb.mxu1 %v2891_v41  ;;  %591 = vmatpush.bf16.msrb.mxu2 %v2895_v42  ;;  %v2807_v41 = vor.u32 %v3750_v38, %v2806_v37  ;;  %v2808_v42 = vld [vmem:[#allocation4 + $0x50] sm:$0xf0]  ;;  %v2814_v43 = vld [vmem:[#allocation4 + $0x48] sm:$0xf]  ;;  %v3751_v44 = vld [vmem:[#allocation4 + $0x54] sm:$0xf0]  ;;  %v50_v51 = vunpack.c.l.bf16 %v4194_v33 }
  0x2c   :  { %292 = vmatmul.bf16.vlgmr.msra.gmra.mxu3 %v52_v32  ;;  %v2811_v46 = vor.u32 %v3748_v39, %v2808_v42  ;;  %v2815_v47 = vor.u32 %v3751_v44, %v2814_v43  ;;  %v3749_v48 = vld [vmem:[#allocation4 + $0x4c] sm:$0xf]  ;;  %v3744_v56 = vld [vmem:[#allocation4 + $0x24] sm:$0xf]  ;;  %v2798_v58 = vld [vmem:[#allocation4 + $0x28] sm:$0xf] }
  0x2d   :  { %604 = vmatpush.bf16.msrb.mxu3 %v2899_v45  ;;  %v3747_v60 = vld [vmem:[#allocation4 + $0x34] sm:$0xf0]  ;;  %v2800_v62 = vld [vmem:[#allocation4 + $0x38] sm:$0xf0]  ;;  %v3742_v3 = vld [vmem:[#allocation4 + $0xc] sm:$0xf0] }
  0x2e   :  { %566 = vmatpush.bf16.msrb.mxu0 %v2871_v49  ;;  %v2816_v49 = vld [vmem:[#allocation4 + $0x58] sm:$0xf0]  ;;  %v2799_v0 = vor.u32 %v3747_v60, %v2798_v58  ;;  %v3740_v4 = vld [vmem:[#allocation4 + $0x4] sm:$0xf]  ;;  %v2776_v8 = vld [vmem:[#allocation4 + $0x10] sm:$0xf0] }
  0x2f   :  { %579 = vmatpush.bf16.msrb.mxu1 %v2875_v53  ;;  %592 = vmatpush.bf16.msrb.mxu2 %v2879_v54  ;;  %v2819_v52 = vor.u32 %v3749_v48, %v2816_v49  ;;  %v2790_v53 = vld [vmem:[#allocation4 + $0x20] sm:$0xf]  ;;  %v3746_v54 = vld [vmem:[#allocation4 + $0x2c] sm:$0xf0]  ;;  %v2782_v9 = vld [vmem:[#allocation4 + $0x8] sm:$0xf]  ;;  %v2779_v12 = vor.u32 %v3740_v4, %v2776_v8 }
  0x30   :  { %v2791_v55 = vor.u32 %v3746_v54, %v2790_v53  ;;  %v42_v48 = vld [vmem:[%s4325_s3] sm:$0xff]  ;;  %v3802_v4 = vld [vmem:[#allocation4 + $0xec] sm:$0xf0]  ;;  %v3028_v8 = vld [vmem:[#allocation4 + $0xe8] sm:$0xf] }
  0x31   :  { %605 = vmatpush.bf16.msrb.mxu3 %v2883_v57  ;;  %v2792_v57 = vld [vmem:[#allocation4 + $0x30] sm:$0xf0] }
  0x32   :  { %567 = vmatpush.bf16.msrb.mxu0 %v2855_v61  ;;  %v2795_v59 = vor.u32 %v3744_v56, %v2792_v57  ;;  %v3745_v61 = vld [vmem:[#allocation4 + $0x2c] sm:$0xf] }
  0x33   :  { %580 = vmatpush.bf16.msrb.mxu1 %v2859_v1  ;;  %593 = vmatpush.bf16.msrb.mxu2 %v2863_v2  ;;  %v2803_v1 = vor.u32 %v3745_v61, %v2800_v62  ;;  %v2774_v2 = vld [vmem:[#allocation4] sm:$0xf] }
  0x34   :  { %v2775_v7 = vor.u32 %v3742_v3, %v2774_v2  ;;  %v3020_v3 = vld [vmem:[#allocation4 + $0xe0] sm:$0xf] }
  0x35   :  { %606 = vmatpush.bf16.msrb.mxu3 %v2867_v6 }
  0x36   :  { %568 = vmatpush.bf16.msrb.mxu0 %v2839_v10  ;;  %v3743_v10 = vld [vmem:[#allocation4 + $0x14] sm:$0xf0] }
  0x37   :  { %581 = vmatpush.bf16.msrb.mxu1 %v2843_v14  ;;  %594 = vmatpush.bf16.msrb.mxu2 %v2847_v15  ;;  %v2783_v13 = vor.u32 %v3743_v10, %v2782_v9  ;;  %v3741_v14 = vld [vmem:[#allocation4 + $0xc] sm:$0xf]  ;;  %v2784_v15 = vld [vmem:[#allocation4 + $0x18] sm:$0xf0]  ;;  %v3803_v9 = vld [vmem:[#allocation4 + $0xf4] sm:$0xf0] }
  0x38   :  { %v2787_v17 = vor.u32 %v3741_v14, %v2784_v15  ;;  %v3004_v15 = vld [vmem:[#allocation4 + $0xc0] sm:$0xf] }
  0x39   :  { %607 = vmatpush.bf16.msrb.mxu3 %v2851_v18 }
  0x3a   :  { %569 = vmatpush.bf16.msrb.mxu0 %v2823_v24 }
  0x3b   :  { %582 = vmatpush.bf16.msrb.mxu1 %v2827_v28  ;;  %595 = vmatpush.bf16.msrb.mxu2 %v2831_v29 }
  0x3d   :  { %608 = vmatpush.bf16.msrb.mxu3 %v2835_v34 }
  0x3e   :  { %570 = vmatpush.bf16.msrb.mxu0 %v2807_v41 }
  0x3f   :  { %583 = vmatpush.bf16.msrb.mxu1 %v2811_v46  ;;  %596 = vmatpush.bf16.msrb.mxu2 %v2815_v47 }
  0x41   :  { %609 = vmatpush.bf16.msrb.mxu3 %v2819_v52 }
  0x42   :  { %571 = vmatpush.bf16.msrb.mxu0 %v2791_v55 }
  0x43   :  { %584 = vmatpush.bf16.msrb.mxu1 %v2795_v59  ;;  %597 = vmatpush.bf16.msrb.mxu2 %v2799_v0 }
  0x45   :  { %610 = vmatpush.bf16.msrb.mxu3 %v2803_v1 }
  0x46   :  { %572 = vmatpush.bf16.msrb.mxu0 %v2775_v7  ;;  %v3022_v7 = vld [vmem:[#allocation4 + $0xf0] sm:$0xf0] }
  0x47   :  { %585 = vmatpush.bf16.msrb.mxu1 %v2779_v12  ;;  %598 = vmatpush.bf16.msrb.mxu2 %v2783_v13  ;;  %v3801_v12 = vld [vmem:[#allocation4 + $0xec] sm:$0xf]  ;;  %v3030_v13 = vld [vmem:[#allocation4 + $0xf8] sm:$0xf0] }
  0x48   :  { %v3033_v14 = vor.u32 %v3801_v12, %v3030_v13  ;;  %v2942_v12 = vld [vmem:[#allocation4 + $0x50] sm:$0xf0]  ;;  %v2948_v13 = vld [vmem:[#allocation4 + $0x48] sm:$0xf] }
  0x49   :  { %611 = vmatpush.bf16.msrb.mxu3 %v2787_v17  ;;  %v3796_v17 = vld [vmem:[#allocation4 + $0xc4] sm:$0xf] }
  0x4d   :  { %925 = vmatpush.bf16.msra.mxu3 %v3033_v14  ;;  %v3783_v14 = vld [vmem:[#allocation4 + $0x54] sm:$0xf0] }
  0xa5   :  { %v254_v32 = vpop.f32.mrf.mxu0 }
  0xa6   :  { %v297_v35 = vadd.f32 %v254_v32, %v48_v19  ;;  %v267_v36 = vpop.f32.mrf.mxu1 }
  0xa7   :  { %v298_v40 = vadd.f32 %v267_v36, %v49_v23  ;;  %v51_v23 = vunpack.c.h.bf16 %v4194_v33 }
  0xa8   :  { %v2767_v45 = vmul.f32 -1.442695, %v297_v35 }
  0xa9   :  { %v2768_v50 = vmul.f32 -1.442695, %v298_v40 }
  0xaa   :  { %3968 = vpow2.f32 %v2767_v45 }
  0xab   :  { %3970 = vpow2.f32 %v2768_v50 }
  0xad   :  { %v280_v63 = vpop.f32.mrf.mxu2  ;;  %v256_v6 = vpop.f32.mrf.mxu0 }
  0xae   :  { %v299_v5 = vadd.f32 %v280_v63, %v50_v51  ;;  %v269_v11 = vpop.f32.mrf.mxu1  ;;  %v3021_v6 = vor.u32 %v3802_v4, %v3020_v3  ;;  %v4213_v4 = vld [vmem:[%s4322_s0 + $0x18] sm:$0xff] }
  0xaf   :  { %v293_v19 = vpop.f32.mrf.mxu3  ;;  %v3029_v11 = vor.u32 %v3803_v9, %v3028_v8  ;;  %v2940_v8 = vld [vmem:[#allocation4 + $0x40] sm:$0xf]  ;;  %v3782_v9 = vld [vmem:[#allocation4 + $0x4c] sm:$0xf0] }
  0xb0   :  { %v2769_v16 = vmul.f32 -1.442695, %v299_v5  ;;  %v3969_v18 = vpop.eup %3968  ;;  %v300_v26 = vadd.f32 %v293_v19, %v51_v23  ;;  %v3800_v5 = vld [vmem:[#allocation4 + $0xe4] sm:$0xf]  ;;  %886 = vmatpush.bf16.msra.mxu0 %v3021_v6  ;;  %v3006_v19 = vld [vmem:[#allocation4 + $0xd0] sm:$0xf0] }
  0xb1   :  { %v3971_v20 = vpop.eup %3970  ;;  %v310_v21 = vadd.f32 1.0, %v3969_v18  ;;  %v3025_v10 = vor.u32 %v3800_v5, %v3022_v7  ;;  %912 = vmatpush.bf16.msra.mxu2 %v3029_v11  ;;  %v2941_v11 = vor.u32 %v3782_v9, %v2940_v8 }
  0xb2   :  { %3972 = vpow2.f32 %v2769_v16  ;;  %v311_v22 = vadd.f32 1.0, %v3971_v20  ;;  %v3798_v16 = vld [vmem:[#allocation4 + $0xcc] sm:$0xf0]  ;;  %v3012_v20 = vld [vmem:[#allocation4 + $0xc8] sm:$0xf] }
  0xb3   :  { %3974 = vrcp.f32 %v310_v21  ;;  %v324_v36 = vand.u32 2147483648, %v310_v21  ;;  %v322_v33 = vand.u32 2147483647, %v310_v21  ;;  %vm318_vm2 = vweird.f32 %v310_v21  ;;  %899 = vmatpush.bf16.msra.mxu1 %v3025_v10  ;;  %v3780_v10 = vld [vmem:[#allocation4 + $0x44] sm:$0xf] }
  0xb4   :  { %3976 = vrcp.f32 %v311_v22  ;;  %v339_v37 = vand.u32 2147483648, %v311_v22  ;;  %v337_v40 = vand.u32 2147483647, %v311_v22  ;;  %vm333_vm3 = vweird.f32 %v311_v22 }
  0xb5   :  { %v282_v24 = vpop.f32.mrf.mxu2  ;;  %v325_v45 = vor.u32 1.1754944e-38, %v324_v36  ;;  %vm323_vm6 = vcmp.eq.f32.partialorder %v322_v33, 8.507059e+37  ;;  %v3005_v18 = vor.u32 %v3798_v16, %v3004_v15  ;;  %v2770_v33 = vld [vmem:[%s4322_s0 + $0x10] sm:$0xff] }
  0xb6   :  { %v340_v47 = vor.u32 1.1754944e-38, %v339_v37  ;;  %vm338_vm7 = vcmp.eq.f32.partialorder %v337_v40, 8.507059e+37  ;;  %v3797_v24 = vld [vmem:[#allocation4 + $0xcc] sm:$0xf]  ;;  %v2972_v40 = vld [vmem:[#allocation4 + $0x80] sm:$0xf] }
  0xb7   :  { %v295_v28 = vpop.f32.mrf.mxu3  ;;  %887 = vmatpush.bf16.msra.mxu0 %v3005_v18  ;;  %v3793_v37 = vld [vmem:[#allocation4 + $0xac] sm:$0xf]  ;;  %v2949_v18 = vor.u32 %v3783_v14, %v2948_v13 }
  0xb8   :  { %v3973_v25 = vpop.eup %3972  ;;  %v3794_v28 = vld [vmem:[#allocation4 + $0xac] sm:$0xf0] }
  0xb9   :  { %v312_v27 = vadd.f32 1.0, %v3973_v25  ;;  %v3975_v29 = vpop.eup %3974  ;;  %v3014_v25 = vld [vmem:[#allocation4 + $0xd8] sm:$0xf0] }
  0xba   :  { %v3977_v30 = vpop.eup %3976  ;;  %v314_v31 = vmul.f32 %v3975_v29, %v310_v21  ;;  %vm319_vm0 = vweird.f32 %v3975_v29  ;;  %v3799_v21 = vld [vmem:[#allocation4 + $0xd4] sm:$0xf0] }
  0xbb   :  { %3978 = vrcp.f32 %v312_v27  ;;  %v329_v32 = vmul.f32 %v3977_v30, %v311_v22  ;;  %vm334_vm1 = vweird.f32 %v3977_v30  ;;  %vm320_vm4 = vmor %vm318_vm2, %vm319_vm0  ;;  %v354_v59 = vand.u32 2147483648, %v312_v27 }
  0xbc   :  { %3980 = vtanh.f32 %v300_v26  ;;  %v315_v34 = vsub.f32 1.0, %v314_v31  ;;  %vm335_vm5 = vmor %vm333_vm3, %vm334_vm1  ;;  %vm348_vm9 = vweird.f32 %v312_v27  ;;  %v352_v60 = vand.u32 2147483647, %v312_v27  ;;  %v2990_v31 = vld [vmem:[#allocation4 + $0xb0] sm:$0xf0] }
  0xbd   :  { %v330_v35 = vsub.f32 1.0, %v329_v32  ;;  %v355_v62 = vor.u32 1.1754944e-38, %v354_v59  ;;  %v3009_v22 = vor.u32 %v3796_v17, %v3006_v19  ;;  %v3013_v23 = vor.u32 %v3799_v21, %v3012_v20  ;;  %v2996_v32 = vld [vmem:[#allocation4 + $0xa8] sm:$0xf]  ;;  %v2958_v59 = vld [vmem:[#allocation4 + $0x70] sm:$0xf0] }
  0xbe   :  { %v316_v38 = vmul.f32 %v3975_v29, %v315_v34  ;;  %vm353_vm11 = vcmp.eq.f32.partialorder %v352_v60, 8.507059e+37  ;;  %v3017_v26 = vor.u32 %v3797_v24, %v3014_v25  ;;  %v3795_v34 = vld [vmem:[#allocation4 + $0xb4] sm:$0xf0]  ;;  %v2964_v60 = vld [vmem:[#allocation4 + $0x68] sm:$0xf]  ;;  %v2945_v17 = vor.u32 %v3780_v10, %v2942_v12 }
  0xbf   :  { %v331_v39 = vmul.f32 %v3977_v30, %v330_v35  ;;  %900 = vmatpush.bf16.msra.mxu1 %v3009_v22  ;;  %913 = vmatpush.bf16.msra.mxu2 %v3013_v23  ;;  %v2997_v36 = vor.u32 %v3795_v34, %v2996_v32  ;;  %v3781_v19 = vld [vmem:[#allocation4 + $0x4c] sm:$0xf]  ;;  %v370_v20 = vunpack.c.l.bf16 %v4213_v4  ;;  %v2950_v21 = vld [vmem:[#allocation4 + $0x58] sm:$0xf0]  ;;  %v2924_v22 = vld [vmem:[#allocation4 + $0x20] sm:$0xf] }
  0xc0   :  { %v317_v42 = vadd.f32 %v3975_v29, %v316_v38  ;;  %926 = vmatpush.bf16.msra.mxu3 %v3017_v26  ;;  %v2998_v38 = vld [vmem:[#allocation4 + $0xb8] sm:$0xf0]  ;;  %v3778_v23 = vld [vmem:[#allocation4 + $0x2c] sm:$0xf0]  ;;  %v2953_v24 = vor.u32 %v3781_v19, %v2950_v21  ;;  %v3776_v26 = vld [vmem:[#allocation4 + $0x24] sm:$0xf] }
  0xc1   :  { %v3979_v41 = vpop.eup %3978  ;;  %v332_v46 = vadd.f32 %v3977_v30, %v331_v39  ;;  %v3001_v39 = vor.u32 %v3793_v37, %v2998_v38  ;;  %v2925_v25 = vor.u32 %v3778_v23, %v2924_v22  ;;  %v2934_v32 = vld [vmem:[#allocation4 + $0x38] sm:$0xf0]  ;;  %v2908_v38 = vld [vmem:[#allocation4] sm:$0xf] }
  0xc2   :  { %v3981_v43 = vpop.eup %3980  ;;  %v344_v44 = vmul.f32 %v3979_v41, %v312_v27  ;;  %v321_v49 = vsel %vm320_vm4, %v3975_v29, %v317_v42  ;;  %vm349_vm8 = vweird.f32 %v3979_v41  ;;  %v2988_v27 = vld [vmem:[#allocation4 + $0xa0] sm:$0xf]  ;;  %v3792_v29 = vld [vmem:[#allocation4 + $0xa4] sm:$0xf] }
  0xc3   :  { %v326_v51 = vsel %vm323_vm6, %v325_v45, %v321_v49  ;;  %v336_v52 = vsel %vm335_vm5, %v3977_v30, %v332_v46  ;;  %vm350_vm10 = vmor %vm348_vm9, %vm349_vm8  ;;  %v2989_v30 = vor.u32 %v3794_v28, %v2988_v27  ;;  %v2993_v35 = vor.u32 %v3792_v29, %v2990_v31  ;;  %914 = vmatpush.bf16.msra.mxu2 %v2997_v36  ;;  %v3788_v42 = vld [vmem:[#allocation4 + $0x84] sm:$0xf]  ;;  %v2980_v45 = vld [vmem:[#allocation4 + $0x88] sm:$0xf] }
  0xc4   :  { %v345_v50 = vsub.f32 1.0, %v344_v44  ;;  %v341_v53 = vsel %vm338_vm7, %v340_v47, %v336_v52  ;;  %v360_v54 = vmul.f32 %v3981_v43, %v326_v51  ;;  %927 = vmatpush.bf16.msra.mxu3 %v3001_v39  ;;  %v2974_v44 = vld [vmem:[#allocation4 + $0x90] sm:$0xf0]  ;;  %v3791_v46 = vld [vmem:[#allocation4 + $0x94] sm:$0xf0]  ;;  %v368_v52 = vunpack.c.l.bf16 %v2770_v33 }
  0xc5   :  { %v359_v56 = vmul.f32 %v341_v53, %v42_v48  ;;  %888 = vmatpush.bf16.msra.mxu0 %v2989_v30  ;;  %901 = vmatpush.bf16.msra.mxu1 %v2993_v35  ;;  %v2977_v47 = vor.u32 %v3788_v42, %v2974_v44  ;;  %v2981_v48 = vor.u32 %v3791_v46, %v2980_v45  ;;  %v3789_v49 = vld [vmem:[#allocation4 + $0x8c] sm:$0xf]  ;;  %v369_v53 = vunpack.c.h.bf16 %v2770_v33  ;;  %v2926_v27 = vld [vmem:[#allocation4 + $0x30] sm:$0xf0]  ;;  %v2932_v28 = vld [vmem:[#allocation4 + $0x28] sm:$0xf] }
  0xc6   :  { %v346_v55 = vmul.f32 %v3979_v41, %v345_v50  ;;  %v2982_v50 = vld [vmem:[#allocation4 + $0x98] sm:$0xf0]  ;;  %v2929_v29 = vor.u32 %v3776_v26, %v2926_v27  ;;  %v3779_v30 = vld [vmem:[#allocation4 + $0x34] sm:$0xf0]  ;;  %v3777_v31 = vld [vmem:[#allocation4 + $0x2c] sm:$0xf] }
  0xc7   :  { %v4201_v57 = vadd.f32 %v360_v54, %v359_v56  ;;  %v2985_v51 = vor.u32 %v3789_v49, %v2982_v50  ;;  %915 = vmatpush.bf16.msra.mxu2 %v2981_v48  ;;  %v2956_v54 = vld [vmem:[#allocation4 + $0x60] sm:$0xf]  ;;  %v3784_v56 = vld [vmem:[#allocation4 + $0x64] sm:$0xf]  ;;  %v2933_v36 = vor.u32 %v3779_v30, %v2932_v28  ;;  %v2937_v37 = vor.u32 %v3777_v31, %v2934_v32  ;;  %v3774_v33 = vld [vmem:[#allocation4 + $0xc] sm:$0xf0] }
  0xc8   :  { %v347_v58 = vadd.f32 %v3979_v41, %v346_v55  ;;  %v3786_v55 = vld [vmem:[#allocation4 + $0x6c] sm:$0xf0]  ;;  %v3772_v39 = vld [vmem:[#allocation4 + $0x4] sm:$0xf]  ;;  %v2910_v44 = vld [vmem:[#allocation4 + $0x10] sm:$0xf0] }
  0xc9   :  { %3982 = vtanh.f32 %v4201_v57  ;;  %902 = vmatpush.bf16.msra.mxu1 %v2977_v47  ;;  %928 = vmatpush.bf16.msra.mxu3 %v2985_v51  ;;  %v2916_v45 = vld [vmem:[#allocation4 + $0x8] sm:$0xf]  ;;  %v3775_v46 = vld [vmem:[#allocation4 + $0x14] sm:$0xf0]  ;;  %v2913_v47 = vor.u32 %v3772_v39, %v2910_v44  ;;  %v3773_v49 = vld [vmem:[#allocation4 + $0xc] sm:$0xf] }
  0xca   :  { %v351_v61 = vsel %vm350_vm10, %v3979_v41, %v347_v58  ;;  %v3790_v41 = vld [vmem:[#allocation4 + $0x8c] sm:$0xf0]  ;;  %v2957_v58 = vor.u32 %v3786_v55, %v2956_v54  ;;  %v2917_v48 = vor.u32 %v3775_v46, %v2916_v45  ;;  %v2918_v50 = vld [vmem:[#allocation4 + $0x18] sm:$0xf0]  ;;  %v3833_v45 = vld [vmem:[#allocation4 + $0xec] sm:$0xf] }
  0xcb   :  { %v356_v0 = vsel %vm353_vm11, %v355_v62, %v351_v61  ;;  %v2973_v43 = vor.u32 %v3790_v41, %v2972_v40  ;;  %v3787_v61 = vld [vmem:[#allocation4 + $0x74] sm:$0xf0]  ;;  %v2961_v62 = vor.u32 %v3784_v56, %v2958_v59  ;;  %v3164_v46 = vld [vmem:[#allocation4 + $0xf8] sm:$0xf0] }
  0xcd   :  { %889 = vmatpush.bf16.msra.mxu0 %v2973_v43  ;;  %903 = vmatpush.bf16.msra.mxu1 %v2961_v62  ;;  %v2909_v43 = vor.u32 %v3774_v33, %v2908_v38  ;;  %v3834_v38 = vld [vmem:[#allocation4 + $0xec] sm:$0xf0]  ;;  %v3832_v33 = vld [vmem:[#allocation4 + $0xe4] sm:$0xf] }
  0xcf   :  { %v3983_v63 = vpop.eup %3982 }
  0xd0   :  { %v363_v1 = vmul.f32 %v3983_v63, %v356_v0  ;;  %v2965_v63 = vor.u32 %v3787_v61, %v2964_v60  ;;  %v3785_v0 = vld [vmem:[#allocation4 + $0x6c] sm:$0xf]  ;;  %v371_v60 = vunpack.c.h.bf16 %v4213_v4 }
  0xd1   :  { %890 = vmatpush.bf16.msra.mxu0 %v2957_v58  ;;  %904 = vmatpush.bf16.msra.mxu1 %v2945_v17 }
  0xd2   :  { %364 = vst [vmem:[%s4326_s4] sm:$0xff] %v363_v1  ;;  %v372_v2 = vpack.c.bf16 %v363_v1, %v363_v1  ;;  %v2966_v1 = vld [vmem:[#allocation4 + $0x78] sm:$0xf0]  ;;  %916 = vmatpush.bf16.msra.mxu2 %v2965_v63 }
  0xd3   :  { %v2969_v5 = vor.u32 %v3785_v0, %v2966_v1 }
  0xd4   :  { %573 = vmatmul.bf16.vlgmr.msrb.gmra.mxu0 %v372_v2  ;;  %586 = vmatmul.bf16.vlgmr.msrb.gmra.mxu1 %v372_v2 }
  0xd5   :  { %599 = vmatmul.bf16.vlgmr.msrb.gmra.mxu2 %v372_v2  ;;  %612 = vmatmul.bf16.vlgmr.msrb.gmra.mxu3 %v372_v2 }
  0xd6   :  { %929 = vmatpush.bf16.msra.mxu3 %v2969_v5  ;;  %891 = vmatpush.bf16.msra.mxu0 %v2941_v11 }
  0xd7   :  { %917 = vmatpush.bf16.msra.mxu2 %v2949_v18  ;;  %905 = vmatpush.bf16.msra.mxu1 %v2929_v29 }
  0xda   :  { %930 = vmatpush.bf16.msra.mxu3 %v2953_v24  ;;  %892 = vmatpush.bf16.msra.mxu0 %v2925_v25 }
  0xdb   :  { %918 = vmatpush.bf16.msra.mxu2 %v2933_v36  ;;  %906 = vmatpush.bf16.msra.mxu1 %v2913_v47  ;;  %v3167_v47 = vor.u32 %v3833_v45, %v3164_v46  ;;  %v3076_v45 = vld [vmem:[#allocation4 + $0x50] sm:$0xf0]  ;;  %v3082_v46 = vld [vmem:[#allocation4 + $0x48] sm:$0xf] }
  0xde   :  { %931 = vmatpush.bf16.msra.mxu3 %v2937_v37  ;;  %893 = vmatpush.bf16.msra.mxu0 %v2909_v43  ;;  %v3154_v37 = vld [vmem:[#allocation4 + $0xe0] sm:$0xf] }
  0xdf   :  { %919 = vmatpush.bf16.msra.mxu2 %v2917_v48  ;;  %v3155_v39 = vor.u32 %v3834_v38, %v3154_v37  ;;  %v3138_v48 = vld [vmem:[#allocation4 + $0xc0] sm:$0xf]  ;;  %v4230_v38 = vld [vmem:[%s4322_s0 + $0x28] sm:$0xff] }
  0xe2   :  { %1207 = vmatpush.bf16.msrb.mxu0 %v3155_v39 }
 0x151   :  { %v574_v2 = vpop.f32.mrf.mxu0  ;;  %v587_v3 = vpop.f32.mrf.mxu1 }
 0x152   :  { %v617_v6 = vadd.f32 %v574_v2, %v368_v52  ;;  %v618_v7 = vadd.f32 %v587_v3, %v369_v53  ;;  %v2921_v53 = vor.u32 %v3773_v49, %v2918_v50  ;;  %v3830_v49 = vld [vmem:[#allocation4 + $0xcc] sm:$0xf0]  ;;  %v3828_v50 = vld [vmem:[#allocation4 + $0xc4] sm:$0xf] }
 0x154   :  { %v2900_v15 = vmul.f32 -1.442695, %v617_v6  ;;  %v2901_v16 = vmul.f32 -1.442695, %v618_v7  ;;  %932 = vmatpush.bf16.msra.mxu3 %v2921_v53  ;;  %v3146_v53 = vld [vmem:[#allocation4 + $0xc8] sm:$0xf] }
 0x156   :  { %3984 = vpow2.f32 %v2900_v15 }
 0x157   :  { %3986 = vpow2.f32 %v2901_v16 }
 0x158   :  { %v600_v34 = vpop.f32.mrf.mxu2  ;;  %v613_v35 = vpop.f32.mrf.mxu3  ;;  %1246 = vmatpush.bf16.msrb.mxu3 %v3167_v47  ;;  %v3815_v47 = vld [vmem:[#allocation4 + $0x54] sm:$0xf0] }
 0x159   :  { %v619_v40 = vadd.f32 %v600_v34, %v370_v20  ;;  %v576_v41 = vpop.f32.mrf.mxu0  ;;  %v589_v42 = vpop.f32.mrf.mxu1  ;;  %v620_v0 = vadd.f32 %v613_v35, %v371_v60 }
 0x15a   :  { %v3162_v41 = vld [vmem:[#allocation4 + $0xe8] sm:$0xf]  ;;  %v3835_v42 = vld [vmem:[#allocation4 + $0xf4] sm:$0xf0] }
 0x15b   :  { %v2902_v51 = vmul.f32 -1.442695, %v619_v40  ;;  %v3156_v40 = vld [vmem:[#allocation4 + $0xf0] sm:$0xf0]  ;;  %v3163_v44 = vor.u32 %v3835_v42, %v3162_v41  ;;  %v3074_v41 = vld [vmem:[#allocation4 + $0x40] sm:$0xf] }
 0x15c   :  { %v3985_v52 = vpop.eup %3984  ;;  %v3159_v43 = vor.u32 %v3832_v33, %v3156_v40  ;;  %v3814_v42 = vld [vmem:[#allocation4 + $0x4c] sm:$0xf0] }
 0x15d   :  { %v3987_v54 = vpop.eup %3986  ;;  %v630_v55 = vadd.f32 1.0, %v3985_v52  ;;  %3988 = vpow2.f32 %v2902_v51  ;;  %1233 = vmatpush.bf16.msrb.mxu2 %v3163_v44  ;;  %v3139_v51 = vor.u32 %v3830_v49, %v3138_v48  ;;  %v3140_v52 = vld [vmem:[#allocation4 + $0xd0] sm:$0xf0]  ;;  %v3075_v44 = vor.u32 %v3814_v42, %v3074_v41 }
 0x15e   :  { %v631_v56 = vadd.f32 1.0, %v3987_v54  ;;  %1220 = vmatpush.bf16.msrb.mxu1 %v3159_v43  ;;  %v3831_v54 = vld [vmem:[#allocation4 + $0xd4] sm:$0xf0]  ;;  %v3812_v43 = vld [vmem:[#allocation4 + $0x44] sm:$0xf] }
 0x15f   :  { %3990 = vrcp.f32 %v630_v55  ;;  %v644_v7 = vand.u32 2147483648, %v630_v55  ;;  %v642_v10 = vand.u32 2147483647, %v630_v55  ;;  %vm638_vm14 = vweird.f32 %v630_v55  ;;  %1208 = vmatpush.bf16.msrb.mxu0 %v3139_v51 }
 0x160   :  { %3992 = vrcp.f32 %v631_v56  ;;  %v602_v58 = vpop.f32.mrf.mxu2  ;;  %v615_v59 = vpop.f32.mrf.mxu3  ;;  %v659_v8 = vand.u32 2147483648, %v631_v56  ;;  %v657_v12 = vand.u32 2147483647, %v631_v56  ;;  %vm653_vm15 = vweird.f32 %v631_v56 }
 0x161   :  { %v645_v15 = vor.u32 1.1754944e-38, %v644_v7  ;;  %vm643_vm2 = vcmp.eq.f32.partialorder %v642_v10, 8.507059e+37  ;;  %v3829_v58 = vld [vmem:[#allocation4 + $0xcc] sm:$0xf]  ;;  %v3148_v59 = vld [vmem:[#allocation4 + $0xd8] sm:$0xf0]  ;;  %v3083_v51 = vor.u32 %v3815_v47, %v3082_v46 }
 0x162   :  { %v660_v17 = vor.u32 1.1754944e-38, %v659_v8  ;;  %vm658_vm3 = vcmp.eq.f32.partialorder %v657_v12, 8.507059e+37  ;;  %v3151_v60 = vor.u32 %v3829_v58, %v3148_v59  ;;  %v3825_v7 = vld [vmem:[#allocation4 + $0xac] sm:$0xf]  ;;  %v3132_v8 = vld [vmem:[#allocation4 + $0xb8] sm:$0xf0] }
 0x163   :  { %v3989_v61 = vpop.eup %3988  ;;  %v3135_v10 = vor.u32 %v3825_v7, %v3132_v8  ;;  %v3822_v12 = vld [vmem:[#allocation4 + $0x8c] sm:$0xf0]  ;;  %v3042_v8 = vld [vmem:[#allocation4] sm:$0xf] }
 0x164   :  { %v632_v62 = vadd.f32 1.0, %v3989_v61  ;;  %v3122_v61 = vld [vmem:[#allocation4 + $0xa0] sm:$0xf]  ;;  %1247 = vmatpush.bf16.msrb.mxu3 %v3151_v60  ;;  %v3808_v60 = vld [vmem:[#allocation4 + $0x24] sm:$0xf] }
 0x165   :  { %v3991_v63 = vpop.eup %3990 }
 0x166   :  { %v3993_v1 = vpop.eup %3992  ;;  %v634_v2 = vmul.f32 %v3991_v63, %v630_v55  ;;  %3994 = vrcp.f32 %v632_v62  ;;  %vm639_vm12 = vweird.f32 %v3991_v63  ;;  %v674_v29 = vand.u32 2147483648, %v632_v62 }
 0x167   :  { %v649_v3 = vmul.f32 %v3993_v1, %v631_v56  ;;  %3996 = vtanh.f32 %v620_v0  ;;  %vm654_vm13 = vweird.f32 %v3993_v1  ;;  %vm640_vm0 = vmor %vm638_vm14, %vm639_vm12  ;;  %vm668_vm5 = vweird.f32 %v632_v62 }
 0x168   :  { %v635_v5 = vsub.f32 1.0, %v634_v2  ;;  %vm655_vm1 = vmor %vm653_vm15, %vm654_vm13  ;;  %v672_v30 = vand.u32 2147483647, %v632_v62  ;;  %v675_v32 = vor.u32 1.1754944e-38, %v674_v29  ;;  %v3143_v55 = vor.u32 %v3828_v50, %v3140_v52  ;;  %v3130_v2 = vld [vmem:[#allocation4 + $0xa8] sm:$0xf]  ;;  %1248 = vmatpush.bf16.msrb.mxu3 %v3135_v10 }
 0x169   :  { %v650_v6 = vsub.f32 1.0, %v649_v3  ;;  %v3147_v56 = vor.u32 %v3831_v54, %v3146_v53  ;;  %v3827_v3 = vld [vmem:[#allocation4 + $0xb4] sm:$0xf0]  ;;  %v3092_v29 = vld [vmem:[#allocation4 + $0x70] sm:$0xf0]  ;;  %v3079_v50 = vor.u32 %v3812_v43, %v3076_v45  ;;  %v691_v53 = vunpack.c.l.bf16 %v4230_v38 }
 0x16a   :  { %v636_v9 = vmul.f32 %v3991_v63, %v635_v5  ;;  %vm673_vm7 = vcmp.eq.f32.partialorder %v672_v30, 8.507059e+37  ;;  %1221 = vmatpush.bf16.msrb.mxu1 %v3143_v55  ;;  %v3098_v30 = vld [vmem:[#allocation4 + $0x68] sm:$0xf]  ;;  %v3813_v52 = vld [vmem:[#allocation4 + $0x4c] sm:$0xf] }
 0x16b   :  { %v651_v11 = vmul.f32 %v3993_v1, %v650_v6  ;;  %1234 = vmatpush.bf16.msrb.mxu2 %v3147_v56  ;;  %v3131_v6 = vor.u32 %v3827_v3, %v3130_v2  ;;  %v3084_v54 = vld [vmem:[#allocation4 + $0x58] sm:$0xf0]  ;;  %v3058_v55 = vld [vmem:[#allocation4 + $0x20] sm:$0xf]  ;;  %v3810_v56 = vld [vmem:[#allocation4 + $0x2c] sm:$0xf0] }
 0x16c   :  { %v3995_v4 = vpop.eup %3994  ;;  %v637_v13 = vadd.f32 %v3991_v63, %v636_v9  ;;  %v2904_v9 = vld [vmem:[%s4322_s0 + $0x20] sm:$0xff]  ;;  %v3087_v58 = vor.u32 %v3813_v52, %v3084_v54  ;;  %v3059_v59 = vor.u32 %v3810_v56, %v3058_v55  ;;  %v3068_v2 = vld [vmem:[#allocation4 + $0x38] sm:$0xf0] }
 0x16d   :  { %v664_v14 = vmul.f32 %v3995_v4, %v632_v62  ;;  %v652_v16 = vadd.f32 %v3993_v1, %v651_v11  ;;  %v3997_v19 = vpop.eup %3996  ;;  %vm669_vm4 = vweird.f32 %v3995_v4  ;;  %v3826_v62 = vld [vmem:[#allocation4 + $0xac] sm:$0xf0]  ;;  %v3106_v11 = vld [vmem:[#allocation4 + $0x80] sm:$0xf]  ;;  %v3804_v10 = vld [vmem:[#allocation4 + $0x4] sm:$0xf] }
 0x16e   :  { %v641_v18 = vsel %vm640_vm0, %v3991_v63, %v637_v13  ;;  %vm670_vm6 = vmor %vm668_vm5, %vm669_vm4  ;;  %v3824_v63 = vld [vmem:[#allocation4 + $0xa4] sm:$0xf]  ;;  %v3123_v0 = vor.u32 %v3826_v62, %v3122_v61  ;;  %v3107_v13 = vor.u32 %v3822_v12, %v3106_v11  ;;  %v3060_v61 = vld [vmem:[#allocation4 + $0x30] sm:$0xf0] }
 0x16f   :  { %v665_v20 = vsub.f32 1.0, %v664_v14  ;;  %v646_v21 = vsel %vm643_vm2, %v645_v15, %v641_v18  ;;  %v656_v22 = vsel %vm655_vm1, %v3993_v1, %v652_v16  ;;  %v3124_v1 = vld [vmem:[#allocation4 + $0xb0] sm:$0xf0]  ;;  %1235 = vmatpush.bf16.msrb.mxu2 %v3131_v6  ;;  %v3114_v15 = vld [vmem:[#allocation4 + $0x88] sm:$0xf] }
 0x170   :  { %v661_v23 = vsel %vm658_vm3, %v660_v17, %v656_v22  ;;  %v680_v24 = vmul.f32 %v3997_v19, %v646_v21  ;;  %v3127_v5 = vor.u32 %v3824_v63, %v3124_v1  ;;  %1209 = vmatpush.bf16.msrb.mxu0 %v3123_v0  ;;  %v3108_v14 = vld [vmem:[#allocation4 + $0x90] sm:$0xf0]  ;;  %v3823_v16 = vld [vmem:[#allocation4 + $0x94] sm:$0xf0]  ;;  %v3821_v19 = vld [vmem:[#allocation4 + $0x8c] sm:$0xf]  ;;  %v689_v22 = vunpack.c.l.bf16 %v2904_v9 }
 0x171   :  { %v666_v25 = vmul.f32 %v3995_v4, %v665_v20  ;;  %v679_v26 = vmul.f32 %v661_v23, %v4201_v57  ;;  %v3115_v18 = vor.u32 %v3823_v16, %v3114_v15  ;;  %v3116_v20 = vld [vmem:[#allocation4 + $0x98] sm:$0xf0]  ;;  %v690_v23 = vunpack.c.h.bf16 %v2904_v9  ;;  %v3066_v62 = vld [vmem:[#allocation4 + $0x28] sm:$0xf]  ;;  %v3811_v0 = vld [vmem:[#allocation4 + $0x34] sm:$0xf0] }
 0x172   :  { %1222 = vmatpush.bf16.msrb.mxu1 %v3127_v5  ;;  %v3119_v21 = vor.u32 %v3821_v19, %v3116_v20  ;;  %v3063_v63 = vor.u32 %v3808_v60, %v3060_v61  ;;  %v3809_v1 = vld [vmem:[#allocation4 + $0x2c] sm:$0xf]  ;;  %v3067_v6 = vor.u32 %v3811_v0, %v3066_v62  ;;  %v3806_v9 = vld [vmem:[#allocation4 + $0xc] sm:$0xf0]  ;;  %v3050_v15 = vld [vmem:[#allocation4 + $0x8] sm:$0xf] }
 0x173   :  { %v4218_v27 = vadd.f32 %v680_v24, %v679_v26  ;;  %v667_v28 = vadd.f32 %v3995_v4, %v666_v25  ;;  %1236 = vmatpush.bf16.msrb.mxu2 %v3115_v18  ;;  %v3090_v24 = vld [vmem:[#allocation4 + $0x60] sm:$0xf]  ;;  %v3818_v25 = vld [vmem:[#allocation4 + $0x6c] sm:$0xf0]  ;;  %v3816_v26 = vld [vmem:[#allocation4 + $0x64] sm:$0xf]  ;;  %v3071_v7 = vor.u32 %v3809_v1, %v3068_v2 }
 0x174   :  { %1210 = vmatpush.bf16.msrb.mxu0 %v3107_v13  ;;  %1249 = vmatpush.bf16.msrb.mxu3 %v3119_v21  ;;  %v3043_v13 = vor.u32 %v3806_v9, %v3042_v8  ;;  %v3807_v16 = vld [vmem:[#allocation4 + $0x14] sm:$0xf0]  ;;  %v3805_v19 = vld [vmem:[#allocation4 + $0xc] sm:$0xf]  ;;  %v3052_v20 = vld [vmem:[#allocation4 + $0x18] sm:$0xf0] }
 0x175   :  { %3998 = vtanh.f32 %v4218_v27  ;;  %v671_v31 = vsel %vm670_vm6, %v3995_v4, %v667_v28  ;;  %v3820_v4 = vld [vmem:[#allocation4 + $0x84] sm:$0xf]  ;;  %v3091_v28 = vor.u32 %v3818_v25, %v3090_v24  ;;  %v3051_v18 = vor.u32 %v3807_v16, %v3050_v15  ;;  %v3866_v8 = vld [vmem:[#allocation4 + $0xec] sm:$0xf0]  ;;  %v3865_v15 = vld [vmem:[#allocation4 + $0xec] sm:$0xf] }
 0x176   :  { %v676_v35 = vsel %vm673_vm7, %v675_v32, %v671_v31  ;;  %v3111_v17 = vor.u32 %v3820_v4, %v3108_v14  ;;  %v3819_v31 = vld [vmem:[#allocation4 + $0x74] sm:$0xf0]  ;;  %v3095_v32 = vor.u32 %v3816_v26, %v3092_v29  ;;  %v3044_v14 = vld [vmem:[#allocation4 + $0x10] sm:$0xf0]  ;;  %v3864_v9 = vld [vmem:[#allocation4 + $0xe4] sm:$0xf] }
 0x177   :  { %v3298_v16 = vld [vmem:[#allocation4 + $0xf8] sm:$0xf0] }
 0x178   :  { %1223 = vmatpush.bf16.msrb.mxu1 %v3111_v17  ;;  %1211 = vmatpush.bf16.msrb.mxu0 %v3091_v28  ;;  %v3047_v17 = vor.u32 %v3804_v10, %v3044_v14 }
 0x17b   :  { %v3999_v34 = vpop.eup %3998 }
 0x17c   :  { %v683_v36 = vmul.f32 %v3999_v34, %v676_v35  ;;  %v3099_v34 = vor.u32 %v3819_v31, %v3098_v30  ;;  %v3817_v35 = vld [vmem:[#allocation4 + $0x6c] sm:$0xf]  ;;  %1224 = vmatpush.bf16.msrb.mxu1 %v3095_v32  ;;  %1212 = vmatpush.bf16.msrb.mxu0 %v3075_v44  ;;  %v692_v30 = vunpack.c.h.bf16 %v4230_v38 }
 0x17e   :  { %2903 = vst [vmem:[%s4326_s4 + $0x8] sm:$0xff] %v683_v36  ;;  %v693_v57 = vpack.c.bf16 %v683_v36, %v683_v36  ;;  %v3100_v36 = vld [vmem:[#allocation4 + $0x78] sm:$0xf0]  ;;  %1237 = vmatpush.bf16.msrb.mxu2 %v3099_v34 }
 0x17f   :  { %v3103_v33 = vor.u32 %v3817_v35, %v3100_v36 }
 0x180   :  { %894 = vmatmul.bf16.vlgmr.msra.gmra.mxu0 %v693_v57  ;;  %907 = vmatmul.bf16.vlgmr.msra.gmra.mxu1 %v693_v57 }
 0x181   :  { %920 = vmatmul.bf16.vlgmr.msra.gmra.mxu2 %v693_v57  ;;  %933 = vmatmul.bf16.vlgmr.msra.gmra.mxu3 %v693_v57 }
 0x182   :  { %1250 = vmatpush.bf16.msrb.mxu3 %v3103_v33  ;;  %1225 = vmatpush.bf16.msrb.mxu1 %v3079_v50 }
 0x183   :  { %1238 = vmatpush.bf16.msrb.mxu2 %v3083_v51  ;;  %1213 = vmatpush.bf16.msrb.mxu0 %v3059_v59 }
 0x186   :  { %1251 = vmatpush.bf16.msrb.mxu3 %v3087_v58  ;;  %1226 = vmatpush.bf16.msrb.mxu1 %v3063_v63 }
 0x187   :  { %1239 = vmatpush.bf16.msrb.mxu2 %v3067_v6  ;;  %1214 = vmatpush.bf16.msrb.mxu0 %v3043_v13 }
 0x18a   :  { %1252 = vmatpush.bf16.msrb.mxu3 %v3071_v7  ;;  %1227 = vmatpush.bf16.msrb.mxu1 %v3047_v17  ;;  %v3288_v7 = vld [vmem:[#allocation4 + $0xe0] sm:$0xf]  ;;  %v3301_v17 = vor.u32 %v3865_v15, %v3298_v16  ;;  %v3210_v15 = vld [vmem:[#allocation4 + $0x50] sm:$0xf0]  ;;  %v3216_v16 = vld [vmem:[#allocation4 + $0x48] sm:$0xf] }
 0x18b   :  { %1240 = vmatpush.bf16.msrb.mxu2 %v3051_v18  ;;  %v3289_v10 = vor.u32 %v3866_v8, %v3288_v7  ;;  %v3272_v18 = vld [vmem:[#allocation4 + $0xc0] sm:$0xf]  ;;  %v4247_v8 = vld [vmem:[%s4322_s0 + $0x38] sm:$0xff] }
 0x18d   :  { %1528 = vmatpush.bf16.msra.mxu0 %v3289_v10 }
 0x1fd   :  { %v895_v57 = vpop.f32.mrf.mxu0  ;;  %v908_v37 = vpop.f32.mrf.mxu1 }
 0x1fe   :  { %v938_v39 = vadd.f32 %v895_v57, %v689_v22  ;;  %v939_v40 = vadd.f32 %v908_v37, %v690_v23  ;;  %v3055_v23 = vor.u32 %v3805_v19, %v3052_v20  ;;  %v3862_v19 = vld [vmem:[#allocation4 + $0xcc] sm:$0xf0]  ;;  %v3860_v20 = vld [vmem:[#allocation4 + $0xc4] sm:$0xf] }
 0x200   :  { %v3034_v48 = vmul.f32 -1.442695, %v938_v39  ;;  %v3035_v49 = vmul.f32 -1.442695, %v939_v40  ;;  %1253 = vmatpush.bf16.msrb.mxu3 %v3055_v23  ;;  %v3280_v23 = vld [vmem:[#allocation4 + $0xc8] sm:$0xf] }
 0x202   :  { %4000 = vpow2.f32 %v3034_v48 }
 0x203   :  { %4002 = vpow2.f32 %v3035_v49 }
 0x204   :  { %v921_v3 = vpop.f32.mrf.mxu2  ;;  %v934_v5 = vpop.f32.mrf.mxu3  ;;  %1567 = vmatpush.bf16.msra.mxu3 %v3301_v17  ;;  %v3847_v17 = vld [vmem:[#allocation4 + $0x54] sm:$0xf0] }
 0x205   :  { %v940_v11 = vadd.f32 %v921_v3, %v691_v53  ;;  %v897_v12 = vpop.f32.mrf.mxu0  ;;  %v910_v4 = vpop.f32.mrf.mxu1  ;;  %v941_v35 = vadd.f32 %v934_v5, %v692_v30 }
 0x206   :  { %v3296_v12 = vld [vmem:[#allocation4 + $0xe8] sm:$0xf]  ;;  %v3867_v4 = vld [vmem:[#allocation4 + $0xf4] sm:$0xf0] }
 0x207   :  { %v3036_v21 = vmul.f32 -1.442695, %v940_v11  ;;  %v3290_v11 = vld [vmem:[#allocation4 + $0xf0] sm:$0xf0]  ;;  %v3297_v14 = vor.u32 %v3867_v4, %v3296_v12  ;;  %v3208_v12 = vld [vmem:[#allocation4 + $0x40] sm:$0xf] }
 0x208   :  { %v4001_v22 = vpop.eup %4000  ;;  %v3293_v13 = vor.u32 %v3864_v9, %v3290_v11  ;;  %v3846_v4 = vld [vmem:[#allocation4 + $0x4c] sm:$0xf0] }
 0x209   :  { %v4003_v24 = vpop.eup %4002  ;;  %v951_v25 = vadd.f32 1.0, %v4001_v22  ;;  %4004 = vpow2.f32 %v3036_v21  ;;  %1554 = vmatpush.bf16.msra.mxu2 %v3297_v14  ;;  %v3273_v21 = vor.u32 %v3862_v19, %v3272_v18  ;;  %v3274_v22 = vld [vmem:[#allocation4 + $0xd0] sm:$0xf0]  ;;  %v3209_v14 = vor.u32 %v3846_v4, %v3208_v12 }
 0x20a   :  { %v952_v26 = vadd.f32 1.0, %v4003_v24  ;;  %1541 = vmatpush.bf16.msra.mxu1 %v3293_v13  ;;  %v3863_v24 = vld [vmem:[#allocation4 + $0xd4] sm:$0xf0]  ;;  %v3844_v13 = vld [vmem:[#allocation4 + $0x44] sm:$0xf] }
 0x20b   :  { %4006 = vrcp.f32 %v951_v25  ;;  %v965_v40 = vand.u32 2147483648, %v951_v25  ;;  %v963_v43 = vand.u32 2147483647, %v951_v25  ;;  %vm959_vm10 = vweird.f32 %v951_v25  ;;  %1529 = vmatpush.bf16.msra.mxu0 %v3273_v21 }
 0x20c   :  { %4008 = vrcp.f32 %v952_v26  ;;  %v923_v28 = vpop.f32.mrf.mxu2  ;;  %v936_v29 = vpop.f32.mrf.mxu3  ;;  %v980_v41 = vand.u32 2147483648, %v952_v26  ;;  %v978_v45 = vand.u32 2147483647, %v952_v26  ;;  %vm974_vm11 = vweird.f32 %v952_v26 }
 0x20d   :  { %v966_v48 = vor.u32 1.1754944e-38, %v965_v40  ;;  %vm964_vm14 = vcmp.eq.f32.partialorder %v963_v43, 8.507059e+37  ;;  %v3861_v28 = vld [vmem:[#allocation4 + $0xcc] sm:$0xf]  ;;  %v3282_v29 = vld [vmem:[#allocation4 + $0xd8] sm:$0xf0]  ;;  %v3217_v21 = vor.u32 %v3847_v17, %v3216_v16 }
 0x20e   :  { %v981_v50 = vor.u32 1.1754944e-38, %v980_v41  ;;  %vm979_vm15 = vcmp.eq.f32.partialorder %v978_v45, 8.507059e+37  ;;  %v3285_v30 = vor.u32 %v3861_v28, %v3282_v29  ;;  %v3857_v40 = vld [vmem:[#allocation4 + $0xac] sm:$0xf]  ;;  %v3266_v41 = vld [vmem:[#allocation4 + $0xb8] sm:$0xf0] }
 0x20f   :  { %v4005_v31 = vpop.eup %4004  ;;  %v3269_v43 = vor.u32 %v3857_v40, %v3266_v41  ;;  %v3854_v45 = vld [vmem:[#allocation4 + $0x8c] sm:$0xf0]  ;;  %v3176_v41 = vld [vmem:[#allocation4] sm:$0xf] }
 0x210   :  { %v953_v32 = vadd.f32 1.0, %v4005_v31  ;;  %v3256_v31 = vld [vmem:[#allocation4 + $0xa0] sm:$0xf]  ;;  %1568 = vmatpush.bf16.msra.mxu3 %v3285_v30  ;;  %v3840_v30 = vld [vmem:[#allocation4 + $0x24] sm:$0xf] }
 0x211   :  { %v4007_v34 = vpop.eup %4006 }
 0x212   :  { %v4009_v36 = vpop.eup %4008  ;;  %v955_v57 = vmul.f32 %v4007_v34, %v951_v25  ;;  %4010 = vrcp.f32 %v953_v32  ;;  %vm960_vm8 = vweird.f32 %v4007_v34  ;;  %v995_v63 = vand.u32 2147483648, %v953_v32 }
 0x213   :  { %v970_v37 = vmul.f32 %v4009_v36, %v952_v26  ;;  %4012 = vtanh.f32 %v941_v35  ;;  %vm975_vm9 = vweird.f32 %v4009_v36  ;;  %vm961_vm12 = vmor %vm959_vm10, %vm960_vm8  ;;  %vm989_vm1 = vweird.f32 %v953_v32 }
 0x214   :  { %v956_v33 = vsub.f32 1.0, %v955_v57  ;;  %vm976_vm13 = vmor %vm974_vm11, %vm975_vm9  ;;  %v993_v0 = vand.u32 2147483647, %v953_v32  ;;  %v996_v2 = vor.u32 1.1754944e-38, %v995_v63  ;;  %v3277_v25 = vor.u32 %v3860_v20, %v3274_v22  ;;  %v3264_v57 = vld [vmem:[#allocation4 + $0xa8] sm:$0xf]  ;;  %1569 = vmatpush.bf16.msra.mxu3 %v3269_v43 }
 0x215   :  { %v971_v39 = vsub.f32 1.0, %v970_v37  ;;  %v3281_v26 = vor.u32 %v3863_v24, %v3280_v23  ;;  %v3859_v37 = vld [vmem:[#allocation4 + $0xb4] sm:$0xf0]  ;;  %v3226_v63 = vld [vmem:[#allocation4 + $0x70] sm:$0xf0]  ;;  %v3213_v20 = vor.u32 %v3844_v13, %v3210_v15  ;;  %v1012_v23 = vunpack.c.l.bf16 %v4247_v8 }
 0x216   :  { %v957_v42 = vmul.f32 %v4007_v34, %v956_v33  ;;  %vm994_vm3 = vcmp.eq.f32.partialorder %v993_v0, 8.507059e+37  ;;  %1542 = vmatpush.bf16.msra.mxu1 %v3277_v25  ;;  %v3232_v0 = vld [vmem:[#allocation4 + $0x68] sm:$0xf]  ;;  %v3845_v22 = vld [vmem:[#allocation4 + $0x4c] sm:$0xf] }
 0x217   :  { %v972_v44 = vmul.f32 %v4009_v36, %v971_v39  ;;  %1555 = vmatpush.bf16.msra.mxu2 %v3281_v26  ;;  %v3265_v39 = vor.u32 %v3859_v37, %v3264_v57  ;;  %v3218_v24 = vld [vmem:[#allocation4 + $0x58] sm:$0xf0]  ;;  %v3192_v25 = vld [vmem:[#allocation4 + $0x20] sm:$0xf]  ;;  %v3842_v26 = vld [vmem:[#allocation4 + $0x2c] sm:$0xf0] }
 0x218   :  { %v4011_v38 = vpop.eup %4010  ;;  %v958_v46 = vadd.f32 %v4007_v34, %v957_v42  ;;  %v3038_v42 = vld [vmem:[%s4322_s0 + $0x30] sm:$0xff]  ;;  %v3221_v28 = vor.u32 %v3845_v22, %v3218_v24  ;;  %v3193_v29 = vor.u32 %v3842_v26, %v3192_v25  ;;  %v3202_v57 = vld [vmem:[#allocation4 + $0x38] sm:$0xf0]  ;;  %v3836_v43 = vld [vmem:[#allocation4 + $0x4] sm:$0xf] }
 0x219   :  { %v985_v47 = vmul.f32 %v4011_v38, %v953_v32  ;;  %v973_v49 = vadd.f32 %v4009_v36, %v972_v44  ;;  %v4013_v52 = vpop.eup %4012  ;;  %vm990_vm0 = vweird.f32 %v4011_v38  ;;  %v3858_v32 = vld [vmem:[#allocation4 + $0xac] sm:$0xf0]  ;;  %v3240_v44 = vld [vmem:[#allocation4 + $0x80] sm:$0xf] }
 0x21a   :  { %v962_v51 = vsel %vm961_vm12, %v4007_v34, %v958_v46  ;;  %vm991_vm2 = vmor %vm989_vm1, %vm990_vm0  ;;  %v3856_v34 = vld [vmem:[#allocation4 + $0xa4] sm:$0xf]  ;;  %v3257_v35 = vor.u32 %v3858_v32, %v3256_v31  ;;  %v3241_v46 = vor.u32 %v3854_v45, %v3240_v44  ;;  %v3194_v31 = vld [vmem:[#allocation4 + $0x30] sm:$0xf0] }
 0x21b   :  { %v986_v53 = vsub.f32 1.0, %v985_v47  ;;  %v967_v54 = vsel %vm964_vm14, %v966_v48, %v962_v51  ;;  %v977_v55 = vsel %vm976_vm13, %v4009_v36, %v973_v49  ;;  %v3258_v36 = vld [vmem:[#allocation4 + $0xb0] sm:$0xf0]  ;;  %1556 = vmatpush.bf16.msra.mxu2 %v3265_v39  ;;  %v3248_v48 = vld [vmem:[#allocation4 + $0x88] sm:$0xf] }
 0x21c   :  { %v982_v56 = vsel %vm979_vm15, %v981_v50, %v977_v55  ;;  %v1001_v58 = vmul.f32 %v4013_v52, %v967_v54  ;;  %v3261_v33 = vor.u32 %v3856_v34, %v3258_v36  ;;  %1530 = vmatpush.bf16.msra.mxu0 %v3257_v35  ;;  %v3242_v47 = vld [vmem:[#allocation4 + $0x90] sm:$0xf0]  ;;  %v3855_v49 = vld [vmem:[#allocation4 + $0x94] sm:$0xf0]  ;;  %v3853_v52 = vld [vmem:[#allocation4 + $0x8c] sm:$0xf]  ;;  %v1010_v55 = vunpack.c.l.bf16 %v3038_v42 }
 0x21d   :  { %v987_v59 = vmul.f32 %v4011_v38, %v986_v53  ;;  %v1000_v60 = vmul.f32 %v982_v56, %v4218_v27  ;;  %v3249_v51 = vor.u32 %v3855_v49, %v3248_v48  ;;  %v3250_v53 = vld [vmem:[#allocation4 + $0x98] sm:$0xf0]  ;;  %v1011_v56 = vunpack.c.h.bf16 %v3038_v42  ;;  %v3200_v32 = vld [vmem:[#allocation4 + $0x28] sm:$0xf]  ;;  %v3843_v35 = vld [vmem:[#allocation4 + $0x34] sm:$0xf0] }
 0x21e   :  { %1543 = vmatpush.bf16.msra.mxu1 %v3261_v33  ;;  %v3253_v54 = vor.u32 %v3853_v52, %v3250_v53  ;;  %v3197_v34 = vor.u32 %v3840_v30, %v3194_v31  ;;  %v3841_v36 = vld [vmem:[#allocation4 + $0x2c] sm:$0xf]  ;;  %v3201_v39 = vor.u32 %v3843_v35, %v3200_v32  ;;  %v3838_v42 = vld [vmem:[#allocation4 + $0xc] sm:$0xf0]  ;;  %v3184_v48 = vld [vmem:[#allocation4 + $0x8] sm:$0xf] }
 0x21f   :  { %v4235_v61 = vadd.f32 %v1001_v58, %v1000_v60  ;;  %v988_v62 = vadd.f32 %v4011_v38, %v987_v59  ;;  %1557 = vmatpush.bf16.msra.mxu2 %v3249_v51  ;;  %v3224_v58 = vld [vmem:[#allocation4 + $0x60] sm:$0xf]  ;;  %v3850_v59 = vld [vmem:[#allocation4 + $0x6c] sm:$0xf0]  ;;  %v3848_v60 = vld [vmem:[#allocation4 + $0x64] sm:$0xf]  ;;  %v3205_v40 = vor.u32 %v3841_v36, %v3202_v57 }
 0x220   :  { %1531 = vmatpush.bf16.msra.mxu0 %v3241_v46  ;;  %1570 = vmatpush.bf16.msra.mxu3 %v3253_v54  ;;  %v3177_v46 = vor.u32 %v3838_v42, %v3176_v41  ;;  %v3839_v49 = vld [vmem:[#allocation4 + $0x14] sm:$0xf0]  ;;  %v3837_v52 = vld [vmem:[#allocation4 + $0xc] sm:$0xf]  ;;  %v3186_v53 = vld [vmem:[#allocation4 + $0x18] sm:$0xf0] }
 0x221   :  { %4014 = vtanh.f32 %v4235_v61  ;;  %v992_v1 = vsel %vm991_vm2, %v4011_v38, %v988_v62  ;;  %v3852_v38 = vld [vmem:[#allocation4 + $0x84] sm:$0xf]  ;;  %v3225_v62 = vor.u32 %v3850_v59, %v3224_v58  ;;  %v3185_v51 = vor.u32 %v3839_v49, %v3184_v48  ;;  %v3898_v41 = vld [vmem:[#allocation4 + $0xec] sm:$0xf0]  ;;  %v3897_v48 = vld [vmem:[#allocation4 + $0xec] sm:$0xf] }
 0x222   :  { %v997_v5 = vsel %vm994_vm3, %v996_v2, %v992_v1  ;;  %v3245_v50 = vor.u32 %v3852_v38, %v3242_v47  ;;  %v3851_v1 = vld [vmem:[#allocation4 + $0x74] sm:$0xf0]  ;;  %v3229_v2 = vor.u32 %v3848_v60, %v3226_v63  ;;  %v3178_v47 = vld [vmem:[#allocation4 + $0x10] sm:$0xf0]  ;;  %v3896_v42 = vld [vmem:[#allocation4 + $0xe4] sm:$0xf] }
 0x223   :  { %v3432_v49 = vld [vmem:[#allocation4 + $0xf8] sm:$0xf0] }
 0x224   :  { %1544 = vmatpush.bf16.msra.mxu1 %v3245_v50  ;;  %1532 = vmatpush.bf16.msra.mxu0 %v3225_v62  ;;  %v3181_v50 = vor.u32 %v3836_v43, %v3178_v47 }
 0x227   :  { %v4015_v3 = vpop.eup %4014 }
 0x228   :  { %v1004_v6 = vmul.f32 %v4015_v3, %v997_v5  ;;  %v3233_v3 = vor.u32 %v3851_v1, %v3232_v0  ;;  %v3849_v5 = vld [vmem:[#allocation4 + $0x6c] sm:$0xf]  ;;  %1545 = vmatpush.bf16.msra.mxu1 %v3229_v2  ;;  %1533 = vmatpush.bf16.msra.mxu0 %v3209_v14  ;;  %v1013_v0 = vunpack.c.h.bf16 %v4247_v8 }
 0x22a   :  { %3037 = vst [vmem:[%s4326_s4 + $0x10] sm:$0xff] %v1004_v6  ;;  %v1014_v27 = vpack.c.bf16 %v1004_v6, %v1004_v6  ;;  %v3234_v6 = vld [vmem:[#allocation4 + $0x78] sm:$0xf0]  ;;  %1558 = vmatpush.bf16.msra.mxu2 %v3233_v3 }
 0x22b   :  { %v3237_v9 = vor.u32 %v3849_v5, %v3234_v6 }
 0x22c   :  { %1215 = vmatmul.bf16.vlgmr.msrb.gmra.mxu0 %v1014_v27  ;;  %1228 = vmatmul.bf16.vlgmr.msrb.gmra.mxu1 %v1014_v27 }
 0x22d   :  { %1241 = vmatmul.bf16.vlgmr.msrb.gmra.mxu2 %v1014_v27  ;;  %1254 = vmatmul.bf16.vlgmr.msrb.gmra.mxu3 %v1014_v27 }
 0x22e   :  { %1571 = vmatpush.bf16.msra.mxu3 %v3237_v9  ;;  %1546 = vmatpush.bf16.msra.mxu1 %v3213_v20 }
 0x22f   :  { %1559 = vmatpush.bf16.msra.mxu2 %v3217_v21  ;;  %1534 = vmatpush.bf16.msra.mxu0 %v3193_v29 }
 0x232   :  { %1572 = vmatpush.bf16.msra.mxu3 %v3221_v28  ;;  %1547 = vmatpush.bf16.msra.mxu1 %v3197_v34 }
 0x233   :  { %1560 = vmatpush.bf16.msra.mxu2 %v3201_v39  ;;  %1535 = vmatpush.bf16.msra.mxu0 %v3177_v46 }
 0x236   :  { %1573 = vmatpush.bf16.msra.mxu3 %v3205_v40  ;;  %1548 = vmatpush.bf16.msra.mxu1 %v3181_v50  ;;  %v3422_v40 = vld [vmem:[#allocation4 + $0xe0] sm:$0xf]  ;;  %v3435_v50 = vor.u32 %v3897_v48, %v3432_v49  ;;  %v3344_v48 = vld [vmem:[#allocation4 + $0x50] sm:$0xf0]  ;;  %v3350_v49 = vld [vmem:[#allocation4 + $0x48] sm:$0xf] }
 0x237   :  { %1561 = vmatpush.bf16.msra.mxu2 %v3185_v51  ;;  %v3423_v43 = vor.u32 %v3898_v41, %v3422_v40  ;;  %v3406_v51 = vld [vmem:[#allocation4 + $0xc0] sm:$0xf]  ;;  %v4264_v41 = vld [vmem:[%s4322_s0 + $0x48] sm:$0xff] }
 0x239   :  { %1849 = vmatpush.bf16.msrb.mxu0 %v3423_v43 }
 0x2a9   :  { %v1216_v27 = vpop.f32.mrf.mxu0  ;;  %v1229_v7 = vpop.f32.mrf.mxu1 }
 0x2aa   :  { %v1259_v10 = vadd.f32 %v1216_v27, %v1010_v55  ;;  %v1260_v11 = vadd.f32 %v1229_v7, %v1011_v56  ;;  %v3189_v56 = vor.u32 %v3837_v52, %v3186_v53  ;;  %v3894_v52 = vld [vmem:[#allocation4 + $0xcc] sm:$0xf0]  ;;  %v3892_v53 = vld [vmem:[#allocation4 + $0xc4] sm:$0xf] }
 0x2ac   :  { %v3168_v18 = vmul.f32 -1.442695, %v1259_v10  ;;  %v3169_v19 = vmul.f32 -1.442695, %v1260_v11  ;;  %1574 = vmatpush.bf16.msra.mxu3 %v3189_v56  ;;  %v3414_v56 = vld [vmem:[#allocation4 + $0xc8] sm:$0xf] }
 0x2ae   :  { %4016 = vpow2.f32 %v3168_v18 }
 0x2af   :  { %4018 = vpow2.f32 %v3169_v19 }
 0x2b0   :  { %v1242_v37 = vpop.f32.mrf.mxu2  ;;  %v1255_v33 = vpop.f32.mrf.mxu3  ;;  %1888 = vmatpush.bf16.msrb.mxu3 %v3435_v50  ;;  %v3879_v50 = vld [vmem:[#allocation4 + $0x54] sm:$0xf0] }
 0x2b1   :  { %v1261_v44 = vadd.f32 %v1242_v37, %v1012_v23  ;;  %v1218_v45 = vpop.f32.mrf.mxu0  ;;  %v1231_v38 = vpop.f32.mrf.mxu1  ;;  %v1262_v5 = vadd.f32 %v1255_v33, %v1013_v0 }
 0x2b2   :  { %v3430_v45 = vld [vmem:[#allocation4 + $0xe8] sm:$0xf]  ;;  %v3899_v38 = vld [vmem:[#allocation4 + $0xf4] sm:$0xf0] }
 0x2b3   :  { %v3170_v54 = vmul.f32 -1.442695, %v1261_v44  ;;  %v3424_v44 = vld [vmem:[#allocation4 + $0xf0] sm:$0xf0]  ;;  %v3431_v47 = vor.u32 %v3899_v38, %v3430_v45  ;;  %v3342_v45 = vld [vmem:[#allocation4 + $0x40] sm:$0xf] }
 0x2b4   :  { %v4017_v55 = vpop.eup %4016  ;;  %v3427_v46 = vor.u32 %v3896_v42, %v3424_v44  ;;  %v3878_v38 = vld [vmem:[#allocation4 + $0x4c] sm:$0xf0] }
 0x2b5   :  { %v4019_v58 = vpop.eup %4018  ;;  %v1272_v59 = vadd.f32 1.0, %v4017_v55  ;;  %4020 = vpow2.f32 %v3170_v54  ;;  %1875 = vmatpush.bf16.msrb.mxu2 %v3431_v47  ;;  %v3407_v54 = vor.u32 %v3894_v52, %v3406_v51  ;;  %v3408_v55 = vld [vmem:[#allocation4 + $0xd0] sm:$0xf0]  ;;  %v3343_v47 = vor.u32 %v3878_v38, %v3342_v45 }
 0x2b6   :  { %v1273_v60 = vadd.f32 1.0, %v4019_v58  ;;  %1862 = vmatpush.bf16.msrb.mxu1 %v3427_v46  ;;  %v3895_v58 = vld [vmem:[#allocation4 + $0xd4] sm:$0xf0]  ;;  %v3876_v46 = vld [vmem:[#allocation4 + $0x44] sm:$0xf] }
 0x2b7   :  { %4022 = vrcp.f32 %v1272_v59  ;;  %v1286_v11 = vand.u32 2147483648, %v1272_v59  ;;  %v1284_v13 = vand.u32 2147483647, %v1272_v59  ;;  %vm1280_vm6 = vweird.f32 %v1272_v59  ;;  %1850 = vmatpush.bf16.msrb.mxu0 %v3407_v54 }
 0x2b8   :  { %4024 = vrcp.f32 %v1273_v60  ;;  %v1244_v62 = vpop.f32.mrf.mxu2  ;;  %v1257_v63 = vpop.f32.mrf.mxu3  ;;  %v1301_v12 = vand.u32 2147483648, %v1273_v60  ;;  %v1299_v15 = vand.u32 2147483647, %v1273_v60  ;;  %vm1295_vm7 = vweird.f32 %v1273_v60 }
 0x2b9   :  { %v1287_v18 = vor.u32 1.1754944e-38, %v1286_v11  ;;  %vm1285_vm10 = vcmp.eq.f32.partialorder %v1284_v13, 8.507059e+37  ;;  %v3893_v62 = vld [vmem:[#allocation4 + $0xcc] sm:$0xf]  ;;  %v3416_v63 = vld [vmem:[#allocation4 + $0xd8] sm:$0xf0]  ;;  %v3351_v54 = vor.u32 %v3879_v50, %v3350_v49 }
 0x2ba   :  { %v1302_v20 = vor.u32 1.1754944e-38, %v1301_v12  ;;  %vm1300_vm11 = vcmp.eq.f32.partialorder %v1299_v15, 8.507059e+37  ;;  %v3419_v0 = vor.u32 %v3893_v62, %v3416_v63  ;;  %v3889_v11 = vld [vmem:[#allocation4 + $0xac] sm:$0xf]  ;;  %v3400_v12 = vld [vmem:[#allocation4 + $0xb8] sm:$0xf0] }
 0x2bb   :  { %v4021_v1 = vpop.eup %4020  ;;  %v3403_v13 = vor.u32 %v3889_v11, %v3400_v12  ;;  %v3886_v15 = vld [vmem:[#allocation4 + $0x8c] sm:$0xf0]  ;;  %v3310_v12 = vld [vmem:[#allocation4] sm:$0xf] }
 0x2bc   :  { %v1274_v2 = vadd.f32 1.0, %v4021_v1  ;;  %v3390_v1 = vld [vmem:[#allocation4 + $0xa0] sm:$0xf]  ;;  %1889 = vmatpush.bf16.msrb.mxu3 %v3419_v0  ;;  %v3872_v0 = vld [vmem:[#allocation4 + $0x24] sm:$0xf] }
 0x2bd   :  { %v4023_v3 = vpop.eup %4022 }
 0x2be   :  { %v4025_v6 = vpop.eup %4024  ;;  %v1276_v27 = vmul.f32 %v4023_v3, %v1272_v59  ;;  %4026 = vrcp.f32 %v1274_v2  ;;  %vm1281_vm4 = vweird.f32 %v4023_v3  ;;  %v1316_v34 = vand.u32 2147483648, %v1274_v2 }
 0x2bf   :  { %v1291_v7 = vmul.f32 %v4025_v6, %v1273_v60  ;;  %4028 = vtanh.f32 %v1262_v5  ;;  %vm1296_vm5 = vweird.f32 %v4025_v6  ;;  %vm1282_vm8 = vmor %vm1280_vm6, %vm1281_vm4  ;;  %vm1310_vm13 = vweird.f32 %v1274_v2 }
 0x2c0   :  { %v1277_v9 = vsub.f32 1.0, %v1276_v27  ;;  %vm1297_vm9 = vmor %vm1295_vm7, %vm1296_vm5  ;;  %v1314_v35 = vand.u32 2147483647, %v1274_v2  ;;  %v1317_v57 = vor.u32 1.1754944e-38, %v1316_v34  ;;  %v3411_v59 = vor.u32 %v3892_v53, %v3408_v55  ;;  %v3398_v27 = vld [vmem:[#allocation4 + $0xa8] sm:$0xf]  ;;  %1890 = vmatpush.bf16.msrb.mxu3 %v3403_v13 }
 0x2c1   :  { %v1292_v10 = vsub.f32 1.0, %v1291_v7  ;;  %v3415_v60 = vor.u32 %v3895_v58, %v3414_v56  ;;  %v3891_v7 = vld [vmem:[#allocation4 + $0xb4] sm:$0xf0]  ;;  %v3360_v34 = vld [vmem:[#allocation4 + $0x70] sm:$0xf0]  ;;  %v3347_v53 = vor.u32 %v3876_v46, %v3344_v48  ;;  %v1333_v56 = vunpack.c.l.bf16 %v4264_v41 }
 0x2c2   :  { %v1278_v4 = vmul.f32 %v4023_v3, %v1277_v9  ;;  %vm1315_vm15 = vcmp.eq.f32.partialorder %v1314_v35, 8.507059e+37  ;;  %1863 = vmatpush.bf16.msrb.mxu1 %v3411_v59  ;;  %v3366_v35 = vld [vmem:[#allocation4 + $0x68] sm:$0xf]  ;;  %v3877_v55 = vld [vmem:[#allocation4 + $0x4c] sm:$0xf] }
 0x2c3   :  { %v1293_v14 = vmul.f32 %v4025_v6, %v1292_v10  ;;  %1876 = vmatpush.bf16.msrb.mxu2 %v3415_v60  ;;  %v3399_v10 = vor.u32 %v3891_v7, %v3398_v27  ;;  %v3352_v58 = vld [vmem:[#allocation4 + $0x58] sm:$0xf0]  ;;  %v3326_v59 = vld [vmem:[#allocation4 + $0x20] sm:$0xf]  ;;  %v3874_v60 = vld [vmem:[#allocation4 + $0x2c] sm:$0xf0] }
 0x2c4   :  { %v4027_v8 = vpop.eup %4026  ;;  %v1279_v16 = vadd.f32 %v4023_v3, %v1278_v4  ;;  %v3172_v4 = vld [vmem:[%s4322_s0 + $0x40] sm:$0xff]  ;;  %v3355_v62 = vor.u32 %v3877_v55, %v3352_v58  ;;  %v3327_v63 = vor.u32 %v3874_v60, %v3326_v59  ;;  %v3336_v27 = vld [vmem:[#allocation4 + $0x38] sm:$0xf0] }
 0x2c5   :  { %v1306_v17 = vmul.f32 %v4027_v8, %v1274_v2  ;;  %v1294_v19 = vadd.f32 %v4025_v6, %v1293_v14  ;;  %v4029_v22 = vpop.eup %4028  ;;  %vm1311_vm12 = vweird.f32 %v4027_v8  ;;  %v3890_v2 = vld [vmem:[#allocation4 + $0xac] sm:$0xf0]  ;;  %v3374_v14 = vld [vmem:[#allocation4 + $0x80] sm:$0xf]  ;;  %v3868_v13 = vld [vmem:[#allocation4 + $0x4] sm:$0xf] }
 0x2c6   :  { %v1283_v21 = vsel %vm1282_vm8, %v4023_v3, %v1279_v16  ;;  %vm1312_vm14 = vmor %vm1310_vm13, %vm1311_vm12  ;;  %v3888_v3 = vld [vmem:[#allocation4 + $0xa4] sm:$0xf]  ;;  %v3391_v5 = vor.u32 %v3890_v2, %v3390_v1  ;;  %v3375_v16 = vor.u32 %v3886_v15, %v3374_v14  ;;  %v3328_v1 = vld [vmem:[#allocation4 + $0x30] sm:$0xf0] }
 0x2c7   :  { %v1307_v23 = vsub.f32 1.0, %v1306_v17  ;;  %v1288_v24 = vsel %vm1285_vm10, %v1287_v18, %v1283_v21  ;;  %v1298_v25 = vsel %vm1297_vm9, %v4025_v6, %v1294_v19  ;;  %v3392_v6 = vld [vmem:[#allocation4 + $0xb0] sm:$0xf0]  ;;  %1877 = vmatpush.bf16.msrb.mxu2 %v3399_v10  ;;  %v3382_v18 = vld [vmem:[#allocation4 + $0x88] sm:$0xf] }
 0x2c8   :  { %v1303_v26 = vsel %vm1300_vm11, %v1302_v20, %v1298_v25  ;;  %v1322_v28 = vmul.f32 %v4029_v22, %v1288_v24  ;;  %v3395_v9 = vor.u32 %v3888_v3, %v3392_v6  ;;  %1851 = vmatpush.bf16.msrb.mxu0 %v3391_v5  ;;  %v3376_v17 = vld [vmem:[#allocation4 + $0x90] sm:$0xf0]  ;;  %v3887_v19 = vld [vmem:[#allocation4 + $0x94] sm:$0xf0]  ;;  %v3885_v22 = vld [vmem:[#allocation4 + $0x8c] sm:$0xf]  ;;  %v1331_v25 = vunpack.c.l.bf16 %v3172_v4 }
 0x2c9   :  { %v1308_v29 = vmul.f32 %v4027_v8, %v1307_v23  ;;  %v1321_v30 = vmul.f32 %v1303_v26, %v4235_v61  ;;  %v3383_v21 = vor.u32 %v3887_v19, %v3382_v18  ;;  %v3384_v23 = vld [vmem:[#allocation4 + $0x98] sm:$0xf0]  ;;  %v1332_v26 = vunpack.c.h.bf16 %v3172_v4  ;;  %v3334_v2 = vld [vmem:[#allocation4 + $0x28] sm:$0xf]  ;;  %v3875_v5 = vld [vmem:[#allocation4 + $0x34] sm:$0xf0] }
 0x2ca   :  { %1864 = vmatpush.bf16.msrb.mxu1 %v3395_v9  ;;  %v3387_v24 = vor.u32 %v3885_v22, %v3384_v23  ;;  %v3331_v3 = vor.u32 %v3872_v0, %v3328_v1  ;;  %v3873_v6 = vld [vmem:[#allocation4 + $0x2c] sm:$0xf]  ;;  %v3335_v10 = vor.u32 %v3875_v5, %v3334_v2  ;;  %v3870_v4 = vld [vmem:[#allocation4 + $0xc] sm:$0xf0]  ;;  %v3318_v18 = vld [vmem:[#allocation4 + $0x8] sm:$0xf] }
 0x2cb   :  { %v4252_v31 = vadd.f32 %v1322_v28, %v1321_v30  ;;  %v1309_v32 = vadd.f32 %v4027_v8, %v1308_v29  ;;  %1878 = vmatpush.bf16.msrb.mxu2 %v3383_v21  ;;  %v3358_v28 = vld [vmem:[#allocation4 + $0x60] sm:$0xf]  ;;  %v3882_v29 = vld [vmem:[#allocation4 + $0x6c] sm:$0xf0]  ;;  %v3880_v30 = vld [vmem:[#allocation4 + $0x64] sm:$0xf]  ;;  %v3339_v11 = vor.u32 %v3873_v6, %v3336_v27 }
 0x2cc   :  { %1852 = vmatpush.bf16.msrb.mxu0 %v3375_v16  ;;  %1891 = vmatpush.bf16.msrb.mxu3 %v3387_v24  ;;  %v3311_v16 = vor.u32 %v3870_v4, %v3310_v12  ;;  %v3871_v19 = vld [vmem:[#allocation4 + $0x14] sm:$0xf0]  ;;  %v3869_v22 = vld [vmem:[#allocation4 + $0xc] sm:$0xf]  ;;  %v3320_v23 = vld [vmem:[#allocation4 + $0x18] sm:$0xf0] }
 0x2cd   :  { %4030 = vtanh.f32 %v4252_v31  ;;  %v1313_v36 = vsel %vm1312_vm14, %v4027_v8, %v1309_v32  ;;  %v3884_v8 = vld [vmem:[#allocation4 + $0x84] sm:$0xf]  ;;  %v3359_v32 = vor.u32 %v3882_v29, %v3358_v28  ;;  %v3319_v21 = vor.u32 %v3871_v19, %v3318_v18  ;;  %v3930_v12 = vld [vmem:[#allocation4 + $0xec] sm:$0xf0]  ;;  %v3929_v18 = vld [vmem:[#allocation4 + $0xec] sm:$0xf] }
 0x2ce   :  { %v1318_v33 = vsel %vm1315_vm15, %v1317_v57, %v1313_v36  ;;  %v3379_v20 = vor.u32 %v3884_v8, %v3376_v17  ;;  %v3883_v36 = vld [vmem:[#allocation4 + $0x74] sm:$0xf0]  ;;  %v3363_v57 = vor.u32 %v3880_v30, %v3360_v34  ;;  %v3312_v17 = vld [vmem:[#allocation4 + $0x10] sm:$0xf0]  ;;  %v3928_v4 = vld [vmem:[#allocation4 + $0xe4] sm:$0xf] }
 0x2cf   :  { %v3566_v19 = vld [vmem:[#allocation4 + $0xf8] sm:$0xf0] }
 0x2d0   :  { %1865 = vmatpush.bf16.msrb.mxu1 %v3379_v20  ;;  %1853 = vmatpush.bf16.msrb.mxu0 %v3359_v32  ;;  %v3315_v20 = vor.u32 %v3868_v13, %v3312_v17 }
 0x2d3   :  { %v4031_v37 = vpop.eup %4030 }
 0x2d4   :  { %v1325_v39 = vmul.f32 %v4031_v37, %v1318_v33  ;;  %v3367_v37 = vor.u32 %v3883_v36, %v3366_v35  ;;  %v3881_v33 = vld [vmem:[#allocation4 + $0x6c] sm:$0xf]  ;;  %1866 = vmatpush.bf16.msrb.mxu1 %v3363_v57  ;;  %1854 = vmatpush.bf16.msrb.mxu0 %v3343_v47  ;;  %v1334_v35 = vunpack.c.h.bf16 %v4264_v41 }
 0x2d6   :  { %3171 = vst [vmem:[%s4326_s4 + $0x18] sm:$0xff] %v1325_v39  ;;  %v1335_v61 = vpack.c.bf16 %v1325_v39, %v1325_v39  ;;  %v3368_v39 = vld [vmem:[#allocation4 + $0x78] sm:$0xf0]  ;;  %1879 = vmatpush.bf16.msrb.mxu2 %v3367_v37 }
 0x2d7   :  { %v3371_v42 = vor.u32 %v3881_v33, %v3368_v39 }
 0x2d8   :  { %1536 = vmatmul.bf16.vlgmr.msra.gmra.mxu0 %v1335_v61  ;;  %1549 = vmatmul.bf16.vlgmr.msra.gmra.mxu1 %v1335_v61 }
 0x2d9   :  { %1562 = vmatmul.bf16.vlgmr.msra.gmra.mxu2 %v1335_v61  ;;  %1575 = vmatmul.bf16.vlgmr.msra.gmra.mxu3 %v1335_v61 }
 0x2da   :  { %1892 = vmatpush.bf16.msrb.mxu3 %v3371_v42  ;;  %1867 = vmatpush.bf16.msrb.mxu1 %v3347_v53 }
 0x2db   :  { %1880 = vmatpush.bf16.msrb.mxu2 %v3351_v54  ;;  %1855 = vmatpush.bf16.msrb.mxu0 %v3327_v63 }
 0x2de   :  { %1893 = vmatpush.bf16.msrb.mxu3 %v3355_v62  ;;  %1868 = vmatpush.bf16.msrb.mxu1 %v3331_v3 }
 0x2df   :  { %1881 = vmatpush.bf16.msrb.mxu2 %v3335_v10  ;;  %1856 = vmatpush.bf16.msrb.mxu0 %v3311_v16 }
 0x2e2   :  { %1894 = vmatpush.bf16.msrb.mxu3 %v3339_v11  ;;  %1869 = vmatpush.bf16.msrb.mxu1 %v3315_v20  ;;  %v3556_v11 = vld [vmem:[#allocation4 + $0xe0] sm:$0xf]  ;;  %v3569_v20 = vor.u32 %v3929_v18, %v3566_v19  ;;  %v3478_v18 = vld [vmem:[#allocation4 + $0x50] sm:$0xf0]  ;;  %v3484_v19 = vld [vmem:[#allocation4 + $0x48] sm:$0xf] }
 0x2e3   :  { %1882 = vmatpush.bf16.msrb.mxu2 %v3319_v21  ;;  %v3557_v13 = vor.u32 %v3930_v12, %v3556_v11  ;;  %v3540_v21 = vld [vmem:[#allocation4 + $0xc0] sm:$0xf]  ;;  %v4281_v12 = vld [vmem:[%s4322_s0 + $0x58] sm:$0xff] }
 0x2e5   :  { %2170 = vmatpush.bf16.msra.mxu0 %v3557_v13 }
 0x355   :  { %v1537_v61 = vpop.f32.mrf.mxu0  ;;  %v1550_v40 = vpop.f32.mrf.mxu1 }
 0x356   :  { %v1580_v43 = vadd.f32 %v1537_v61, %v1331_v25  ;;  %v1581_v44 = vadd.f32 %v1550_v40, %v1332_v26  ;;  %v3323_v26 = vor.u32 %v3869_v22, %v3320_v23  ;;  %v3926_v22 = vld [vmem:[#allocation4 + $0xcc] sm:$0xf0]  ;;  %v3924_v23 = vld [vmem:[#allocation4 + $0xc4] sm:$0xf] }
 0x358   :  { %v3302_v51 = vmul.f32 -1.442695, %v1580_v43  ;;  %v3303_v52 = vmul.f32 -1.442695, %v1581_v44  ;;  %1895 = vmatpush.bf16.msrb.mxu3 %v3323_v26  ;;  %v3548_v26 = vld [vmem:[#allocation4 + $0xc8] sm:$0xf] }
 0x35a   :  { %4032 = vpow2.f32 %v3302_v51 }
 0x35b   :  { %4034 = vpow2.f32 %v3303_v52 }
 0x35c   :  { %v1563_v7 = vpop.f32.mrf.mxu2  ;;  %v1576_v9 = vpop.f32.mrf.mxu3  ;;  %2209 = vmatpush.bf16.msra.mxu3 %v3569_v20  ;;  %v3911_v20 = vld [vmem:[#allocation4 + $0x54] sm:$0xf0] }
 0x35d   :  { %v1582_v14 = vadd.f32 %v1563_v7, %v1333_v56  ;;  %v1539_v15 = vpop.f32.mrf.mxu0  ;;  %v1552_v8 = vpop.f32.mrf.mxu1  ;;  %v1583_v33 = vadd.f32 %v1576_v9, %v1334_v35 }
 0x35e   :  { %v3564_v15 = vld [vmem:[#allocation4 + $0xe8] sm:$0xf]  ;;  %v3931_v8 = vld [vmem:[#allocation4 + $0xf4] sm:$0xf0] }
 0x35f   :  { %v3304_v24 = vmul.f32 -1.442695, %v1582_v14  ;;  %v3558_v14 = vld [vmem:[#allocation4 + $0xf0] sm:$0xf0]  ;;  %v3565_v17 = vor.u32 %v3931_v8, %v3564_v15  ;;  %v3476_v15 = vld [vmem:[#allocation4 + $0x40] sm:$0xf] }
 0x360   :  { %v4033_v25 = vpop.eup %4032  ;;  %v3561_v16 = vor.u32 %v3928_v4, %v3558_v14  ;;  %v3910_v8 = vld [vmem:[#allocation4 + $0x4c] sm:$0xf0] }
 0x361   :  { %v4035_v28 = vpop.eup %4034  ;;  %v1593_v29 = vadd.f32 1.0, %v4033_v25  ;;  %4036 = vpow2.f32 %v3304_v24  ;;  %2196 = vmatpush.bf16.msra.mxu2 %v3565_v17  ;;  %v3541_v24 = vor.u32 %v3926_v22, %v3540_v21  ;;  %v3542_v25 = vld [vmem:[#allocation4 + $0xd0] sm:$0xf0]  ;;  %v3477_v17 = vor.u32 %v3910_v8, %v3476_v15 }
 0x362   :  { %v1594_v30 = vadd.f32 1.0, %v4035_v28  ;;  %2183 = vmatpush.bf16.msra.mxu1 %v3561_v16  ;;  %v3927_v28 = vld [vmem:[#allocation4 + $0xd4] sm:$0xf0]  ;;  %v3908_v16 = vld [vmem:[#allocation4 + $0x44] sm:$0xf] }
 0x363   :  { %4038 = vrcp.f32 %v1593_v29  ;;  %v1607_v44 = vand.u32 2147483648, %v1593_v29  ;;  %v1605_v46 = vand.u32 2147483647, %v1593_v29  ;;  %vm1601_vm2 = vweird.f32 %v1593_v29  ;;  %2171 = vmatpush.bf16.msra.mxu0 %v3541_v24 }
 0x364   :  { %4040 = vrcp.f32 %v1594_v30  ;;  %v1565_v32 = vpop.f32.mrf.mxu2  ;;  %v1578_v34 = vpop.f32.mrf.mxu3  ;;  %v1622_v45 = vand.u32 2147483648, %v1594_v30  ;;  %v1620_v48 = vand.u32 2147483647, %v1594_v30  ;;  %vm1616_vm3 = vweird.f32 %v1594_v30 }
 0x365   :  { %v1608_v51 = vor.u32 1.1754944e-38, %v1607_v44  ;;  %vm1606_vm6 = vcmp.eq.f32.partialorder %v1605_v46, 8.507059e+37  ;;  %v3925_v32 = vld [vmem:[#allocation4 + $0xcc] sm:$0xf]  ;;  %v3550_v34 = vld [vmem:[#allocation4 + $0xd8] sm:$0xf0]  ;;  %v3485_v24 = vor.u32 %v3911_v20, %v3484_v19 }
 0x366   :  { %v1623_v53 = vor.u32 1.1754944e-38, %v1622_v45  ;;  %vm1621_vm7 = vcmp.eq.f32.partialorder %v1620_v48, 8.507059e+37  ;;  %v3553_v35 = vor.u32 %v3925_v32, %v3550_v34  ;;  %v3921_v44 = vld [vmem:[#allocation4 + $0xac] sm:$0xf]  ;;  %v3534_v45 = vld [vmem:[#allocation4 + $0xb8] sm:$0xf0] }
 0x367   :  { %v4037_v36 = vpop.eup %4036  ;;  %v3537_v46 = vor.u32 %v3921_v44, %v3534_v45  ;;  %v3918_v48 = vld [vmem:[#allocation4 + $0x8c] sm:$0xf0]  ;;  %v3444_v45 = vld [vmem:[#allocation4] sm:$0xf] }
 0x368   :  { %v1595_v57 = vadd.f32 1.0, %v4037_v36  ;;  %v3524_v36 = vld [vmem:[#allocation4 + $0xa0] sm:$0xf]  ;;  %2210 = vmatpush.bf16.msra.mxu3 %v3553_v35  ;;  %v3904_v35 = vld [vmem:[#allocation4 + $0x24] sm:$0xf] }
 0x369   :  { %v4039_v37 = vpop.eup %4038 }
 0x36a   :  { %v4041_v39 = vpop.eup %4040  ;;  %v1597_v61 = vmul.f32 %v4039_v37, %v1593_v29  ;;  %4042 = vrcp.f32 %v1595_v57  ;;  %vm1602_vm0 = vweird.f32 %v4039_v37  ;;  %v1637_v3 = vand.u32 2147483648, %v1595_v57 }
 0x36b   :  { %v1612_v40 = vmul.f32 %v4041_v39, %v1594_v30  ;;  %4044 = vtanh.f32 %v1583_v33  ;;  %vm1617_vm1 = vweird.f32 %v4041_v39  ;;  %vm1603_vm4 = vmor %vm1601_vm2, %vm1602_vm0  ;;  %vm1631_vm9 = vweird.f32 %v1595_v57 }
 0x36c   :  { %v1598_v42 = vsub.f32 1.0, %v1597_v61  ;;  %vm1618_vm5 = vmor %vm1616_vm3, %vm1617_vm1  ;;  %v1635_v5 = vand.u32 2147483647, %v1595_v57  ;;  %v1638_v27 = vor.u32 1.1754944e-38, %v1637_v3  ;;  %v3545_v29 = vor.u32 %v3924_v23, %v3542_v25  ;;  %v3532_v61 = vld [vmem:[#allocation4 + $0xa8] sm:$0xf]  ;;  %2211 = vmatpush.bf16.msra.mxu3 %v3537_v46 }
 0x36d   :  { %v1613_v43 = vsub.f32 1.0, %v1612_v40  ;;  %v3549_v30 = vor.u32 %v3927_v28, %v3548_v26  ;;  %v3923_v40 = vld [vmem:[#allocation4 + $0xb4] sm:$0xf0]  ;;  %v3494_v3 = vld [vmem:[#allocation4 + $0x70] sm:$0xf0]  ;;  %v3481_v23 = vor.u32 %v3908_v16, %v3478_v18  ;;  %v1654_v26 = vunpack.c.l.bf16 %v4281_v12 }
 0x36e   :  { %v1599_v38 = vmul.f32 %v4039_v37, %v1598_v42  ;;  %vm1636_vm11 = vcmp.eq.f32.partialorder %v1635_v5, 8.507059e+37  ;;  %2184 = vmatpush.bf16.msra.mxu1 %v3545_v29  ;;  %v3500_v5 = vld [vmem:[#allocation4 + $0x68] sm:$0xf]  ;;  %v3909_v25 = vld [vmem:[#allocation4 + $0x4c] sm:$0xf] }
 0x36f   :  { %v1614_v47 = vmul.f32 %v4041_v39, %v1613_v43  ;;  %2197 = vmatpush.bf16.msra.mxu2 %v3549_v30  ;;  %v3533_v43 = vor.u32 %v3923_v40, %v3532_v61  ;;  %v3486_v28 = vld [vmem:[#allocation4 + $0x58] sm:$0xf0]  ;;  %v3460_v29 = vld [vmem:[#allocation4 + $0x20] sm:$0xf]  ;;  %v3906_v30 = vld [vmem:[#allocation4 + $0x2c] sm:$0xf0] }
 0x370   :  { %v4043_v41 = vpop.eup %4042  ;;  %v1600_v49 = vadd.f32 %v4039_v37, %v1599_v38  ;;  %v3306_v38 = vld [vmem:[%s4322_s0 + $0x50] sm:$0xff]  ;;  %v3489_v32 = vor.u32 %v3909_v25, %v3486_v28  ;;  %v3461_v34 = vor.u32 %v3906_v30, %v3460_v29  ;;  %v3470_v61 = vld [vmem:[#allocation4 + $0x38] sm:$0xf0]  ;;  %v3900_v46 = vld [vmem:[#allocation4 + $0x4] sm:$0xf] }
 0x371   :  { %v1627_v50 = vmul.f32 %v4043_v41, %v1595_v57  ;;  %v1615_v52 = vadd.f32 %v4041_v39, %v1614_v47  ;;  %v4045_v55 = vpop.eup %4044  ;;  %vm1632_vm8 = vweird.f32 %v4043_v41  ;;  %v3922_v57 = vld [vmem:[#allocation4 + $0xac] sm:$0xf0]  ;;  %v3508_v47 = vld [vmem:[#allocation4 + $0x80] sm:$0xf] }
 0x372   :  { %v1604_v54 = vsel %vm1603_vm4, %v4039_v37, %v1600_v49  ;;  %vm1633_vm10 = vmor %vm1631_vm9, %vm1632_vm8  ;;  %v3920_v37 = vld [vmem:[#allocation4 + $0xa4] sm:$0xf]  ;;  %v3525_v33 = vor.u32 %v3922_v57, %v3524_v36  ;;  %v3509_v49 = vor.u32 %v3918_v48, %v3508_v47  ;;  %v3462_v36 = vld [vmem:[#allocation4 + $0x30] sm:$0xf0] }
 0x373   :  { %v1628_v56 = vsub.f32 1.0, %v1627_v50  ;;  %v1609_v58 = vsel %vm1606_vm6, %v1608_v51, %v1604_v54  ;;  %v1619_v59 = vsel %vm1618_vm5, %v4041_v39, %v1615_v52  ;;  %v3526_v39 = vld [vmem:[#allocation4 + $0xb0] sm:$0xf0]  ;;  %2198 = vmatpush.bf16.msra.mxu2 %v3533_v43  ;;  %v3516_v51 = vld [vmem:[#allocation4 + $0x88] sm:$0xf] }
 0x374   :  { %v1624_v60 = vsel %vm1621_vm7, %v1623_v53, %v1619_v59  ;;  %v1643_v62 = vmul.f32 %v4045_v55, %v1609_v58  ;;  %v3529_v42 = vor.u32 %v3920_v37, %v3526_v39  ;;  %2172 = vmatpush.bf16.msra.mxu0 %v3525_v33  ;;  %v3510_v50 = vld [vmem:[#allocation4 + $0x90] sm:$0xf0]  ;;  %v3919_v52 = vld [vmem:[#allocation4 + $0x94] sm:$0xf0]  ;;  %v3917_v55 = vld [vmem:[#allocation4 + $0x8c] sm:$0xf]  ;;  %v1652_v59 = vunpack.c.l.bf16 %v3306_v38 }
 0x375   :  { %v1629_v63 = vmul.f32 %v4043_v41, %v1628_v56  ;;  %v1642_v0 = vmul.f32 %v1624_v60, %v4252_v31  ;;  %v3517_v54 = vor.u32 %v3919_v52, %v3516_v51  ;;  %v3518_v56 = vld [vmem:[#allocation4 + $0x98] sm:$0xf0]  ;;  %v1653_v60 = vunpack.c.h.bf16 %v3306_v38  ;;  %v3468_v57 = vld [vmem:[#allocation4 + $0x28] sm:$0xf]  ;;  %v3907_v33 = vld [vmem:[#allocation4 + $0x34] sm:$0xf0] }
 0x376   :  { %2185 = vmatpush.bf16.msra.mxu1 %v3529_v42  ;;  %v3521_v58 = vor.u32 %v3917_v55, %v3518_v56  ;;  %v3465_v37 = vor.u32 %v3904_v35, %v3462_v36  ;;  %v3905_v39 = vld [vmem:[#allocation4 + $0x2c] sm:$0xf]  ;;  %v3469_v43 = vor.u32 %v3907_v33, %v3468_v57  ;;  %v3902_v38 = vld [vmem:[#allocation4 + $0xc] sm:$0xf0]  ;;  %v3452_v51 = vld [vmem:[#allocation4 + $0x8] sm:$0xf] }
 0x377   :  { %v4269_v1 = vadd.f32 %v1643_v62, %v1642_v0  ;;  %v1630_v2 = vadd.f32 %v4043_v41, %v1629_v63  ;;  %2199 = vmatpush.bf16.msra.mxu2 %v3517_v54  ;;  %v3492_v62 = vld [vmem:[#allocation4 + $0x60] sm:$0xf]  ;;  %v3914_v63 = vld [vmem:[#allocation4 + $0x6c] sm:$0xf0]  ;;  %v3912_v0 = vld [vmem:[#allocation4 + $0x64] sm:$0xf]  ;;  %v3473_v44 = vor.u32 %v3905_v39, %v3470_v61 }
 0x378   :  { %2173 = vmatpush.bf16.msra.mxu0 %v3509_v49  ;;  %2212 = vmatpush.bf16.msra.mxu3 %v3521_v58  ;;  %v3445_v49 = vor.u32 %v3902_v38, %v3444_v45  ;;  %v3903_v52 = vld [vmem:[#allocation4 + $0x14] sm:$0xf0]  ;;  %v3901_v55 = vld [vmem:[#allocation4 + $0xc] sm:$0xf]  ;;  %v3454_v56 = vld [vmem:[#allocation4 + $0x18] sm:$0xf0] }
 0x379   :  { %4046 = vtanh.f32 %v4269_v1  ;;  %v1634_v6 = vsel %vm1633_vm10, %v4043_v41, %v1630_v2  ;;  %v3916_v41 = vld [vmem:[#allocation4 + $0x84] sm:$0xf]  ;;  %v3493_v2 = vor.u32 %v3914_v63, %v3492_v62  ;;  %v3453_v54 = vor.u32 %v3903_v52, %v3452_v51  ;;  %v3962_v45 = vld [vmem:[#allocation4 + $0xec] sm:$0xf0]  ;;  %v3961_v51 = vld [vmem:[#allocation4 + $0xec] sm:$0xf] }
 0x37a   :  { %v1639_v9 = vsel %vm1636_vm11, %v1638_v27, %v1634_v6  ;;  %v3513_v53 = vor.u32 %v3916_v41, %v3510_v50  ;;  %v3915_v6 = vld [vmem:[#allocation4 + $0x74] sm:$0xf0]  ;;  %v3497_v27 = vor.u32 %v3912_v0, %v3494_v3  ;;  %v3446_v50 = vld [vmem:[#allocation4 + $0x10] sm:$0xf0]  ;;  %v3960_v38 = vld [vmem:[#allocation4 + $0xe4] sm:$0xf] }
 0x37b   :  { %v3700_v52 = vld [vmem:[#allocation4 + $0xf8] sm:$0xf0] }
 0x37c   :  { %2186 = vmatpush.bf16.msra.mxu1 %v3513_v53  ;;  %2174 = vmatpush.bf16.msra.mxu0 %v3493_v2  ;;  %v3449_v53 = vor.u32 %v3900_v46, %v3446_v50 }
 0x37f   :  { %v4047_v7 = vpop.eup %4046 }
 0x380   :  { %v1646_v10 = vmul.f32 %v4047_v7, %v1639_v9  ;;  %v3501_v7 = vor.u32 %v3915_v6, %v3500_v5  ;;  %v3913_v9 = vld [vmem:[#allocation4 + $0x6c] sm:$0xf]  ;;  %2187 = vmatpush.bf16.msra.mxu1 %v3497_v27  ;;  %2175 = vmatpush.bf16.msra.mxu0 %v3477_v17  ;;  %v1655_v5 = vunpack.c.h.bf16 %v4281_v12 }
 0x382   :  { %3305 = vst [vmem:[%s4326_s4 + $0x20] sm:$0xff] %v1646_v10  ;;  %v1656_v31 = vpack.c.bf16 %v1646_v10, %v1646_v10  ;;  %v3502_v10 = vld [vmem:[#allocation4 + $0x78] sm:$0xf0]  ;;  %2200 = vmatpush.bf16.msra.mxu2 %v3501_v7 }
 0x383   :  { %v3505_v4 = vor.u32 %v3913_v9, %v3502_v10 }
 0x384   :  { %1857 = vmatmul.bf16.vlgmr.msrb.gmra.mxu0 %v1656_v31  ;;  %1870 = vmatmul.bf16.vlgmr.msrb.gmra.mxu1 %v1656_v31 }
 0x385   :  { %1883 = vmatmul.bf16.vlgmr.msrb.gmra.mxu2 %v1656_v31  ;;  %1896 = vmatmul.bf16.vlgmr.msrb.gmra.mxu3 %v1656_v31 }
 0x386   :  { %2213 = vmatpush.bf16.msra.mxu3 %v3505_v4  ;;  %2188 = vmatpush.bf16.msra.mxu1 %v3481_v23 }
 0x387   :  { %2201 = vmatpush.bf16.msra.mxu2 %v3485_v24  ;;  %2176 = vmatpush.bf16.msra.mxu0 %v3461_v34 }
 0x38a   :  { %2214 = vmatpush.bf16.msra.mxu3 %v3489_v32  ;;  %2189 = vmatpush.bf16.msra.mxu1 %v3465_v37 }
 0x38b   :  { %2202 = vmatpush.bf16.msra.mxu2 %v3469_v43  ;;  %2177 = vmatpush.bf16.msra.mxu0 %v3445_v49 }
 0x38e   :  { %2215 = vmatpush.bf16.msra.mxu3 %v3473_v44  ;;  %2190 = vmatpush.bf16.msra.mxu1 %v3449_v53  ;;  %v3690_v44 = vld [vmem:[#allocation4 + $0xe0] sm:$0xf]  ;;  %v3703_v53 = vor.u32 %v3961_v51, %v3700_v52  ;;  %v3612_v51 = vld [vmem:[#allocation4 + $0x50] sm:$0xf0]  ;;  %v3618_v52 = vld [vmem:[#allocation4 + $0x48] sm:$0xf] }
 0x38f   :  { %2203 = vmatpush.bf16.msra.mxu2 %v3453_v54  ;;  %v3691_v46 = vor.u32 %v3962_v45, %v3690_v44  ;;  %v3674_v54 = vld [vmem:[#allocation4 + $0xc0] sm:$0xf]  ;;  %v4298_v45 = vld [vmem:[%s4322_s0 + $0x68] sm:$0xff] }
 0x391   :  { %2491 = vmatpush.bf16.msrb.mxu0 %v3691_v46 }
 0x401   :  { %v1858_v31 = vpop.f32.mrf.mxu0  ;;  %v1871_v11 = vpop.f32.mrf.mxu1 }
 0x402   :  { %v1901_v13 = vadd.f32 %v1858_v31, %v1652_v59  ;;  %v1902_v14 = vadd.f32 %v1871_v11, %v1653_v60  ;;  %v3457_v60 = vor.u32 %v3901_v55, %v3454_v56  ;;  %v3958_v55 = vld [vmem:[#allocation4 + $0xcc] sm:$0xf0]  ;;  %v3956_v56 = vld [vmem:[#allocation4 + $0xc4] sm:$0xf] }
 0x404   :  { %v3436_v21 = vmul.f32 -1.442695, %v1901_v13  ;;  %v3437_v22 = vmul.f32 -1.442695, %v1902_v14  ;;  %2216 = vmatpush.bf16.msra.mxu3 %v3457_v60  ;;  %v3682_v60 = vld [vmem:[#allocation4 + $0xc8] sm:$0xf] }
 0x406   :  { %4048 = vpow2.f32 %v3436_v21 }
 0x407   :  { %4050 = vpow2.f32 %v3437_v22 }
 0x408   :  { %v1884_v40 = vpop.f32.mrf.mxu2  ;;  %v1897_v42 = vpop.f32.mrf.mxu3  ;;  %2530 = vmatpush.bf16.msrb.mxu3 %v3703_v53  ;;  %v3943_v53 = vld [vmem:[#allocation4 + $0x54] sm:$0xf0] }
 0x409   :  { %v1903_v47 = vadd.f32 %v1884_v40, %v1654_v26  ;;  %v1860_v48 = vpop.f32.mrf.mxu0  ;;  %v1873_v41 = vpop.f32.mrf.mxu1  ;;  %v1904_v9 = vadd.f32 %v1897_v42, %v1655_v5 }
 0x40a   :  { %v3698_v48 = vld [vmem:[#allocation4 + $0xe8] sm:$0xf]  ;;  %v3963_v41 = vld [vmem:[#allocation4 + $0xf4] sm:$0xf0] }
 0x40b   :  { %v3438_v58 = vmul.f32 -1.442695, %v1903_v47  ;;  %v3692_v47 = vld [vmem:[#allocation4 + $0xf0] sm:$0xf0]  ;;  %v3699_v50 = vor.u32 %v3963_v41, %v3698_v48  ;;  %v3610_v48 = vld [vmem:[#allocation4 + $0x40] sm:$0xf] }
 0x40c   :  { %v4049_v59 = vpop.eup %4048  ;;  %v3695_v49 = vor.u32 %v3960_v38, %v3692_v47  ;;  %v3942_v41 = vld [vmem:[#allocation4 + $0x4c] sm:$0xf0] }
 0x40d   :  { %v4051_v62 = vpop.eup %4050  ;;  %v1914_v63 = vadd.f32 1.0, %v4049_v59  ;;  %4052 = vpow2.f32 %v3438_v58  ;;  %2517 = vmatpush.bf16.msrb.mxu2 %v3699_v50  ;;  %v3675_v58 = vor.u32 %v3958_v55, %v3674_v54  ;;  %v3676_v59 = vld [vmem:[#allocation4 + $0xd0] sm:$0xf0]  ;;  %v3611_v50 = vor.u32 %v3942_v41, %v3610_v48 }
 0x40e   :  { %v1915_v0 = vadd.f32 1.0, %v4051_v62  ;;  %2504 = vmatpush.bf16.msrb.mxu1 %v3695_v49  ;;  %v3959_v62 = vld [vmem:[#allocation4 + $0xd4] sm:$0xf0]  ;;  %v3940_v49 = vld [vmem:[#allocation4 + $0x44] sm:$0xf] }
 0x40f   :  { %4054 = vrcp.f32 %v1914_v63  ;;  %v1928_v14 = vand.u32 2147483648, %v1914_v63  ;;  %v1926_v16 = vand.u32 2147483647, %v1914_v63  ;;  %vm1922_vm14 = vweird.f32 %v1914_v63  ;;  %2492 = vmatpush.bf16.msrb.mxu0 %v3675_v58 }
 0x410   :  { %4056 = vrcp.f32 %v1915_v0  ;;  %v1886_v2 = vpop.f32.mrf.mxu2  ;;  %v1899_v3 = vpop.f32.mrf.mxu3  ;;  %v1943_v15 = vand.u32 2147483648, %v1915_v0  ;;  %v1941_v18 = vand.u32 2147483647, %v1915_v0  ;;  %vm1937_vm15 = vweird.f32 %v1915_v0 }
 0x411   :  { %v1929_v21 = vor.u32 1.1754944e-38, %v1928_v14  ;;  %vm1927_vm2 = vcmp.eq.f32.partialorder %v1926_v16, 8.507059e+37  ;;  %v3957_v2 = vld [vmem:[#allocation4 + $0xcc] sm:$0xf]  ;;  %v3684_v3 = vld [vmem:[#allocation4 + $0xd8] sm:$0xf0]  ;;  %v3619_v58 = vor.u32 %v3943_v53, %v3618_v52 }
 0x412   :  { %v1944_v23 = vor.u32 1.1754944e-38, %v1943_v15  ;;  %vm1942_vm3 = vcmp.eq.f32.partialorder %v1941_v18, 8.507059e+37  ;;  %v3687_v5 = vor.u32 %v3957_v2, %v3684_v3  ;;  %v3953_v14 = vld [vmem:[#allocation4 + $0xac] sm:$0xf]  ;;  %v3668_v15 = vld [vmem:[#allocation4 + $0xb8] sm:$0xf0] }
 0x413   :  { %v4053_v6 = vpop.eup %4052  ;;  %v3671_v16 = vor.u32 %v3953_v14, %v3668_v15  ;;  %v3950_v18 = vld [vmem:[#allocation4 + $0x8c] sm:$0xf0]  ;;  %v3578_v15 = vld [vmem:[#allocation4] sm:$0xf] }
 0x414   :  { %v1916_v27 = vadd.f32 1.0, %v4053_v6  ;;  %v3658_v6 = vld [vmem:[#allocation4 + $0xa0] sm:$0xf]  ;;  %2531 = vmatpush.bf16.msrb.mxu3 %v3687_v5  ;;  %v3936_v5 = vld [vmem:[#allocation4 + $0x24] sm:$0xf] }
 0x415   :  { %v4055_v7 = vpop.eup %4054 }
 0x416   :  { %v4057_v10 = vpop.eup %4056  ;;  %v1918_v31 = vmul.f32 %v4055_v7, %v1914_v63  ;;  %4058 = vrcp.f32 %v1916_v27  ;;  %vm1923_vm12 = vweird.f32 %v4055_v7  ;;  %v1958_v37 = vand.u32 2147483648, %v1916_v27 }
 0x417   :  { %v1933_v11 = vmul.f32 %v4057_v10, %v1915_v0  ;;  %4060 = vtanh.f32 %v1904_v9  ;;  %vm1938_vm13 = vweird.f32 %v4057_v10  ;;  %vm1924_vm0 = vmor %vm1922_vm14, %vm1923_vm12  ;;  %vm1952_vm5 = vweird.f32 %v1916_v27 }
 0x418   :  { %v1919_v4 = vsub.f32 1.0, %v1918_v31  ;;  %vm1939_vm1 = vmor %vm1937_vm15, %vm1938_vm13  ;;  %v1956_v33 = vand.u32 2147483647, %v1916_v27  ;;  %v1959_v61 = vor.u32 1.1754944e-38, %v1958_v37  ;;  %v3679_v63 = vor.u32 %v3956_v56, %v3676_v59  ;;  %v3666_v31 = vld [vmem:[#allocation4 + $0xa8] sm:$0xf]  ;;  %2532 = vmatpush.bf16.msrb.mxu3 %v3671_v16 }
 0x419   :  { %v1934_v13 = vsub.f32 1.0, %v1933_v11  ;;  %v3683_v0 = vor.u32 %v3959_v62, %v3682_v60  ;;  %v3955_v11 = vld [vmem:[#allocation4 + $0xb4] sm:$0xf0]  ;;  %v3628_v37 = vld [vmem:[#allocation4 + $0x70] sm:$0xf0]  ;;  %v3615_v56 = vor.u32 %v3940_v49, %v3612_v51  ;;  %v1975_v60 = vunpack.c.l.bf16 %v4298_v45 }
 0x41a   :  { %v1920_v8 = vmul.f32 %v4055_v7, %v1919_v4  ;;  %vm1957_vm7 = vcmp.eq.f32.partialorder %v1956_v33, 8.507059e+37  ;;  %2505 = vmatpush.bf16.msrb.mxu1 %v3679_v63  ;;  %v3634_v33 = vld [vmem:[#allocation4 + $0x68] sm:$0xf]  ;;  %v3941_v59 = vld [vmem:[#allocation4 + $0x4c] sm:$0xf] }
 0x41b   :  { %v1935_v17 = vmul.f32 %v4057_v10, %v1934_v13  ;;  %2518 = vmatpush.bf16.msrb.mxu2 %v3683_v0  ;;  %v3667_v13 = vor.u32 %v3955_v11, %v3666_v31  ;;  %v3620_v62 = vld [vmem:[#allocation4 + $0x58] sm:$0xf0]  ;;  %v3594_v63 = vld [vmem:[#allocation4 + $0x20] sm:$0xf]  ;;  %v3938_v0 = vld [vmem:[#allocation4 + $0x2c] sm:$0xf0] }
 0x41c   :  { %v4059_v12 = vpop.eup %4058  ;;  %v1921_v19 = vadd.f32 %v4055_v7, %v1920_v8  ;;  %v3440_v8 = vld [vmem:[%s4322_s0 + $0x60] sm:$0xff]  ;;  %v3623_v2 = vor.u32 %v3941_v59, %v3620_v62  ;;  %v3595_v3 = vor.u32 %v3938_v0, %v3594_v63  ;;  %v3604_v31 = vld [vmem:[#allocation4 + $0x38] sm:$0xf0] }
 0x41d   :  { %v1948_v20 = vmul.f32 %v4059_v12, %v1916_v27  ;;  %v1936_v22 = vadd.f32 %v4057_v10, %v1935_v17  ;;  %v4061_v25 = vpop.eup %4060  ;;  %vm1953_vm4 = vweird.f32 %v4059_v12  ;;  %v3954_v27 = vld [vmem:[#allocation4 + $0xac] sm:$0xf0]  ;;  %v3642_v17 = vld [vmem:[#allocation4 + $0x80] sm:$0xf]  ;;  %v3932_v16 = vld [vmem:[#allocation4 + $0x4] sm:$0xf] }
 0x41e   :  { %v1925_v24 = vsel %vm1924_vm0, %v4055_v7, %v1921_v19  ;;  %vm1954_vm6 = vmor %vm1952_vm5, %vm1953_vm4  ;;  %v3952_v7 = vld [vmem:[#allocation4 + $0xa4] sm:$0xf]  ;;  %v3659_v9 = vor.u32 %v3954_v27, %v3658_v6  ;;  %v3643_v19 = vor.u32 %v3950_v18, %v3642_v17  ;;  %v3596_v6 = vld [vmem:[#allocation4 + $0x30] sm:$0xf0] }
 0x41f   :  { %v1949_v26 = vsub.f32 1.0, %v1948_v20  ;;  %v1930_v28 = vsel %vm1927_vm2, %v1929_v21, %v1925_v24  ;;  %v1940_v29 = vsel %vm1939_vm1, %v4057_v10, %v1936_v22  ;;  %v3660_v10 = vld [vmem:[#allocation4 + $0xb0] sm:$0xf0]  ;;  %2519 = vmatpush.bf16.msrb.mxu2 %v3667_v13  ;;  %v3650_v21 = vld [vmem:[#allocation4 + $0x88] sm:$0xf] }
 0x420   :  { %v1945_v30 = vsel %vm1942_vm3, %v1944_v23, %v1940_v29  ;;  %v1964_v32 = vmul.f32 %v4061_v25, %v1930_v28  ;;  %v3663_v4 = vor.u32 %v3952_v7, %v3660_v10  ;;  %2493 = vmatpush.bf16.msrb.mxu0 %v3659_v9  ;;  %v3644_v20 = vld [vmem:[#allocation4 + $0x90] sm:$0xf0]  ;;  %v3951_v22 = vld [vmem:[#allocation4 + $0x94] sm:$0xf0]  ;;  %v3949_v25 = vld [vmem:[#allocation4 + $0x8c] sm:$0xf]  ;;  %v1973_v29 = vunpack.c.l.bf16 %v3440_v8 }
 0x421   :  { %v1950_v34 = vmul.f32 %v4059_v12, %v1949_v26  ;;  %v1963_v35 = vmul.f32 %v1945_v30, %v4269_v1  ;;  %v3651_v24 = vor.u32 %v3951_v22, %v3650_v21  ;;  %v3652_v26 = vld [vmem:[#allocation4 + $0x98] sm:$0xf0]  ;;  %v1974_v30 = vunpack.c.h.bf16 %v3440_v8  ;;  %v3602_v27 = vld [vmem:[#allocation4 + $0x28] sm:$0xf]  ;;  %v3939_v9 = vld [vmem:[#allocation4 + $0x34] sm:$0xf0] }
 0x422   :  { %2506 = vmatpush.bf16.msrb.mxu1 %v3663_v4  ;;  %v3655_v28 = vor.u32 %v3949_v25, %v3652_v26  ;;  %v3599_v7 = vor.u32 %v3936_v5, %v3596_v6  ;;  %v3937_v10 = vld [vmem:[#allocation4 + $0x2c] sm:$0xf]  ;;  %v3603_v13 = vor.u32 %v3939_v9, %v3602_v27  ;;  %v3934_v8 = vld [vmem:[#allocation4 + $0xc] sm:$0xf0]  ;;  %v3586_v21 = vld [vmem:[#allocation4 + $0x8] sm:$0xf] }
 0x423   :  { %v4286_v36 = vadd.f32 %v1964_v32, %v1963_v35  ;;  %v1951_v57 = vadd.f32 %v4059_v12, %v1950_v34  ;;  %2520 = vmatpush.bf16.msrb.mxu2 %v3651_v24  ;;  %v3626_v32 = vld [vmem:[#allocation4 + $0x60] sm:$0xf]  ;;  %v3946_v34 = vld [vmem:[#allocation4 + $0x6c] sm:$0xf0]  ;;  %v3944_v35 = vld [vmem:[#allocation4 + $0x64] sm:$0xf]  ;;  %v3607_v14 = vor.u32 %v3937_v10, %v3604_v31 }
 0x424   :  { %2494 = vmatpush.bf16.msrb.mxu0 %v3643_v19  ;;  %2533 = vmatpush.bf16.msrb.mxu3 %v3655_v28  ;;  %v3579_v19 = vor.u32 %v3934_v8, %v3578_v15  ;;  %v3935_v22 = vld [vmem:[#allocation4 + $0x14] sm:$0xf0]  ;;  %v3933_v25 = vld [vmem:[#allocation4 + $0xc] sm:$0xf]  ;;  %v3588_v26 = vld [vmem:[#allocation4 + $0x18] sm:$0xf0] }
 0x425   :  { %4062 = vtanh.f32 %v4286_v36  ;;  %v1955_v39 = vsel %vm1954_vm6, %v4059_v12, %v1951_v57  ;;  %v3948_v12 = vld [vmem:[#allocation4 + $0x84] sm:$0xf]  ;;  %v3627_v57 = vor.u32 %v3946_v34, %v3626_v32  ;;  %v3587_v24 = vor.u32 %v3935_v22, %v3586_v21 }
 0x426   :  { %v1960_v42 = vsel %vm1957_vm7, %v1959_v61, %v1955_v39  ;;  %v3647_v23 = vor.u32 %v3948_v12, %v3644_v20  ;;  %v3947_v39 = vld [vmem:[#allocation4 + $0x74] sm:$0xf0]  ;;  %v3631_v61 = vor.u32 %v3944_v35, %v3628_v37  ;;  %v3580_v20 = vld [vmem:[#allocation4 + $0x10] sm:$0xf0] }
 0x428   :  { %2507 = vmatpush.bf16.msrb.mxu1 %v3647_v23  ;;  %2495 = vmatpush.bf16.msrb.mxu0 %v3627_v57  ;;  %v3583_v23 = vor.u32 %v3932_v16, %v3580_v20 }
 0x42b   :  { %v4063_v40 = vpop.eup %4062 }
 0x42c   :  { %v1967_v43 = vmul.f32 %v4063_v40, %v1960_v42  ;;  %v3635_v40 = vor.u32 %v3947_v39, %v3634_v33  ;;  %v3945_v42 = vld [vmem:[#allocation4 + $0x6c] sm:$0xf]  ;;  %2508 = vmatpush.bf16.msrb.mxu1 %v3631_v61  ;;  %2496 = vmatpush.bf16.msrb.mxu0 %v3611_v50  ;;  %v1976_v33 = vunpack.c.h.bf16 %v4298_v45 }
 0x42e   :  { %3439 = vst [vmem:[%s4326_s4 + $0x28] sm:$0xff] %v1967_v43  ;;  %v1977_v1 = vpack.c.bf16 %v1967_v43, %v1967_v43  ;;  %v3636_v43 = vld [vmem:[#allocation4 + $0x78] sm:$0xf0]  ;;  %2521 = vmatpush.bf16.msrb.mxu2 %v3635_v40 }
 0x42f   :  { %v3639_v38 = vor.u32 %v3945_v42, %v3636_v43 }
 0x430   :  { %2178 = vmatmul.bf16.vlgmr.msra.gmra.mxu0 %v1977_v1  ;;  %2191 = vmatmul.bf16.vlgmr.msra.gmra.mxu1 %v1977_v1 }
 0x431   :  { %2204 = vmatmul.bf16.vlgmr.msra.gmra.mxu2 %v1977_v1  ;;  %2217 = vmatmul.bf16.vlgmr.msra.gmra.mxu3 %v1977_v1 }
 0x432   :  { %2534 = vmatpush.bf16.msrb.mxu3 %v3639_v38  ;;  %2509 = vmatpush.bf16.msrb.mxu1 %v3615_v56 }
 0x433   :  { %2522 = vmatpush.bf16.msrb.mxu2 %v3619_v58  ;;  %2497 = vmatpush.bf16.msrb.mxu0 %v3595_v3 }
 0x436   :  { %2535 = vmatpush.bf16.msrb.mxu3 %v3623_v2  ;;  %2510 = vmatpush.bf16.msrb.mxu1 %v3599_v7 }
 0x437   :  { %2523 = vmatpush.bf16.msrb.mxu2 %v3603_v13  ;;  %2498 = vmatpush.bf16.msrb.mxu0 %v3579_v19  ;;  %v3575_v19 = vld [vmem:[%s4322_s0 + $0x78] sm:$0xff] }
 0x438   :  { %v2296_v22 = vunpack.c.l.bf16 %v3575_v19 }
 0x43a   :  { %2536 = vmatpush.bf16.msrb.mxu3 %v3607_v14  ;;  %2511 = vmatpush.bf16.msrb.mxu1 %v3583_v23  ;;  %v3574_v14 = vld [vmem:[%s4322_s0 + $0x70] sm:$0xff]  ;;  %s4151_s0 = smov [#allocation7]  }
 0x43b   :  { %2524 = vmatpush.bf16.msrb.mxu2 %v3587_v24  ;;  %v2294_v15 = vunpack.c.l.bf16 %v3574_v14  ;;  %v2295_v8 = vunpack.c.h.bf16 %v3574_v14  ;;  %s2625_s19 = sshll.u32 %s4151_s0, 4  ;;  %s2626_s19 = int_to_ptr.vmem [resolvable:$true] %s2625_s19 }
 0x4ad   :  { %v2179_v1 = vpop.f32.mrf.mxu0  ;;  %v2192_v44 = vpop.f32.mrf.mxu1 }
 0x4ae   :  { %v2222_v46 = vadd.f32 %v2179_v1, %v1973_v29  ;;  %v2223_v47 = vadd.f32 %v2192_v44, %v1974_v30  ;;  %v3591_v30 = vor.u32 %v3933_v25, %v3588_v26 }
 0x4b0   :  { %v3570_v54 = vmul.f32 -1.442695, %v2222_v46  ;;  %v3571_v55 = vmul.f32 -1.442695, %v2223_v47  ;;  %2537 = vmatpush.bf16.msrb.mxu3 %v3591_v30 }
 0x4b2   :  { %4064 = vpow2.f32 %v3570_v54 }
 0x4b3   :  { %4066 = vpow2.f32 %v3571_v55 }
 0x4b4   :  { %v2205_v11 = vpop.f32.mrf.mxu2  ;;  %v2218_v4 = vpop.f32.mrf.mxu3 }
 0x4b5   :  { %v2224_v17 = vadd.f32 %v2205_v11, %v1975_v60  ;;  %v2181_v18 = vpop.f32.mrf.mxu0  ;;  %v2194_v12 = vpop.f32.mrf.mxu1  ;;  %v2225_v42 = vadd.f32 %v2218_v4, %v1976_v33  ;;  %v2297_v33 = vunpack.c.h.bf16 %v3575_v19 }
 0x4b7   :  { %v3572_v28 = vmul.f32 -1.442695, %v2224_v17 }
 0x4b8   :  { %v4065_v29 = vpop.eup %4064 }
 0x4b9   :  { %v4067_v32 = vpop.eup %4066  ;;  %v2235_v34 = vadd.f32 1.0, %v4065_v29  ;;  %4068 = vpow2.f32 %v3572_v28 }
 0x4ba   :  { %v2236_v35 = vadd.f32 1.0, %v4067_v32 }
 0x4bb   :  { %4070 = vrcp.f32 %v2235_v34  ;;  %v2249_v47 = vand.u32 2147483648, %v2235_v34  ;;  %v2247_v49 = vand.u32 2147483647, %v2235_v34  ;;  %vm2243_vm10 = vweird.f32 %v2235_v34 }
 0x4bc   :  { %4072 = vrcp.f32 %v2236_v35  ;;  %v2207_v57 = vpop.f32.mrf.mxu2  ;;  %v2220_v37 = vpop.f32.mrf.mxu3  ;;  %v2264_v48 = vand.u32 2147483648, %v2236_v35  ;;  %v2262_v51 = vand.u32 2147483647, %v2236_v35  ;;  %vm2258_vm11 = vweird.f32 %v2236_v35 }
 0x4bd   :  { %v2250_v54 = vor.u32 1.1754944e-38, %v2249_v47  ;;  %vm2248_vm14 = vcmp.eq.f32.partialorder %v2247_v49, 8.507059e+37 }
 0x4be   :  { %v2265_v56 = vor.u32 1.1754944e-38, %v2264_v48  ;;  %vm2263_vm15 = vcmp.eq.f32.partialorder %v2262_v51, 8.507059e+37 }
 0x4bf   :  { %v4069_v39 = vpop.eup %4068 }
 0x4c0   :  { %v2237_v61 = vadd.f32 1.0, %v4069_v39 }
 0x4c1   :  { %v4071_v40 = vpop.eup %4070 }
 0x4c2   :  { %v4073_v43 = vpop.eup %4072  ;;  %v2239_v1 = vmul.f32 %v4071_v40, %v2235_v34  ;;  %4074 = vrcp.f32 %v2237_v61  ;;  %vm2244_vm8 = vweird.f32 %v4071_v40  ;;  %v2279_v7 = vand.u32 2147483648, %v2237_v61 }
 0x4c3   :  { %v2254_v44 = vmul.f32 %v4073_v43, %v2236_v35  ;;  %4076 = vtanh.f32 %v2225_v42  ;;  %vm2259_vm9 = vweird.f32 %v4073_v43  ;;  %vm2245_vm12 = vmor %vm2243_vm10, %vm2244_vm8  ;;  %vm2273_vm1 = vweird.f32 %v2237_v61 }
 0x4c4   :  { %v2240_v38 = vsub.f32 1.0, %v2239_v1  ;;  %vm2260_vm13 = vmor %vm2258_vm11, %vm2259_vm9  ;;  %v2277_v9 = vand.u32 2147483647, %v2237_v61  ;;  %v2280_v31 = vor.u32 1.1754944e-38, %v2279_v7 }
 0x4c5   :  { %v2255_v46 = vsub.f32 1.0, %v2254_v44 }
 0x4c6   :  { %v2241_v41 = vmul.f32 %v4071_v40, %v2240_v38  ;;  %vm2278_vm3 = vcmp.eq.f32.partialorder %v2277_v9, 8.507059e+37 }
 0x4c7   :  { %v2256_v50 = vmul.f32 %v4073_v43, %v2255_v46 }
 0x4c8   :  { %v4075_v45 = vpop.eup %4074  ;;  %v2242_v52 = vadd.f32 %v4071_v40, %v2241_v41 }
 0x4c9   :  { %v2269_v53 = vmul.f32 %v4075_v45, %v2237_v61  ;;  %v2257_v55 = vadd.f32 %v4073_v43, %v2256_v50  ;;  %v4077_v59 = vpop.eup %4076  ;;  %vm2274_vm0 = vweird.f32 %v4075_v45 }
 0x4ca   :  { %v2246_v58 = vsel %vm2245_vm12, %v4071_v40, %v2242_v52  ;;  %vm2275_vm2 = vmor %vm2273_vm1, %vm2274_vm0 }
 0x4cb   :  { %v2270_v60 = vsub.f32 1.0, %v2269_v53  ;;  %v2251_v62 = vsel %vm2248_vm14, %v2250_v54, %v2246_v58  ;;  %v2261_v63 = vsel %vm2260_vm13, %v4073_v43, %v2257_v55 }
 0x4cc   :  { %v2266_v0 = vsel %vm2263_vm15, %v2265_v56, %v2261_v63  ;;  %v2285_v2 = vmul.f32 %v4077_v59, %v2251_v62 }
 0x4cd   :  { %v2271_v3 = vmul.f32 %v4075_v45, %v2270_v60  ;;  %v2284_v5 = vmul.f32 %v2266_v0, %v4286_v36 }
 0x4cf   :  { %v4303_v6 = vadd.f32 %v2285_v2, %v2284_v5  ;;  %v2272_v27 = vadd.f32 %v4075_v45, %v2271_v3 }
 0x4d1   :  { %4078 = vtanh.f32 %v4303_v6  ;;  %v2276_v10 = vsel %vm2275_vm2, %v4075_v45, %v2272_v27 }
 0x4d2   :  { %v2281_v4 = vsel %vm2278_vm3, %v2280_v31, %v2276_v10 }
 0x4d7   :  { %v4079_v11 = vpop.eup %4078 }
 0x4d8   :  { %v2288_v13 = vmul.f32 %v4079_v11, %v2281_v4 }
 0x4da   :  { %3573 = vst [vmem:[%s4326_s4 + $0x30] sm:$0xff] %v2288_v13  ;;  %v2298_v36 = vpack.c.bf16 %v2288_v13, %v2288_v13 }
 0x4dc   :  { %2499 = vmatmul.bf16.vlgmr.msrb.gmra.mxu0 %v2298_v36  ;;  %2512 = vmatmul.bf16.vlgmr.msrb.gmra.mxu1 %v2298_v36 }
 0x4dd   :  { %2525 = vmatmul.bf16.vlgmr.msrb.gmra.mxu2 %v2298_v36  ;;  %2538 = vmatmul.bf16.vlgmr.msrb.gmra.mxu3 %v2298_v36 }
 0x559   :  { %v2500_v16 = vpop.f32.mrf.mxu0  ;;  %v2513_v17 = vpop.f32.mrf.mxu1 }
 0x55a   :  { %v2543_v18 = vadd.f32 %v2500_v16, %v2294_v15  ;;  %v2544_v12 = vadd.f32 %v2513_v17, %v2295_v8 }
 0x55c   :  { %v3704_v20 = vmul.f32 -1.442695, %v2543_v18  ;;  %v3705_v21 = vmul.f32 -1.442695, %v2544_v12 }
 0x55e   :  { %4080 = vpow2.f32 %v3704_v20 }
 0x55f   :  { %4082 = vpow2.f32 %v3705_v21 }
 0x560   :  { %v2526_v23 = vpop.f32.mrf.mxu2  ;;  %v2539_v24 = vpop.f32.mrf.mxu3 }
 0x561   :  { %v2545_v25 = vadd.f32 %v2526_v23, %v2296_v22  ;;  %v2502_v26 = vpop.f32.mrf.mxu0  ;;  %v2515_v28 = vpop.f32.mrf.mxu1  ;;  %v2546_v42 = vadd.f32 %v2539_v24, %v2297_v33 }
 0x563   :  { %v3706_v29 = vmul.f32 -1.442695, %v2545_v25 }
 0x564   :  { %v4081_v30 = vpop.eup %4080 }
 0x565   :  { %v4083_v32 = vpop.eup %4082  ;;  %v2556_v34 = vadd.f32 1.0, %v4081_v30  ;;  %4084 = vpow2.f32 %v3706_v29 }
 0x566   :  { %v2557_v35 = vadd.f32 1.0, %v4083_v32 }
 0x567   :  { %4086 = vrcp.f32 %v2556_v34  ;;  %v2570_v47 = vand.u32 2147483648, %v2556_v34  ;;  %v2568_v41 = vand.u32 2147483647, %v2556_v34  ;;  %vm2564_vm6 = vweird.f32 %v2556_v34 }
 0x568   :  { %4088 = vrcp.f32 %v2557_v35  ;;  %v2528_v57 = vpop.f32.mrf.mxu2  ;;  %v2541_v37 = vpop.f32.mrf.mxu3  ;;  %v2585_v49 = vand.u32 2147483648, %v2557_v35  ;;  %v2583_v51 = vand.u32 2147483647, %v2557_v35  ;;  %vm2579_vm8 = vweird.f32 %v2557_v35 }
 0x569   :  { %v2571_v54 = vor.u32 1.1754944e-38, %v2570_v47  ;;  %vm2569_vm9 = vcmp.eq.f32.partialorder %v2568_v41, 8.507059e+37 }
 0x56a   :  { %v2586_v58 = vor.u32 1.1754944e-38, %v2585_v49  ;;  %vm2584_vm11 = vcmp.eq.f32.partialorder %v2583_v51, 8.507059e+37 }
 0x56b   :  { %v4085_v39 = vpop.eup %4084 }
 0x56c   :  { %v2558_v61 = vadd.f32 1.0, %v4085_v39 }
 0x56d   :  { %v4087_v40 = vpop.eup %4086 }
 0x56e   :  { %v4089_v43 = vpop.eup %4088  ;;  %v2560_v1 = vmul.f32 %v4087_v40, %v2556_v34  ;;  %4090 = vrcp.f32 %v2558_v61  ;;  %vm2565_vm4 = vweird.f32 %v4087_v40  ;;  %v2600_v9 = vand.u32 2147483648, %v2558_v61 }
 0x56f   :  { %v2575_v44 = vmul.f32 %v4089_v43, %v2557_v35  ;;  %4092 = vtanh.f32 %v2546_v42  ;;  %vm2580_vm5 = vweird.f32 %v4089_v43  ;;  %vm2566_vm7 = vmor %vm2564_vm6, %vm2565_vm4  ;;  %vm2594_vm13 = vweird.f32 %v2558_v61 }
 0x570   :  { %v2561_v38 = vsub.f32 1.0, %v2560_v1  ;;  %vm2581_vm10 = vmor %vm2579_vm8, %vm2580_vm5  ;;  %v2598_v10 = vand.u32 2147483647, %v2558_v61  ;;  %v2601_v11 = vor.u32 1.1754944e-38, %v2600_v9 }
 0x571   :  { %v2576_v46 = vsub.f32 1.0, %v2575_v44 }
 0x572   :  { %v2562_v48 = vmul.f32 %v4087_v40, %v2561_v38  ;;  %vm2599_vm15 = vcmp.eq.f32.partialorder %v2598_v10, 8.507059e+37 }
 0x573   :  { %v2577_v50 = vmul.f32 %v4089_v43, %v2576_v46 }
 0x574   :  { %v4091_v45 = vpop.eup %4090  ;;  %v2563_v52 = vadd.f32 %v4087_v40, %v2562_v48 }
 0x575   :  { %v2590_v53 = vmul.f32 %v4091_v45, %v2558_v61  ;;  %v2578_v55 = vadd.f32 %v4089_v43, %v2577_v50  ;;  %v4093_v59 = vpop.eup %4092  ;;  %vm2595_vm12 = vweird.f32 %v4091_v45 }
 0x576   :  { %v2567_v56 = vsel %vm2566_vm7, %v4087_v40, %v2563_v52  ;;  %vm2596_vm14 = vmor %vm2594_vm13, %vm2595_vm12 }
 0x577   :  { %v2591_v60 = vsub.f32 1.0, %v2590_v53  ;;  %v2572_v62 = vsel %vm2569_vm9, %v2571_v54, %v2567_v56  ;;  %v2582_v63 = vsel %vm2581_vm10, %v4089_v43, %v2578_v55 }
 0x578   :  { %v2587_v0 = vsel %vm2584_vm11, %v2586_v58, %v2582_v63  ;;  %v2606_v2 = vmul.f32 %v4093_v59, %v2572_v62 }
 0x579   :  { %v2592_v3 = vmul.f32 %v4091_v45, %v2591_v60  ;;  %v2605_v5 = vmul.f32 %v2587_v0, %v4303_v6 }
 0x57b   :  { %v2607_v27 = vadd.f32 %v2606_v2, %v2605_v5  ;;  %v2593_v7 = vadd.f32 %v4091_v45, %v2592_v3 }
 0x57d   :  { %4094 = vtanh.f32 %v2607_v27  ;;  %2617 = vst [vmem:[#allocation7] sm:$0xff] %v2607_v27  ;;  %v2597_v31 = vsel %vm2596_vm14, %v4091_v45, %v2593_v7 }
 0x57e   :  { %2630 = dma.vmem_to_hbm [thread:$0]  %s2626_s19, 128, %s2628_s22, [#allocation6]   ;;  %v2602_v13 = vsel %vm2599_vm15, %v2601_v11, %v2597_v31 }
 0x583   :  { %v4095_v4 = vpop.eup %4094 }
 0x584   :  { %v2609_v36 = vmul.f32 %v4095_v4, %v2602_v13 }
 0x586   :  { %3707 = vst [vmem:[%s4326_s4 + $0x38] sm:$0xff] %v2609_v36 }
 0x587   :  { %4146 = dma.done.wait [#allocation6], 128  }
 0x588   :  { %4147 = vsyncadd [#allocation6], 4294967168 }
 0x589   :  { %2637 = vsyncpa [#allocation5], 1 }
 0x58a   :  { %2638 = vsyncpa [#allocation6], 1 }

</bundles_post_ra>
